<compile_context>
chip_gen: v6e
topology: v6e:2x2x1
jax: 0.10.0
libtpu: 0.0.40
codegen_flags: <defaults>
</compile_context>

<pallas_src>
import numpy as np
import jax
import jax.numpy as jnp
from jax import lax
from jax.experimental import pallas as pl
from jax.experimental.pallas import tpu as pltpu


# ------------------------- in-kernel math helpers -------------------------

def _erf(x):
    # Abramowitz & Stegun 7.1.26 rational approximation (max abs err ~1.5e-7);
    # keeps nn.GELU's exact-erf semantics; exp() lands on the EUP.
    # TODO(synk): on v5e, if the VALU slot saturates, switch to tanh-GELU (EUP).
    a1, a2, a3, a4, a5 = (0.254829592, -0.284496736, 1.421413741,
                          -1.453152027, 1.061405429)
    p = 0.3275911
    sgn = jnp.sign(x)
    ax = jnp.abs(x)
    t = 1.0 / (1.0 + p * ax)
    poly = ((((a5 * t + a4) * t + a3) * t + a2) * t + a1) * t
    return sgn * (1.0 - poly * jnp.exp(-ax * ax))


def _gelu_exact(x):
    return 0.5 * x * (1.0 + _erf(x * np.float32(1.0 / np.sqrt(2.0))))


def _layer_norm(x, w, b, eps=1e-5):
    mean = jnp.mean(x, axis=-1, keepdims=True)
    xc = x - mean
    var = jnp.mean(xc * xc, axis=-1, keepdims=True)
    return xc * lax.rsqrt(var + eps) * w + b


# ------------------------------ Pallas kernels ------------------------------

def _qkv_kernel(x_ref, ln1_w_ref, ln1_b_ref, wqkv_ref, bqkv_ref,
                q_ref, k_ref, v_ref):
    """LN1 + fused QKV projection; lane-dense (seq, D) writes per output."""
    f32, bf16 = jnp.float32, jnp.bfloat16
    D = x_ref.shape[-1]
    xn = _layer_norm(x_ref[0], ln1_w_ref[...], ln1_b_ref[...])
    qkv = jnp.dot(xn.astype(bf16), wqkv_ref[...],
                  preferred_element_type=f32) + bqkv_ref[...]          # (ts, 3D)
    # 1/sqrt(dh) is already folded into the Q columns of Wqkv / bqkv on the host.
    q_ref[0] = qkv[:, 0:D].astype(q_ref.dtype)          # bf16 (MXU operand later)
    k_ref[0] = qkv[:, D:2 * D].astype(k_ref.dtype)      # f32 KV cache
    v_ref[0] = qkv[:, 2 * D:3 * D].astype(v_ref.dtype)


def _flash_attn_kernel(x_ref, q_ref, k_ref, v_ref, wo_ref, bo_ref, resw_ref,
                       x1_ref, m_scr, l_scr, acc_scr, proj_scr):
    """Online-softmax attention + per-head out-projection + weighted residual."""
    f32, bf16 = jnp.float32, jnp.bfloat16
    h = pl.program_id(2)
    nh = pl.num_programs(2)
    ki = pl.program_id(3)
    nk = pl.num_programs(3)

    @pl.when((h == 0) & (ki == 0))
    def _():
        proj_scr[...] = jnp.zeros(proj_scr.shape, f32)

    @pl.when(ki == 0)
    def _():
        m_scr[...] = jnp.full(m_scr.shape, -jnp.inf, f32)
        l_scr[...] = jnp.zeros(l_scr.shape, f32)
        acc_scr[...] = jnp.zeros(acc_scr.shape, f32)

    q = q_ref[0]                                   # (tq, dh) bf16, pre-scaled
    k = k_ref[0].astype(bf16)                      # (tk, dh)
    v = v_ref[0].astype(bf16)

    s = jnp.einsum('qd,kd->qk', q, k, preferred_element_type=f32)      # (tq, tk)
    m_prev = m_scr[...]
    m_new = jnp.maximum(m_prev, jnp.max(s, axis=-1, keepdims=True))
    alpha = jnp.exp(m_prev - m_new)
    p = jnp.exp(s - m_new)
    l_scr[...] = alpha * l_scr[...] + jnp.sum(p, axis=-1, keepdims=True)
    acc_scr[...] = alpha * acc_scr[...] + jnp.dot(p.astype(bf16), v,
                                                  preferred_element_type=f32)
    m_scr[...] = m_new

    # Per-head epilogue: normalize and fold this head's slice of the output
    # projection (Wo row-block) into the shared (tq, D) accumulator.
    @pl.when(ki == nk - 1)
    def _():
        o = acc_scr[...] * pl.reciprocal(l_scr[...], approx=False)
        proj_scr[...] += jnp.dot(o.astype(bf16), wo_ref[...],
                                 preferred_element_type=f32)

    @pl.when((h == nh - 1) & (ki == nk - 1))
    def _():
        attn = proj_scr[...] + bo_ref[...]
        x1_ref[0] = (x_ref[0] + resw_ref[0] * attn).astype(x1_ref.dtype)


def _mlp_kernel(x1_ref, ln2_w_ref, ln2_b_ref, w1_ref, b1_ref, w2_ref, b2_ref,
                resw_ref, out_ref, xn2_scr, acc_scr):
    """LN2 + GELU MLP streamed over mlp-dim tiles with an f32 accumulator."""
    f32, bf16 = jnp.float32, jnp.bfloat16
    mi = pl.program_id(2)
    nm = pl.num_programs(2)

    @pl.when(mi == 0)
    def _():
        xn2_scr[...] = _layer_norm(x1_ref[0], ln2_w_ref[...],
                                   ln2_b_ref[...]).astype(bf16)
        acc_scr[...] = jnp.zeros(acc_scr.shape, f32)

    hmid = jnp.dot(xn2_scr[...], w1_ref[...],
                   preferred_element_type=f32) + b1_ref[...]           # (ts, tm)
    hmid = _gelu_exact(hmid)
    acc_scr[...] += jnp.dot(hmid.astype(bf16), w2_ref[...],
                            preferred_element_type=f32)

    @pl.when(mi == nm - 1)
    def _():
        mlp = acc_scr[...] + b2_ref[...]
        out_ref[0] = (x1_ref[0] + resw_ref[1] * mlp).astype(out_ref.dtype)


# ------------------------------ host wrapper ------------------------------

def _pick_tile(total, preferred):
    # demo-grade: fall back to the full extent when `preferred` does not divide it
    return preferred if total % preferred == 0 else total


def _vmem_limit_bytes():
    # ~75% of physical VMEM: leaves headroom for Mosaic internal scratch /
    # semaphores / pipeline buffers (never request the full 64 MiB on v7x).
    cap = 64 * 1024 * 1024
    try:
        info = pltpu.get_tpu_info()
        cap = int(getattr(info, "vmem_capacity_bytes", cap))
    except Exception:
        pass
    return (cap // 4) * 3


def _const_spec(shape, grid_rank, single_buffer):
    zero = (0,) * len(shape)
    if grid_rank == 2:
        imap = lambda i, j: zero
    elif grid_rank == 3:
        imap = lambda i, j, k: zero
    else:
        imap = lambda i, j, k, l: zero
    kwargs = {"pipeline_mode": pl.Buffered(1)} if single_buffer else {}
    return pl.BlockSpec(shape, imap, **kwargs)


def transformer_layer(x, params, num_heads, *, single_buffer_weights=True,
                      seq_tile=128, mlp_tile=512):
    """Returns (y, (k_cache, v_cache)) with k/v lane-dense, shaped (B, S, D)."""
    B, S, D = x.shape
    M = params["w1"].shape[1]
    H = num_heads
    dh = D // H
    assert D % H == 0 and dh % 128 == 0, "head_dim must be a multiple of 128"
    # TODO(synk): support head_dim == 64 by packing two heads per lane block.

    f32, bf16 = jnp.float32, jnp.bfloat16
    scale = np.float32(1.0 / np.sqrt(dh))

    # Fold 1/sqrt(dh) into the Q projection (weights AND bias); bf16 MXU weights.
    wqkv_f = params["wqkv"].astype(f32)
    bqkv_f = params["bqkv"].astype(f32)
    wqkv = jnp.concatenate([wqkv_f[:, :D] * scale, wqkv_f[:, D:]], axis=1).astype(bf16)
    bqkv = jnp.concatenate([bqkv_f[:, :D] * scale, bqkv_f[:, D:]], axis=1)
    wo = params["wo"].astype(bf16)
    w1 = params["w1"].astype(bf16)
    w2 = params["w2"].astype(bf16)
    ln1_w, ln1_b = params["ln1_w"].astype(f32), params["ln1_b"].astype(f32)
    ln2_w, ln2_b = params["ln2_w"].astype(f32), params["ln2_b"].astype(f32)
    bo, b1, b2 = (params["bo"].astype(f32), params["b1"].astype(f32),
                  params["b2"].astype(f32))
    resw = params["resw"].astype(f32)

    ts = _pick_tile(S, seq_tile)     # projection / MLP seq tile
    tq = _pick_tile(S, seq_tile)     # attention query tile
    tk = _pick_tile(S, seq_tile)     # attention kv tile
    tm = _pick_tile(M, mlp_tile)     # MLP hidden tile
    # TODO(synk): sweep (tq, tk, tm) per chip generation (larger on 128 MiB parts).

    vmem_limit = _vmem_limit_bytes()
    smem_spec = pl.BlockSpec(memory_space=pltpu.MemorySpace.SMEM)

    # ---- pass 1: LN1 + fused QKV projection (writes lane-dense Q / K / V) ----
    q_all, k_cache, v_cache = pl.pallas_call(
        _qkv_kernel,
        out_shape=(
            jax.ShapeDtypeStruct((B, S, D), bf16),     # pre-scaled Q (MXU operand)
            jax.ShapeDtypeStruct((B, S, D), x.dtype),  # K cache
            jax.ShapeDtypeStruct((B, S, D), x.dtype),  # V cache
        ),
        grid=(B, S // ts),
        in_specs=[
            pl.BlockSpec((1, ts, D), lambda b, si: (b, si, 0)),
            _const_spec((1, D), 2, single_buffer_weights),
            _const_spec((1, D), 2, single_buffer_weights),
            _const_spec((D, 3 * D), 2, single_buffer_weights),
            _const_spec((1, 3 * D), 2, single_buffer_weights),
        ],
        out_specs=(
            pl.BlockSpec((1, ts, D), lambda b, si: (b, si, 0)),
            pl.BlockSpec((1, ts, D), lambda b, si: (b, si, 0)),
            pl.BlockSpec((1, ts, D), lambda b, si: (b, si, 0)),
        ),
        compiler_params=pltpu.CompilerParams(
            dimension_semantics=("parallel", "parallel"),
            vmem_limit_bytes=vmem_limit,
        ),
    )(x, ln1_w, ln1_b, wqkv, bqkv)

    # ---- pass 2: flash attention (online softmax) + out-proj + residual ----
    x1 = pl.pallas_call(
        _flash_attn_kernel,
        out_shape=jax.ShapeDtypeStruct((B, S, D), x.dtype),
        grid=(B, S // tq, H, S // tk),
        in_specs=[
            pl.BlockSpec((1, tq, D), lambda b, qi, h, ki: (b, qi, 0)),   # residual x
            pl.BlockSpec((1, tq, dh), lambda b, qi, h, ki: (b, qi, h)),  # Q head blk
            pl.BlockSpec((1, tk, dh), lambda b, qi, h, ki: (b, ki, h)),  # K head blk
            pl.BlockSpec((1, tk, dh), lambda b, qi, h, ki: (b, ki, h)),  # V head blk
            pl.BlockSpec((dh, D), lambda b, qi, h, ki: (h, 0)),          # Wo row blk
            _const_spec((1, D), 4, single_buffer_weights),               # bo
            smem_spec,                                                   # resw
        ],
        out_specs=pl.BlockSpec((1, tq, D), lambda b, qi, h, ki: (b, qi, 0)),
        scratch_shapes=[
            pltpu.VMEM((tq, 1), jnp.float32),    # running max
            pltpu.VMEM((tq, 1), jnp.float32),    # running sum
            pltpu.VMEM((tq, dh), jnp.float32),   # per-head output accumulator
            pltpu.VMEM((tq, D), jnp.float32),    # out-projection accumulator
        ],
        compiler_params=pltpu.CompilerParams(
            dimension_semantics=("parallel", "parallel", "arbitrary", "arbitrary"),
            vmem_limit_bytes=vmem_limit,
        ),
    )(x, q_all, k_cache, v_cache, wo, bo, resw)

    # ---- pass 3: LN2 + streamed GELU MLP (accumulate over mlp-dim tiles) ----
    y = pl.pallas_call(
        _mlp_kernel,
        out_shape=jax.ShapeDtypeStruct((B, S, D), x.dtype),
        grid=(B, S // ts, M // tm),
        in_specs=[
            pl.BlockSpec((1, ts, D), lambda b, si, mi: (b, si, 0)),      # x1
            _const_spec((1, D), 3, single_buffer_weights),               # ln2_w
            _const_spec((1, D), 3, single_buffer_weights),               # ln2_b
            pl.BlockSpec((D, tm), lambda b, si, mi: (0, mi)),            # W1 tile
            pl.BlockSpec((1, tm), lambda b, si, mi: (0, mi)),            # b1 tile
            pl.BlockSpec((tm, D), lambda b, si, mi: (mi, 0)),            # W2 tile
            _const_spec((1, D), 3, single_buffer_weights),               # b2
            smem_spec,                                                   # resw
        ],
        out_specs=pl.BlockSpec((1, ts, D), lambda b, si, mi: (b, si, 0)),
        scratch_shapes=[
            pltpu.VMEM((ts, D), jnp.bfloat16),   # LN2(x1), cached across mlp tiles
            pltpu.VMEM((ts, D), jnp.float32),    # MLP accumulator
        ],
        compiler_params=pltpu.CompilerParams(
            dimension_semantics=("parallel", "parallel", "arbitrary"),
            vmem_limit_bytes=vmem_limit,
        ),
    )(x1, ln2_w, ln2_b, w1, b1, w2, b2, resw)

    return y, (k_cache, v_cache)


# ---------------------------- pure-JAX reference ----------------------------

def reference(x, params, num_heads):
    B, S, D = x.shape
    dh = D // num_heads

    def ln(t, w, b):
        m = t.mean(-1, keepdims=True)
        v = ((t - m) ** 2).mean(-1, keepdims=True)
        return (t - m) / jnp.sqrt(v + 1e-5) * w + b

    xn = ln(x, params["ln1_w"][0], params["ln1_b"][0])
    qkv = xn @ params["wqkv"] + params["bqkv"][0]
    q, k, v = jnp.split(qkv, 3, axis=-1)
    sh = lambda t: t.reshape(B, S, num_heads, dh).transpose(0, 2, 1, 3)
    qh, kh, vh = sh(q), sh(k), sh(v)
    s = jnp.einsum("bhqd,bhkd->bhqk", qh, kh) / np.sqrt(dh)
    p = jax.nn.softmax(s, axis=-1)
    o = jnp.einsum("bhqk,bhkd->bhqd", p, vh).transpose(0, 2, 1, 3).reshape(B, S, D)
    attn = o @ params["wo"] + params["bo"][0]
    x1 = x + params["resw"][0] * attn
    xn2 = ln(x1, params["ln2_w"][0], params["ln2_b"][0])
    h = jax.nn.gelu(xn2 @ params["w1"] + params["b1"][0], approximate=False)
    mlp = h @ params["w2"] + params["b2"][0]
    return x1 + params["resw"][1] * mlp, k, v


# ---------------------------------- main ----------------------------------

if __name__ == "__main__":
    # (8, 128)-tile-aligned small shapes so real layouts and multi-tile grids are
    # exercised: batch=2, seq=256, dim=256, heads=2 (head_dim=128), mlp_dim=1024.
    B, S, D, H, M = 2, 256, 256, 2, 1024
    key = jax.random.PRNGKey(0)
    ks = jax.random.split(key, 9)

    params = {
        # LayerNorm init matches nn.LayerNorm defaults (weight=1, bias=0)
        "ln1_w": jnp.ones((1, D), jnp.float32),
        "ln1_b": jnp.zeros((1, D), jnp.float32),
        "ln2_w": jnp.ones((1, D), jnp.float32),
        "ln2_b": jnp.zeros((1, D), jnp.float32),
        # attention (FlashAttention assumed: fused QKV proj + output proj)
        "wqkv": jax.random.normal(ks[0], (D, 3 * D), jnp.float32) * 0.05,
        "bqkv": jax.random.normal(ks[1], (1, 3 * D), jnp.float32) * 0.05,
        "wo":   jax.random.normal(ks[2], (D, D), jnp.float32) * 0.05,
        "bo":   jax.random.normal(ks[3], (1, D), jnp.float32) * 0.05,
        # MLP
        "w1": jax.random.normal(ks[4], (D, M), jnp.float32) * 0.05,
        "b1": jax.random.normal(ks[5], (1, M), jnp.float32) * 0.05,
        "w2": jax.random.normal(ks[6], (M, D), jnp.float32) * 0.05,
        "b2": jax.random.normal(ks[7], (1, D), jnp.float32) * 0.05,
        # residual_weight = nn.Parameter(torch.ones(2))
        "resw": jnp.ones((2,), jnp.float32),
    }
    x = jax.random.normal(ks[8], (B, S, D), jnp.float32)

    try:
        y, (k_cache, v_cache) = transformer_layer(x, params, num_heads=H)
    except Exception:
        # TODO(synk): this jax version rejects pl.Buffered(1) single-buffering of
        # the constant weight blocks; fall back to default double-buffered specs.
        y, (k_cache, v_cache) = transformer_layer(x, params, num_heads=H,
                                                  single_buffer_weights=False)

    y = jax.block_until_ready(y)
    k_cache = jax.block_until_ready(k_cache)
    v_cache = jax.block_until_ready(v_cache)

    y_ref, k_ref, v_ref = reference(x, params, num_heads=H)

    def check(name, got, want, atol, agg_tol):
        got = np.asarray(got, np.float64)
        want = np.asarray(want, np.float64)
        # per-element (bf16 MXU operands with f32 accumulation vs f32 reference)
        np.testing.assert_allclose(got, want, atol=atol, rtol=2e-2, err_msg=name)
        # aggregate relative error catches structural bugs masked by atol
        rel = np.linalg.norm(got - want) / max(np.linalg.norm(want), 1e-30)
        assert rel < agg_tol, f"{name}: aggregate relative error {rel:.3e}"

    check("k_cache", k_cache, k_ref, atol=2e-2, agg_tol=1e-2)
    check("v_cache", v_cache, v_ref, atol=2e-2, agg_tol=1e-2)
    check("y", y, y_ref, atol=5e-2, agg_tol=2e-2)
    assert k_cache.shape == (B, S, D) and v_cache.shape == (B, S, D)

    print("KERNEL_OK")
</pallas_src>

<mosaic_0001>
module attributes {stable_mosaic.version = 11 : i64} {
  func.func @_qkv_kernel(%arg0: i32, %arg1: i32, %arg2: memref<1x128x256xf32, #tpu.memory_space<vmem>>, %arg3: memref<1x256xf32, #tpu.memory_space<vmem>>, %arg4: memref<1x256xf32, #tpu.memory_space<vmem>>, %arg5: memref<256x768xbf16, #tpu.memory_space<vmem>>, %arg6: memref<1x768xf32, #tpu.memory_space<vmem>>, %arg7: memref<1x128x256xbf16, #tpu.memory_space<vmem>>, %arg8: memref<1x128x256xf32, #tpu.memory_space<vmem>>, %arg9: memref<1x128x256xf32, #tpu.memory_space<vmem>>) attributes {dimension_semantics = [#tpu.dimension_semantics<parallel>, #tpu.dimension_semantics<parallel>], iteration_bounds = array<i64: 2, 2>, scalar_prefetch = 0 : i64, scratch_operands = 0 : i64, tpu.core_type = #tpu.core_type<tc>, window_params = [{transform_indices = @transform_0, window_bounds = array<i64: 1, 128, 256>}, {pipeline_mode = #tpu.pipeline_mode<synchronous>, transform_indices = @transform_1, window_bounds = array<i64: 1, 256>}, {pipeline_mode = #tpu.pipeline_mode<synchronous>, transform_indices = @transform_2, window_bounds = array<i64: 1, 256>}, {pipeline_mode = #tpu.pipeline_mode<synchronous>, transform_indices = @transform_3, window_bounds = array<i64: 256, 768>}, {pipeline_mode = #tpu.pipeline_mode<synchronous>, transform_indices = @transform_4, window_bounds = array<i64: 1, 768>}, {transform_indices = @transform_5, window_bounds = array<i64: 1, 128, 256>}, {transform_indices = @transform_6, window_bounds = array<i64: 1, 128, 256>}, {transform_indices = @transform_7, window_bounds = array<i64: 1, 128, 256>}]} {
    %c0 = arith.constant 0 : index
    %c0_0 = arith.constant 0 : index
    %c0_1 = arith.constant 0 : index
    %0 = vector.load %arg2[%c0, %c0_0, %c0_1] : memref<1x128x256xf32, #tpu.memory_space<vmem>>, vector<1x128x256xf32>
    %1 = vector.shape_cast %0 : vector<1x128x256xf32> to vector<128x256xf32>
    %c0_2 = arith.constant 0 : index
    %c0_3 = arith.constant 0 : index
    %2 = vector.load %arg3[%c0_2, %c0_3] : memref<1x256xf32, #tpu.memory_space<vmem>>, vector<1x256xf32>
    %c0_4 = arith.constant 0 : index
    %c0_5 = arith.constant 0 : index
    %3 = vector.load %arg4[%c0_4, %c0_5] : memref<1x256xf32, #tpu.memory_space<vmem>>, vector<1x256xf32>
    %cst = arith.constant dense<0.000000e+00> : vector<128xf32>
    %4 = vector.multi_reduction <add>, %1, %cst [1] : vector<128x256xf32> to vector<128xf32>
    %5 = vector.shape_cast %4 : vector<128xf32> to vector<128x1xf32>
    %cst_6 = arith.constant 2.560000e+02 : f32
    %6 = vector.broadcast %cst_6 : f32 to vector<128x1xf32>
    %7 = arith.divf %5, %6 : vector<128x1xf32>
    %8 = vector.broadcast %7 : vector<128x1xf32> to vector<128x256xf32>
    %9 = arith.subf %1, %8 : vector<128x256xf32>
    %10 = arith.mulf %9, %9 : vector<128x256xf32>
    %cst_7 = arith.constant dense<0.000000e+00> : vector<128xf32>
    %11 = vector.multi_reduction <add>, %10, %cst_7 [1] : vector<128x256xf32> to vector<128xf32>
    %12 = vector.shape_cast %11 : vector<128xf32> to vector<128x1xf32>
    %cst_8 = arith.constant 2.560000e+02 : f32
    %13 = vector.broadcast %cst_8 : f32 to vector<128x1xf32>
    %14 = arith.divf %12, %13 : vector<128x1xf32>
    %cst_9 = arith.constant 9.99999974E-6 : f32
    %15 = vector.broadcast %cst_9 : f32 to vector<128x1xf32>
    %16 = arith.addf %14, %15 : vector<128x1xf32>
    %17 = math.rsqrt %16 : vector<128x1xf32>
    %18 = vector.broadcast %17 : vector<128x1xf32> to vector<128x256xf32>
    %19 = arith.mulf %9, %18 : vector<128x256xf32>
    %20 = vector.broadcast %2 : vector<1x256xf32> to vector<128x256xf32>
    %21 = arith.mulf %19, %20 : vector<128x256xf32>
    %22 = vector.broadcast %3 : vector<1x256xf32> to vector<128x256xf32>
    %23 = arith.addf %21, %22 : vector<128x256xf32>
    %24 = arith.truncf %23 : vector<128x256xf32> to vector<128x256xbf16>
    %c0_10 = arith.constant 0 : index
    %c0_11 = arith.constant 0 : index
    %25 = vector.load %arg5[%c0_10, %c0_11] : memref<256x768xbf16, #tpu.memory_space<vmem>>, vector<256x768xbf16>
    %cst_12 = arith.constant dense<0.000000e+00> : vector<128x768xf32>
    %26 = tpu.matmul %24, %25, %cst_12 {dimension_numbers = #tpu.dot_dimension_numbers<[1], [0], [0], [1], [0, 0, 1, 1], [], []>} : vector<128x256xbf16>, vector<256x768xbf16>, vector<128x768xf32> -> vector<128x768xf32>
    %c0_13 = arith.constant 0 : index
    %c0_14 = arith.constant 0 : index
    %27 = vector.load %arg6[%c0_13, %c0_14] : memref<1x768xf32, #tpu.memory_space<vmem>>, vector<1x768xf32>
    %28 = vector.broadcast %27 : vector<1x768xf32> to vector<128x768xf32>
    %29 = arith.addf %26, %28 : vector<128x768xf32>
    %30 = vector.extract_strided_slice %29 {offsets = [0, 0], sizes = [128, 256], strides = [1, 1]} : vector<128x768xf32> to vector<128x256xf32>
    %31 = arith.truncf %30 : vector<128x256xf32> to vector<128x256xbf16>
    %c0_15 = arith.constant 0 : index
    %c0_16 = arith.constant 0 : index
    %c0_17 = arith.constant 0 : index
    %32 = vector.load %arg7[%c0_15, %c0_16, %c0_17] : memref<1x128x256xbf16, #tpu.memory_space<vmem>>, vector<1x128x256xbf16>
    %33 = vector.shape_cast %32 : vector<1x128x256xbf16> to vector<128x256xbf16>
    %34 = vector.shape_cast %31 : vector<128x256xbf16> to vector<1x128x256xbf16>
    tpu.vector_store %arg7[%c0_15, %c0_16, %c0_17], %34 {strides = array<i32>} : memref<1x128x256xbf16, #tpu.memory_space<vmem>>, vector<1x128x256xbf16>,
    %35 = vector.extract_strided_slice %29 {offsets = [0, 256], sizes = [128, 256], strides = [1, 1]} : vector<128x768xf32> to vector<128x256xf32>
    %c0_18 = arith.constant 0 : index
    %c0_19 = arith.constant 0 : index
    %c0_20 = arith.constant 0 : index
    %36 = vector.load %arg8[%c0_18, %c0_19, %c0_20] : memref<1x128x256xf32, #tpu.memory_space<vmem>>, vector<1x128x256xf32>
    %37 = vector.shape_cast %36 : vector<1x128x256xf32> to vector<128x256xf32>
    %38 = vector.shape_cast %35 : vector<128x256xf32> to vector<1x128x256xf32>
    tpu.vector_store %arg8[%c0_18, %c0_19, %c0_20], %38 {strides = array<i32>} : memref<1x128x256xf32, #tpu.memory_space<vmem>>, vector<1x128x256xf32>,
    %39 = vector.extract_strided_slice %29 {offsets = [0, 512], sizes = [128, 256], strides = [1, 1]} : vector<128x768xf32> to vector<128x256xf32>
    %c0_21 = arith.constant 0 : index
    %c0_22 = arith.constant 0 : index
    %c0_23 = arith.constant 0 : index
    %40 = vector.load %arg9[%c0_21, %c0_22, %c0_23] : memref<1x128x256xf32, #tpu.memory_space<vmem>>, vector<1x128x256xf32>
    %41 = vector.shape_cast %40 : vector<1x128x256xf32> to vector<128x256xf32>
    %42 = vector.shape_cast %39 : vector<128x256xf32> to vector<1x128x256xf32>
    tpu.vector_store %arg9[%c0_21, %c0_22, %c0_23], %42 {strides = array<i32>} : memref<1x128x256xf32, #tpu.memory_space<vmem>>, vector<1x128x256xf32>,
    return
  }
  func.func @transform_0(%arg0: i32, %arg1: i32) -> (i32, i32, i32) {
    %c0_i32 = arith.constant 0 : i32
    %c0_i32_0 = arith.constant 0 : i32
    return %arg0, %arg1, %c0_i32 : i32, i32, i32
  }
  func.func @transform_1(%arg0: i32, %arg1: i32) -> (i32, i32) {
    %c0_i32 = arith.constant 0 : i32
    %c0_i32_0 = arith.constant 0 : i32
    %c0_i32_1 = arith.constant 0 : i32
    return %c0_i32, %c0_i32_0 : i32, i32
  }
  func.func @transform_2(%arg0: i32, %arg1: i32) -> (i32, i32) {
    %c0_i32 = arith.constant 0 : i32
    %c0_i32_0 = arith.constant 0 : i32
    %c0_i32_1 = arith.constant 0 : i32
    return %c0_i32, %c0_i32_0 : i32, i32
  }
  func.func @transform_3(%arg0: i32, %arg1: i32) -> (i32, i32) {
    %c0_i32 = arith.constant 0 : i32
    %c0_i32_0 = arith.constant 0 : i32
    %c0_i32_1 = arith.constant 0 : i32
    return %c0_i32, %c0_i32_0 : i32, i32
  }
  func.func @transform_4(%arg0: i32, %arg1: i32) -> (i32, i32) {
    %c0_i32 = arith.constant 0 : i32
    %c0_i32_0 = arith.constant 0 : i32
    %c0_i32_1 = arith.constant 0 : i32
    return %c0_i32, %c0_i32_0 : i32, i32
  }
  func.func @transform_5(%arg0: i32, %arg1: i32) -> (i32, i32, i32) {
    %c0_i32 = arith.constant 0 : i32
    %c0_i32_0 = arith.constant 0 : i32
    return %arg0, %arg1, %c0_i32 : i32, i32, i32
  }
  func.func @transform_6(%arg0: i32, %arg1: i32) -> (i32, i32, i32) {
    %c0_i32 = arith.constant 0 : i32
    %c0_i32_0 = arith.constant 0 : i32
    return %arg0, %arg1, %c0_i32 : i32, i32, i32
  }
  func.func @transform_7(%arg0: i32, %arg1: i32) -> (i32, i32, i32) {
    %c0_i32 = arith.constant 0 : i32
    %c0_i32_0 = arith.constant 0 : i32
    return %arg0, %arg1, %c0_i32 : i32, i32, i32
  }
}

module attributes {stable_mosaic.version = 11 : i64} {
  func.func @_qkv_kernel(%arg0: i32, %arg1: i32, %arg2: memref<1x128x256xf32, #tpu.memory_space<vmem>>, %arg3: memref<1x256xf32, #tpu.memory_space<vmem>>, %arg4: memref<1x256xf32, #tpu.memory_space<vmem>>, %arg5: memref<256x768xbf16, #tpu.memory_space<vmem>>, %arg6: memref<1x768xf32, #tpu.memory_space<vmem>>, %arg7: memref<1x128x256xbf16, #tpu.memory_space<vmem>>, %arg8: memref<1x128x256xf32, #tpu.memory_space<vmem>>, %arg9: memref<1x128x256xf32, #tpu.memory_space<vmem>>) attributes {dimension_semantics = [#tpu.dimension_semantics<parallel>, #tpu.dimension_semantics<parallel>], iteration_bounds = array<i64: 2, 2>, scalar_prefetch = 0 : i64, scratch_operands = 0 : i64, tpu.core_type = #tpu.core_type<tc>, window_params = [{transform_indices = @transform_0, window_bounds = array<i64: 1, 128, 256>}, {pipeline_mode = #tpu.pipeline_mode<synchronous>, transform_indices = @transform_1, window_bounds = array<i64: 1, 256>}, {pipeline_mode = #tpu.pipeline_mode<synchronous>, transform_indices = @transform_2, window_bounds = array<i64: 1, 256>}, {pipeline_mode = #tpu.pipeline_mode<synchronous>, transform_indices = @transform_3, window_bounds = array<i64: 256, 768>}, {pipeline_mode = #tpu.pipeline_mode<synchronous>, transform_indices = @transform_4, window_bounds = array<i64: 1, 768>}, {transform_indices = @transform_5, window_bounds = array<i64: 1, 128, 256>}, {transform_indices = @transform_6, window_bounds = array<i64: 1, 128, 256>}, {transform_indices = @transform_7, window_bounds = array<i64: 1, 128, 256>}]} {
    %c0 = arith.constant 0 : index
    %c0_0 = arith.constant 0 : index
    %c0_1 = arith.constant 0 : index
    %0 = vector.load %arg2[%c0, %c0_0, %c0_1] : memref<1x128x256xf32, #tpu.memory_space<vmem>>, vector<1x128x256xf32>
    %1 = vector.shape_cast %0 : vector<1x128x256xf32> to vector<128x256xf32>
    %c0_2 = arith.constant 0 : index
    %c0_3 = arith.constant 0 : index
    %2 = vector.load %arg3[%c0_2, %c0_3] : memref<1x256xf32, #tpu.memory_space<vmem>>, vector<1x256xf32>
    %c0_4 = arith.constant 0 : index
    %c0_5 = arith.constant 0 : index
    %3 = vector.load %arg4[%c0_4, %c0_5] : memref<1x256xf32, #tpu.memory_space<vmem>>, vector<1x256xf32>
    %cst = arith.constant dense<0.000000e+00> : vector<128xf32>
    %4 = vector.multi_reduction <add>, %1, %cst [1] : vector<128x256xf32> to vector<128xf32>
    %5 = vector.shape_cast %4 : vector<128xf32> to vector<128x1xf32>
    %cst_6 = arith.constant 2.560000e+02 : f32
    %6 = vector.broadcast %cst_6 : f32 to vector<128x1xf32>
    %7 = arith.divf %5, %6 : vector<128x1xf32>
    %8 = vector.broadcast %7 : vector<128x1xf32> to vector<128x256xf32>
    %9 = arith.subf %1, %8 : vector<128x256xf32>
    %10 = arith.mulf %9, %9 : vector<128x256xf32>
    %cst_7 = arith.constant dense<0.000000e+00> : vector<128xf32>
    %11 = vector.multi_reduction <add>, %10, %cst_7 [1] : vector<128x256xf32> to vector<128xf32>
    %12 = vector.shape_cast %11 : vector<128xf32> to vector<128x1xf32>
    %cst_8 = arith.constant 2.560000e+02 : f32
    %13 = vector.broadcast %cst_8 : f32 to vector<128x1xf32>
    %14 = arith.divf %12, %13 : vector<128x1xf32>
    %cst_9 = arith.constant 9.99999974E-6 : f32
    %15 = vector.broadcast %cst_9 : f32 to vector<128x1xf32>
    %16 = arith.addf %14, %15 : vector<128x1xf32>
    %17 = math.rsqrt %16 : vector<128x1xf32>
    %18 = vector.broadcast %17 : vector<128x1xf32> to vector<128x256xf32>
    %19 = arith.mulf %9, %18 : vector<128x256xf32>
    %20 = vector.broadcast %2 : vector<1x256xf32> to vector<128x256xf32>
    %21 = arith.mulf %19, %20 : vector<128x256xf32>
    %22 = vector.broadcast %3 : vector<1x256xf32> to vector<128x256xf32>
    %23 = arith.addf %21, %22 : vector<128x256xf32>
    %24 = arith.truncf %23 : vector<128x256xf32> to vector<128x256xbf16>
    %c0_10 = arith.constant 0 : index
    %c0_11 = arith.constant 0 : index
    %25 = vector.load %arg5[%c0_10, %c0_11] : memref<256x768xbf16, #tpu.memory_space<vmem>>, vector<256x768xbf16>
    %cst_12 = arith.constant dense<0.000000e+00> : vector<128x768xf32>
    %26 = tpu.matmul %24, %25, %cst_12 {dimension_numbers = #tpu.dot_dimension_numbers<[1], [0], [0], [1], [0, 0, 1, 1], [], []>} : vector<128x256xbf16>, vector<256x768xbf16>, vector<128x768xf32> -> vector<128x768xf32>
    %c0_13 = arith.constant 0 : index
    %c0_14 = arith.constant 0 : index
    %27 = vector.load %arg6[%c0_13, %c0_14] : memref<1x768xf32, #tpu.memory_space<vmem>>, vector<1x768xf32>
    %28 = vector.broadcast %27 : vector<1x768xf32> to vector<128x768xf32>
    %29 = arith.addf %26, %28 : vector<128x768xf32>
    %30 = vector.extract_strided_slice %29 {offsets = [0, 0], sizes = [128, 256], strides = [1, 1]} : vector<128x768xf32> to vector<128x256xf32>
    %31 = arith.truncf %30 : vector<128x256xf32> to vector<128x256xbf16>
    %c0_15 = arith.constant 0 : index
    %c0_16 = arith.constant 0 : index
    %c0_17 = arith.constant 0 : index
    %32 = vector.load %arg7[%c0_15, %c0_16, %c0_17] : memref<1x128x256xbf16, #tpu.memory_space<vmem>>, vector<1x128x256xbf16>
    %33 = vector.shape_cast %32 : vector<1x128x256xbf16> to vector<128x256xbf16>
    %34 = vector.shape_cast %31 : vector<128x256xbf16> to vector<1x128x256xbf16>
    tpu.vector_store %arg7[%c0_15, %c0_16, %c0_17], %34 {strides = array<i32>} : memref<1x128x256xbf16, #tpu.memory_space<vmem>>, vector<1x128x256xbf16>,
    %35 = vector.extract_strided_slice %29 {offsets = [0, 256], sizes = [128, 256], strides = [1, 1]} : vector<128x768xf32> to vector<128x256xf32>
    %c0_18 = arith.constant 0 : index
    %c0_19 = arith.constant 0 : index
    %c0_20 = arith.constant 0 : index
    %36 = vector.load %arg8[%c0_18, %c0_19, %c0_20] : memref<1x128x256xf32, #tpu.memory_space<vmem>>, vector<1x128x256xf32>
    %37 = vector.shape_cast %36 : vector<1x128x256xf32> to vector<128x256xf32>
    %38 = vector.shape_cast %35 : vector<128x256xf32> to vector<1x128x256xf32>
    tpu.vector_store %arg8[%c0_18, %c0_19, %c0_20], %38 {strides = array<i32>} : memref<1x128x256xf32, #tpu.memory_space<vmem>>, vector<1x128x256xf32>,
    %39 = vector.extract_strided_slice %29 {offsets = [0, 512], sizes = [128, 256], strides = [1, 1]} : vector<128x768xf32> to vector<128x256xf32>
    %c0_21 = arith.constant 0 : index
    %c0_22 = arith.constant 0 : index
    %c0_23 = arith.constant 0 : index
    %40 = vector.load %arg9[%c0_21, %c0_22, %c0_23] : memref<1x128x256xf32, #tpu.memory_space<vmem>>, vector<1x128x256xf32>
    %41 = vector.shape_cast %40 : vector<1x128x256xf32> to vector<128x256xf32>
    %42 = vector.shape_cast %39 : vector<128x256xf32> to vector<1x128x256xf32>
    tpu.vector_store %arg9[%c0_21, %c0_22, %c0_23], %42 {strides = array<i32>} : memref<1x128x256xf32, #tpu.memory_space<vmem>>, vector<1x128x256xf32>,
    return
  }
  func.func @transform_0(%arg0: i32, %arg1: i32) -> (i32, i32, i32) {
    %c0_i32 = arith.constant 0 : i32
    %c0_i32_0 = arith.constant 0 : i32
    return %arg0, %arg1, %c0_i32 : i32, i32, i32
  }
  func.func @transform_1(%arg0: i32, %arg1: i32) -> (i32, i32) {
    %c0_i32 = arith.constant 0 : i32
    %c0_i32_0 = arith.constant 0 : i32
    %c0_i32_1 = arith.constant 0 : i32
    return %c0_i32, %c0_i32_0 : i32, i32
  }
  func.func @transform_2(%arg0: i32, %arg1: i32) -> (i32, i32) {
    %c0_i32 = arith.constant 0 : i32
    %c0_i32_0 = arith.constant 0 : i32
    %c0_i32_1 = arith.constant 0 : i32
    return %c0_i32, %c0_i32_0 : i32, i32
  }
  func.func @transform_3(%arg0: i32, %arg1: i32) -> (i32, i32) {
    %c0_i32 = arith.constant 0 : i32
    %c0_i32_0 = arith.constant 0 : i32
    %c0_i32_1 = arith.constant 0 : i32
    return %c0_i32, %c0_i32_0 : i32, i32
  }
  func.func @transform_4(%arg0: i32, %arg1: i32) -> (i32, i32) {
    %c0_i32 = arith.constant 0 : i32
    %c0_i32_0 = arith.constant 0 : i32
    %c0_i32_1 = arith.constant 0 : i32
    return %c0_i32, %c0_i32_0 : i32, i32
  }
  func.func @transform_5(%arg0: i32, %arg1: i32) -> (i32, i32, i32) {
    %c0_i32 = arith.constant 0 : i32
    %c0_i32_0 = arith.constant 0 : i32
    return %arg0, %arg1, %c0_i32 : i32, i32, i32
  }
  func.func @transform_6(%arg0: i32, %arg1: i32) -> (i32, i32, i32) {
    %c0_i32 = arith.constant 0 : i32
    %c0_i32_0 = arith.constant 0 : i32
    return %arg0, %arg1, %c0_i32 : i32, i32, i32
  }
  func.func @transform_7(%arg0: i32, %arg1: i32) -> (i32, i32, i32) {
    %c0_i32 = arith.constant 0 : i32
    %c0_i32_0 = arith.constant 0 : i32
    return %arg0, %arg1, %c0_i32 : i32, i32, i32
  }
}

</mosaic_0001>

<bundles_post_ra>
// kernel: tpu_custom_call.1
= control target key start
LH: loop header
LB: loop body
LE: loop exit
PB: predicated region body
PF: predicated region fallthrough
CT: control target
= control target key end

     0   :  { %s3977_s0 = inlined_call_operand.hbm [shape: f32[2,256,256], index: 0, kind: input, shape index: {}]   ;;  %s3978_s1 = inlined_call_operand.hbm [shape: f32[1,256], index: 1, kind: input, shape index: {}]   ;;  %s3979_s2 = inlined_call_operand.hbm [shape: f32[1,256], index: 2, kind: input, shape index: {}]   ;;  %s3980_s3 = inlined_call_operand.hbm [shape: bf16[256,768], index: 3, kind: input, shape index: {}]   ;;  %s3981_s4 = inlined_call_operand.vmem [shape: f32[1,768], index: 4, kind: input, shape index: {}]   ;;  %s3982_s5 = inlined_call_operand.hbm [shape: bf16[2,256,256], index: 5, kind: output, shape index: {0}]   ;;  %s3983_s6 = inlined_call_operand.hbm [shape: f32[2,256,256], index: 6, kind: output, shape index: {1}]   ;;  %s3984_s7 = inlined_call_operand.hbm [shape: f32[2,256,256], index: 7, kind: output, shape index: {2}]  }
   0x1   :  { %3995 = sst [smem:[#allocation23_spill]] %s3978_s1 }
   0x2   :  { %3996 = sst [smem:[#allocation24_spill]] %s3979_s2 }
   0x3   :  { %3997 = sst [smem:[#allocation25_spill]] %s3980_s3 }
   0x4   :  { %3998 = sst [smem:[#allocation26_spill]] %s3982_s5 }
   0x5   :  { %3999 = sst [smem:[#allocation27_spill]] %s3984_s7 }
   0x6   :  { %13 = vsyncpa [#allocation3], 0 }
   0x7   :  { %15 = vsyncpa [#allocation3 + $0x1], 0 }
   0x8   :  { %16 = vsyncpa [#allocation6], 0 }
   0x9   :  { %17 = vsyncpa [#allocation9], 0 }
   0xa   :  { %18 = vsyncpa [#allocation4], 0 }
   0xb   :  { %20 = vsyncpa [#allocation4 + $0x1], 0 }
   0xc   :  { %21 = vsyncpa [#allocation12], 0 }
   0xd   :  { %23 = vsyncpa [#allocation12 + $0x1], 0  ;;  %s2976_s24 = smov 0   ;;  %s2978_s25 = smov 0  }
   0xe   :  { %s2980_s26 = smov 0   ;;  %s2982_s27 = smov 0  }
   0xf   :  { %s2984_s28 = smov 0   ;;  %s2986_s29 = smov 0  }
  0x10   :  { %s2988_s30 = smov 0   ;;  %s2990_s8 = smov 0  }
  0x11 LB: > { %4000 = sst [smem:[#allocation19_spill]] %s2891_s24  ;;  %s3017_s9 = sadd.s32 4294967295, %s2919_s8   ;;  %s2919_s8 = sphi %s2990_s8, %s29_s8   ;;  %s2915_s30 = sphi %s2988_s30, %s4033_s30   ;;  %s2911_s29 = sphi %s2986_s29, %s4028_s29   ;;  %s2907_s28 = sphi %s2984_s28, %s4032_s28   ;;  %s2903_s27 = sphi %s2982_s27, %s4027_s27   ;;  %s2899_s26 = sphi %s2980_s26, %s4031_s26   ;;  %s2895_s25 = sphi %s2978_s25, %s4030_s25   ;;  %s2891_s24 = sphi %s2976_s24, %s4029_s24  }
  0x12   : > { %4001 = sst [smem:[#allocation20_spill]] %s2911_s29  ;;  %s3988_s10 = sadd.s32 4294967294, %s2919_s8  }
  0x13   : > { %p63_p0 = scmp.ne.s32.totalorder %s2895_s25, %s2891_s24  ;;  %p3985_p1 = scmp.eq.s32.totalorder %s3017_s9, 0 }
  0x14   : > { %p179_p3 = scmp.eq.s32.totalorder %s3988_s10, 3  ;;  %p2151_p5 = scmp.ge.s32.totalorder %s2919_s8, 1 }
  0x15   : > { %p3028_p4 = por %p3985_p1, %p63_p0  ;;  %p242_p7 = scmp.lt.s32.totalorder %s2919_s8, 5 }
  0x16   : > { %p3033_p6 = por %p179_p3, %p63_p0  ;;  %s2921_s14 = smov [#allocation5]  }
  0x17   : > { %s4002_s11 = scalar_select %p3028_p4, 1, 0 }
  0x18   : > { %s4003_s12 = scalar_select %p3033_p6, 1, 0 }
  0x19   : > { %p3038_p8 = pnand %p2151_p5, %p242_p7  ;;  %s255_s15 = sshll.u32 %s2921_s14, 4  ;;  %s256_s15 = int_to_ptr.vmem [resolvable:$true] %s255_s15 }
  0x1a   : > { %4004 = sst [smem:[#allocation21_spill]] %s4003_s12  ;;  %s2922_s16 = smov [#allocation7]  }
  0x1b   : > { %s4005_s13 = scalar_select %p3038_p8, 1, 0 }
  0x1c   : > { %p2370_p9 = pneg %p3038_p8  ;;  %s266_s17 = sshll.u32 %s2922_s16, 4  ;;  %s267_s17 = int_to_ptr.vmem [resolvable:$true] %s266_s17 }
  0x1d   : > { %s2923_s19 = smov [#allocation8]   ;;  %s2664_s21 = scalar_lea.vmem %s256_s15, 32 }
  0x1e   : > { %p3046_p10 = pnand %p2370_p9, %p3985_p1  ;;  %s276_s20 = sshll.u32 %s2923_s19, 4  ;;  %s3050_s20 = int_to_ptr.vmem [resolvable:$true] %s276_s20 }
  0x1f   : > { %p2665_p12 = scmp.ne.s32.totalorder %s256_s15, %s2664_s21  ;;  %p2672_p3 = scmp.lt.s32.totalorder %s256_s15, %s256_s15 }
  0x20   : > { %p2655_p11 = pneg %p3046_p10  ;;  %p2673_p5 = scmp.lt.s32.totalorder %s2664_s21, %s2664_s21 }
  0x22   : > { %p2667_p13 = pnand %p2665_p12, %p2655_p11  ;;  %p2674_p7 = por %p2673_p5, %p2672_p3 }
  0x24   : > { %p2668_p0 = pneg %p2667_p13 }
  0x26   : > { %p2675_p9 = pnand %p2674_p7, %p2668_p0 }
  0x28   : > { %2678 = shalt.err (!%p2675_p9)
}
  0x29   : > { %s4007_s1 = sld [smem:[#allocation23_spill]]  ;;  %s2690_s14 = scalar_lea.vmem %s267_s17, 32 }
  0x2a   : > { %p2691_p1 = scmp.ne.s32.totalorder %s267_s17, %s2690_s14  ;;  %p2698_p12 = scmp.lt.s32.totalorder %s267_s17, %s267_s17 }
  0x2b   : > { %p2699_p13 = scmp.lt.s32.totalorder %s2690_s14, %s2690_s14 }
  0x2c   : > { %p2693_p2 = pnand %p2691_p1, %p2655_p11 }
  0x2d   : > { %p2700_p4 = por %p2699_p13, %p2698_p12 }
  0x2e   : > { %p2694_p6 = pneg %p2693_p2 }
  0x2f   : > { %2373 = dma.hbm_to_vmem [thread:$0]  (!%p3046_p10), %s4007_s1, 32, %s256_s15, [#allocation6]  }
  0x30   : > { %p2701_p8 = pnand %p2700_p4, %p2694_p6 }
  0x32   : > { %2704 = shalt.err (!%p2701_p8)
}
  0x33   : > { %s4008_s2 = sld [smem:[#allocation24_spill]]  ;;  %s2716_s15 = scalar_lea.vmem %s3050_s20, 12288 }
  0x34   : > { %p2717_p0 = scmp.ne.s32.totalorder %s3050_s20, %s2716_s15  ;;  %p2724_p3 = scmp.lt.s32.totalorder %s3050_s20, %s3050_s20 }
  0x35   : > { %p2725_p4 = scmp.lt.s32.totalorder %s2716_s15, %s2716_s15 }
  0x36   : > { %p2719_p1 = pnand %p2717_p0, %p2655_p11 }
  0x37   : > { %p2726_p6 = por %p2725_p4, %p2724_p3 }
  0x38   : > { %p2720_p2 = pneg %p2719_p1 }
  0x39   : > { %2376 = dma.hbm_to_vmem [thread:$0]  (!%p3046_p10), %s4008_s2, 32, %s267_s17, [#allocation6]  }
  0x3a   : > { %p2727_p8 = pnand %p2726_p6, %p2720_p2 }
  0x3c   : > { %2730 = shalt.err (!%p2727_p8)
}
  0x3d   : > { %s2924_s21 = smov 384   ;;  %s2925_s17 = smov 24  }
  0x3e   : > { %s4009_s3 = sld [smem:[#allocation25_spill]]  ;;  %s38_s14 = sadd.s32 1, %s2911_s29 }
  0x3f   : > { %p39_p11 = scmp.ge.s32.totalorder %s38_s14, 2  ;;  %s41_s16 = sadd.s32 1, %s2915_s30 }
  0x40   : > { %s50_s19 = sadd.s32 1, %s2899_s26  ;;  %p57_p5 = scmp.ne.s32.totalorder %s2899_s26, %s2895_s25 }
  0x41   : > { %s4035_s14 = smov (%p39_p11, %s38_s14), 0  ;;  %s4037_s16 = smov (!%p39_p11, %s41_s16), %s2915_s30 }
  0x42   : > { %4010 = sst [smem:[#allocation22_spill]] %s4035_s14  ;;  %s46_s15 = ssub.s32 %s2911_s29, %s4035_s14 }
  0x43   : > { %p58_p7 = scmp.eq.s32.totalorder %s2919_s8, 0  ;;  %p43_p9 = scmp.ge.s32.totalorder %s4037_s16, 2 }
  0x44   : > { %2379 = dma.hbm_to_vmem [thread:$0]  (!%p3046_p10), %s4009_s3, 12288, %s3050_s20, [#allocation9], %s2924_s21, %s2924_s21, %s2925_s17  }
  0x45   : > { %p4011_p12 = scmp.eq.s32.totalorder %s3017_s9, 3  ;;  %p3100_p10 = por %p58_p7, %p57_p5 }
  0x46   : > { %p2397_p0 = scmp.lt.s32.totalorder %s2919_s8, 4  ;;  %s4039_s16 = smov (%p43_p9, %s4037_s16), 0 }
  0x47   : > { %p3096_p13 = por %p4011_p12, %p57_p5  ;;  %s293_s21 = sand.u32 1, %s2899_s26  }
  0x48   : > { %s2298_s17 = sshll.u32 %s2911_s29, 5  ;;  %s45_s22 = ssub.s32 %s2915_s30, %s4039_s16 }
  0x49   : > { %s47_s23 = sor.u32 %s46_s15, %s45_s22  ;;  %s2156_s10 = sshll.u32 %s293_s21, 8 }
  0x4a   : > { %p48_p1 = scmp.eq.s32.totalorder %s47_s23, 0  ;;  %s2159_s1 = sshll.u32 %s2915_s30, 6 }
  0x4b   : > { %s297_s2 = scalar_lea.vmem [#allocation2], %s2156_s10  ;;  %s304_s12 = sadd.s32 %s2298_s17, %s2159_s1 }
  0x4c   : > { %s307_s3 = sshll.u32 %s297_s2, 4  ;;  %s2160_s24 = sshll.u32 %s304_s12, 7  ;;  %s308_s3 = int_to_ptr.vmem [resolvable:$true] %s307_s3 }
  0x4d   : > { %s3113_s14 = scalar_select %p48_p1, %s2899_s26, %s50_s19  }
  0x4e   : > { %p3119_p2 = pnand %p2397_p0, %p3100_p10  ;;  %s306_s15 = scalar_lea.hbm %s3977_s0, %s2160_s24 }
  0x4f   : > { %s294_s22 = scalar_lea.sflag [#allocation3], %s293_s21  ;;  %s2744_s2 = scalar_lea.vmem %s308_s3, 4096 }
  0x50   : > { %p2733_p3 = pneg %p3119_p2  ;;  %p2745_p4 = scmp.ne.s32.totalorder %s308_s3, %s2744_s2 }
  0x51   : > { %s2926_s1 = smov [#allocation2]  }
  0x52   : > { %p2747_p6 = pnand %p2745_p4, %p2733_p3  ;;  %s2749_s10 = sshll.u32 %s2926_s1, 4  ;;  %s2750_s10 = int_to_ptr.vmem [resolvable:$false] %s2749_s10 }
  0x53   : > { %s2751_s12 = scalar_lea.vmem %s2750_s10, 8192  ;;  %p2752_p11 = scmp.lt.s32.totalorder %s308_s3, %s2750_s10 }
  0x54   : > { %p2748_p8 = pneg %p2747_p6  ;;  %p2753_p5 = scmp.lt.s32.totalorder %s2751_s12, %s2744_s2 }
  0x56   : > { %p2754_p7 = por %p2753_p5, %p2752_p11 }
  0x58   : > { %p2755_p9 = pnand %p2754_p7, %p2748_p8 }
  0x5a   : > { %2758 = shalt.err (!%p2755_p9)
}
  0x5b   : > { %s2927_s19 = smov 256   ;;  %s2928_s5 = smov 16  }
  0x5c   : > { %2383 = dma.hbm_to_vmem [thread:$0]  (!%p3119_p2), %s306_s15, 4096, %s308_s3, %s294_s22, %s2927_s19, %s2927_s19, %s2928_s5  }
  0x5d   : > { %p4015_p12 = scmp.ne.s32.totalorder %s4005_s13, 0 }
  0x5e   : > { %s3133_s24 = sand.u32 (!%p4015_p12), 1, %s2895_s25   ;;  %p4016_p10 = scmp.ne.s32.totalorder (!%p4015_p12), %s4002_s11, 0 }
  0x5f   : > { %319 = sbr.rel (%p4015_p12) target bundleno = 758 (0x2f6), region = 40  ;;  %s3136_s29 = sshll.u32 (!%p4015_p12), %s3133_s24, 8 }
  0x60   : > { %s322_s20 = scalar_lea.sflag (!%p4015_p12), [#allocation3], %s3133_s24  ;;  %s3140_s21 = scalar_lea.vmem (!%p4015_p12), [#allocation2], %s3136_s29 }
  0x64   : > { %2870 = dma.done.wait (%p4016_p10), %s322_s20, 4096  }
  0x65   : > { %2872 = vsyncadd (%p4016_p10), %s322_s20, 4294963200  ;;  %p4017_p0 = scmp.eq.s32.totalorder %s3017_s9, 0 }
  0x67   : > { %2874 = dma.done.wait (%p4017_p0), [#allocation6], 64   ;;  %p4018_p1 = pmov %p4017_p0 }
  0x68   : > { %p4019_p2 = pmov %p4017_p0 }
  0x69   : > { %2876 = vsyncadd (%p4018_p1), [#allocation6], 4294967232 }
  0x6a   : > { %2878 = dma.done.wait (%p4019_p2), [#allocation9], 12288   ;;  %p4020_p3 = pmov %p4017_p0 }
  0x6b   : > { %v3155_v0 = vld [vmem:[%s3140_s21] sm:$0xff]  ;;  %v3158_v1 = vld [vmem:[%s3140_s21 + $0x8] sm:$0xff]  ;;  %v3169_v5 = vld [vmem:[%s3140_s21 + $0x10] sm:$0xff]  ;;  %s2166_s11 = sshll.u32 %s3133_s24, 7  ;;  %s3648_s13 = scalar_lea.vmem [#allocation11], %s3136_s29 }
  0x6c   : > { %2880 = vsyncadd (%p4020_p3), [#allocation9], 4294955008  ;;  %v3161_v2 = vld [vmem:[%s3140_s21 + $0x20] sm:$0xff]  ;;  %v416_v3 = vadd.f32 %v3158_v1, %v3155_v0  ;;  %v3166_v4 = vld [vmem:[%s3140_s21 + $0x28] sm:$0xff]  ;;  %s3655_s17 = scalar_lea.vmem [#allocation10], %s2166_s11  ;;  %s2315_s23 = sshll.u32 %s2903_s27, 5 }
  0x6d   : > { %v3172_v6 = vld [vmem:[%s3140_s21 + $0x18] sm:$0xff]  ;;  %v422_v7 = vadd.f32 %v3166_v4, %v3161_v2  ;;  %v3177_v8 = vld [vmem:[%s3140_s21 + $0x30] sm:$0xff]  ;;  %v3187_v12 = vld [vmem:[%s3140_s21 + $0x40] sm:$0xff]  ;;  %s2286_s15 = sshll.u32 %s2907_s28, 6  ;;  %s1903_s27 = sand.u32 1, %s3017_s9  }
  0x6e   : > { %v3180_v9 = vld [vmem:[%s3140_s21 + $0x38] sm:$0xff]  ;;  %417 = vadd.xlane.f32.xlu0 %v416_v3  ;;  %v419_v10 = vadd.f32 %v3172_v6, %v3169_v5  ;;  %v3190_v13 = vld [vmem:[%s3140_s21 + $0x48] sm:$0xff]  ;;  %v3193_v14 = vld [vmem:[%s3140_s21 + $0x50] sm:$0xff]  ;;  %s3748_s22 = sadd.s32 %s2315_s23, %s2286_s15  ;;  %s1944_s28 = sshll.u32 %s3648_s13, 4  ;;  %s3762_s28 = int_to_ptr.vmem [resolvable:$true] %s1944_s28 }
  0x6f   : > { %423 = vadd.xlane.f32.xlu1 %v422_v7  ;;  %v425_v11 = vadd.f32 %v3180_v9, %v3177_v8  ;;  %v3196_v15 = vld [vmem:[%s3140_s21 + $0x58] sm:$0xff]  ;;  %v428_v16 = vadd.f32 %v3190_v13, %v3187_v12  ;;  %v3203_v18 = vld [vmem:[%s3140_s21 + $0x60] sm:$0xff]  ;;  %v3206_v19 = vld [vmem:[%s3140_s21 + $0x68] sm:$0xff]  ;;  %s2291_s2 = sshll.u32 %s3748_s22, 7  ;;  %s2287_s1 = sshll.u32 %s3748_s22, 6 }
  0x70   : > { %v431_v17 = vadd.f32 %v3196_v15, %v3193_v14  ;;  %v3209_v20 = vld [vmem:[%s3140_s21 + $0x70] sm:$0xff]  ;;  %v3212_v21 = vld [vmem:[%s3140_s21 + $0x78] sm:$0xff]  ;;  %v3215_v22 = vld [vmem:[%s3140_s21 + $0x80] sm:$0xff]  ;;  %v434_v24 = vadd.f32 %v3206_v19, %v3203_v18  ;;  %s1925_s10 = sshll.u32 %s3655_s17, 4  ;;  %s3776_s5 = scalar_lea.hbm %s3983_s6, %s2291_s2  ;;  %s3791_s10 = int_to_ptr.vmem [resolvable:$true] %s1925_s10 }
  0x71   : > { %v3218_v23 = vld [vmem:[%s3140_s21 + $0x88] sm:$0xff]  ;;  %v3223_v25 = vld [vmem:[%s3140_s21 + $0x90] sm:$0xff]  ;;  %v3226_v26 = vld [vmem:[%s3140_s21 + $0x98] sm:$0xff]  ;;  %v437_v27 = vadd.f32 %v3212_v21, %v3209_v20  ;;  %s4021_s3 = sld [smem:[#allocation26_spill]]  ;;  %s3798_s11 = scalar_lea.sflag [#allocation12], %s1903_s27 }
  0x72   : > { %420 = vadd.xlane.f32.xlu0 %v419_v10  ;;  %v3231_v28 = vld [vmem:[%s3140_s21 + $0xa0] sm:$0xff]  ;;  %v3234_v29 = vld [vmem:[%s3140_s21 + $0xa8] sm:$0xff]  ;;  %v440_v30 = vadd.f32 %v3218_v23, %v3215_v22  ;;  %v3239_v31 = vld [vmem:[%s3140_s21 + $0xb0] sm:$0xff]  ;;  %v443_v33 = vadd.f32 %v3226_v26, %v3223_v25  ;;  %s2759_s23 = scalar_lea.vmem %s3762_s28, 4096  ;;  %s2929_s15 = smov [#allocation11]  }
  0x73   : > { %426 = vadd.xlane.f32.xlu1 %v425_v11  ;;  %v3242_v32 = vld [vmem:[%s3140_s21 + $0xb8] sm:$0xff]  ;;  %v3247_v34 = vld [vmem:[%s3140_s21 + $0xc0] sm:$0xff]  ;;  %v3250_v35 = vld [vmem:[%s3140_s21 + $0xc8] sm:$0xff]  ;;  %v446_v36 = vadd.f32 %v3234_v29, %v3231_v28  ;;  %p2760_p4 = scmp.ne.s32.totalorder %s3762_s28, %s2759_s23 }
  0x74   : > { %v3255_v37 = vld [vmem:[%s3140_s21 + $0xd0] sm:$0xff]  ;;  %v3258_v38 = vld [vmem:[%s3140_s21 + $0xd8] sm:$0xff]  ;;  %v449_v39 = vadd.f32 %v3242_v32, %v3239_v31  ;;  %v3263_v40 = vld [vmem:[%s3140_s21 + $0xe0] sm:$0xff]  ;;  %v452_v42 = vadd.f32 %v3250_v35, %v3247_v34 }
  0x75   : > { %v3266_v41 = vld [vmem:[%s3140_s21 + $0xe8] sm:$0xff]  ;;  %v3271_v43 = vld [vmem:[%s3140_s21 + $0xf0] sm:$0xff]  ;;  %v3274_v44 = vld [vmem:[%s3140_s21 + $0xf8] sm:$0xff]  ;;  %v455_v45 = vadd.f32 %v3258_v38, %v3255_v37  ;;  %p2761_p6 = pnand %p2760_p4, %p3096_p13 }
  0x76   : > { %429 = vadd.xlane.f32.xlu0 %v428_v16  ;;  %v458_v46 = vadd.f32 %v3266_v41, %v3263_v40  ;;  %v461_v47 = vadd.f32 %v3274_v44, %v3271_v43  ;;  %v2477_v48 = vld [vmem:[#allocation8 + $0x154] ss:$24 sps:$4 sm:$0xff]   ;;  %v2481_v50 = vld [vmem:[#allocation8 + $0x150] ss:$24 sps:$4 sm:$0xff]   ;;  %v2483_v52 = vld [vmem:[#allocation8 + $0x124] ss:$24 sps:$4 sm:$0xff]  }
  0x77   : > { %432 = vadd.xlane.f32.xlu1 %v431_v17  ;;  %v2479_v49 = vld [vmem:[#allocation8 + $0x15c] ss:$24 sps:$4 sm:$0xff]   ;;  %v2482_v51 = vld [vmem:[#allocation8 + $0x158] ss:$24 sps:$4 sm:$0xff]   ;;  %v2485_v53 = vld [vmem:[#allocation8 + $0x12c] ss:$24 sps:$4 sm:$0xff]   ;;  %1383 = vmatprep.subr.bf16.mxu0 %v2477_v48  ;;  %s3789_s7 = scalar_lea.hbm %s4021_s3, %s2287_s1  ;;  %p2762_p8 = pneg %p2761_p6 }
  0x78   : > { %1496 = vmatprep.subr.bf16.mxu1 %v2479_v49  ;;  %1384 = vmatpush1.bf16.msra.mxu0 %v2481_v50  ;;  %v2487_v54 = vld [vmem:[#allocation8 + $0x120] ss:$24 sps:$4 sm:$0xff]   ;;  %v2489_v56 = vld [vmem:[#allocation8 + $0xf4] ss:$24 sps:$4 sm:$0xff]   ;;  %v2493_v58 = vld [vmem:[#allocation8 + $0xf0] ss:$24 sps:$4 sm:$0xff]  }
  0x79   : > { %1497 = vmatpush1.bf16.msra.mxu1 %v2482_v51  ;;  %v2488_v55 = vld [vmem:[#allocation8 + $0x128] ss:$24 sps:$4 sm:$0xff]   ;;  %1385 = vmatprep.subr.bf16.mxu0 %v2483_v52  ;;  %v2491_v57 = vld [vmem:[#allocation8 + $0xfc] ss:$24 sps:$4 sm:$0xff]   ;;  %v2494_v59 = vld [vmem:[#allocation8 + $0xf8] ss:$24 sps:$4 sm:$0xff]  }
  0x7a   : > { %435 = vadd.xlane.f32.xlu0 %v434_v24  ;;  %1498 = vmatprep.subr.bf16.mxu1 %v2485_v53  ;;  %v2495_v60 = vld [vmem:[#allocation8 + $0xc4] ss:$24 sps:$4 sm:$0xff]   ;;  %v2499_v62 = vld [vmem:[#allocation8 + $0xc0] ss:$24 sps:$4 sm:$0xff]   ;;  %v2501_v3 = vld [vmem:[#allocation8 + $0x94] ss:$24 sps:$4 sm:$0xff]  }
  0x7b   : > { %438 = vadd.xlane.f32.xlu1 %v437_v27  ;;  %v2497_v61 = vld [vmem:[#allocation8 + $0xcc] ss:$24 sps:$4 sm:$0xff]   ;;  %v2500_v63 = vld [vmem:[#allocation8 + $0xc8] ss:$24 sps:$4 sm:$0xff]   ;;  %v2503_v7 = vld [vmem:[#allocation8 + $0x9c] ss:$24 sps:$4 sm:$0xff]  }
  0x7c   : > { %1386 = vmatpush1.bf16.msra.mxu0 %v2487_v54  ;;  %v2505_v10 = vld [vmem:[#allocation8 + $0x90] ss:$24 sps:$4 sm:$0xff]   ;;  %v2507_v16 = vld [vmem:[#allocation8 + $0x64] ss:$24 sps:$4 sm:$0xff]   ;;  %v2511_v24 = vld [vmem:[#allocation8 + $0x60] ss:$24 sps:$4 sm:$0xff]  }
  0x7d   : > { %1499 = vmatpush1.bf16.msra.mxu1 %v2488_v55  ;;  %1387 = vmatprep.subr.bf16.mxu0 %v2489_v56  ;;  %v2506_v11 = vld [vmem:[#allocation8 + $0x98] ss:$24 sps:$4 sm:$0xff]   ;;  %v2509_v17 = vld [vmem:[#allocation8 + $0x6c] ss:$24 sps:$4 sm:$0xff]   ;;  %v2512_v27 = vld [vmem:[#allocation8 + $0x68] ss:$24 sps:$4 sm:$0xff]  }
  0x7e   : > { %441 = vadd.xlane.f32.xlu0 %v440_v30  ;;  %1500 = vmatprep.subr.bf16.mxu1 %v2491_v57  ;;  %v2513_v30 = vld [vmem:[#allocation8 + $0x34] ss:$24 sps:$4 sm:$0xff]   ;;  %v2529_v50 = vld [vmem:[#allocation8 + $0x2d0] ss:$24 sps:$4 sm:$0xff]   ;;  %s2763_s1 = sshll.u32 %s2929_s15, 4  ;;  %s2764_s1 = int_to_ptr.vmem [resolvable:$false] %s2763_s1 }
  0x7f   : > { %444 = vadd.xlane.f32.xlu1 %v443_v33  ;;  %v2515_v33 = vld [vmem:[#allocation8 + $0x3c] ss:$24 sps:$4 sm:$0xff]   ;;  %v2530_v51 = vld [vmem:[#allocation8 + $0x2d8] ss:$24 sps:$4 sm:$0xff]   ;;  %s2765_s12 = scalar_lea.vmem %s2764_s1, 8192  ;;  %p2766_p11 = scmp.lt.s32.totalorder %s3762_s28, %s2764_s1 }
  0x80   : > { %1388 = vmatpush1.bf16.msra.mxu0 %v2493_v58  ;;  %v2525_v48 = vld [vmem:[#allocation8 + $0x2d4] ss:$24 sps:$4 sm:$0xff]   ;;  %p2767_p5 = scmp.lt.s32.totalorder %s2765_s12, %s2759_s23 }
  0x81   : > { %1501 = vmatpush1.bf16.msra.mxu1 %v2494_v59  ;;  %1389 = vmatprep.subr.bf16.mxu0 %v2495_v60  ;;  %v2527_v49 = vld [vmem:[#allocation8 + $0x2dc] ss:$24 sps:$4 sm:$0xff]  }
  0x82   : > { %447 = vadd.xlane.f32.xlu0 %v446_v36  ;;  %1502 = vmatprep.subr.bf16.mxu1 %v2497_v61  ;;  %v2517_v36 = vld [vmem:[#allocation8 + $0x30] ss:$24 sps:$4 sm:$0xff]   ;;  %p2768_p7 = por %p2767_p5, %p2766_p11 }
  0x83   : > { %450 = vadd.xlane.f32.xlu1 %v449_v39  ;;  %v2518_v39 = vld [vmem:[#allocation8 + $0x38] ss:$24 sps:$4 sm:$0xff]  }
  0x84   : > { %1390 = vmatpush1.bf16.msra.mxu0 %v2499_v62  ;;  %p2769_p9 = pnand %p2768_p7, %p2762_p8 }
  0x85   : > { %1503 = vmatpush1.bf16.msra.mxu1 %v2500_v63  ;;  %1391 = vmatprep.subr.bf16.mxu0 %v2501_v3 }
  0x86   : > { %453 = vadd.xlane.f32.xlu0 %v452_v42  ;;  %1504 = vmatprep.subr.bf16.mxu1 %v2503_v7  ;;  %v2519_v42 = vld [vmem:[#allocation8 + $0x4] ss:$24 sps:$4 sm:$0xff]  }
  0x87   : > { %456 = vadd.xlane.f32.xlu1 %v455_v45  ;;  %v2521_v45 = vld [vmem:[#allocation8 + $0xc] ss:$24 sps:$4 sm:$0xff]  }
  0x88   : > { %1392 = vmatpush1.bf16.msra.mxu0 %v2505_v10 }
  0x89   : > { %1505 = vmatpush1.bf16.msra.mxu1 %v2506_v11  ;;  %1393 = vmatprep.subr.bf16.mxu0 %v2507_v16 }
  0x8a   : > { %459 = vadd.xlane.f32.xlu0 %v458_v46  ;;  %1506 = vmatprep.subr.bf16.mxu1 %v2509_v17  ;;  %v2523_v46 = vld [vmem:[#allocation8] ss:$24 sps:$4 sm:$0xff]  }
  0x8b   : > { %462 = vadd.xlane.f32.xlu1 %v461_v47  ;;  %v2524_v47 = vld [vmem:[#allocation8 + $0x8] ss:$24 sps:$4 sm:$0xff]  }
  0x8c   : > { %1394 = vmatpush1.bf16.msra.mxu0 %v2511_v24 }
  0x8d   : > { %1507 = vmatpush1.bf16.msra.mxu1 %v2512_v27  ;;  %1395 = vmatprep.subr.bf16.mxu0 %v2513_v30 }
  0x8e   : > { %1508 = vmatprep.subr.bf16.mxu1 %v2515_v33 }
  0x90   : > { %1396 = vmatpush1.bf16.msra.mxu0 %v2517_v36 }
  0x91   : > { %1509 = vmatpush1.bf16.msra.mxu1 %v2518_v39  ;;  %1397 = vmatprep.subr.bf16.mxu0 %v2519_v42 }
  0x92   : > { %1510 = vmatprep.subr.bf16.mxu1 %v2521_v45 }
  0x94   : > { %1398 = vmatpush1.bf16.msra.mxu0 %v2523_v46 }
  0x95   : > { %1511 = vmatpush1.bf16.msra.mxu1 %v2524_v47  ;;  %1399 = vmatprep.subr.bf16.mxu0 %v2525_v48 }
  0x96   : > { %1512 = vmatprep.subr.bf16.mxu1 %v2527_v49 }
  0x98   : > { %1400 = vmatpush2.bf16.msra.mxu0 %v2529_v50 }
  0x99   : > { %1513 = vmatpush2.bf16.msra.mxu1 %v2530_v51 }
  0xf7   : > { %v418_v52 = vpop.xlane.xlu0 %417 }
  0xf8   : > { %v465_v53 = vmul.f32 0.00390625, %v418_v52  ;;  %v424_v54 = vpop.xlane.xlu1 %423 }
  0xf9   : > { %v467_v55 = vmul.f32 0.00390625, %v424_v54 }
  0xfa   : > { %v3283_v56 = vsub.f32 %v3155_v0, %v465_v53  ;;  %v3286_v57 = vsub.f32 %v3158_v1, %v465_v53 }
  0xfb   : > { %v3289_v58 = vsub.f32 %v3161_v2, %v467_v55  ;;  %v3292_v59 = vsub.f32 %v3166_v4, %v467_v55  ;;  %v421_v60 = vpop.xlane.xlu0 %420 }
  0xfc   : > { %v466_v61 = vmul.f32 0.00390625, %v421_v60  ;;  %v427_v62 = vpop.xlane.xlu1 %426  ;;  %v513_v63 = vmul.f32 %v3283_v56, %v3283_v56  ;;  %v514_v3 = vmul.f32 %v3286_v57, %v3286_v57 }
  0xfd   : > { %v468_v0 = vmul.f32 0.00390625, %v427_v62  ;;  %v517_v1 = vmul.f32 %v3289_v58, %v3289_v58  ;;  %v518_v2 = vmul.f32 %v3292_v59, %v3292_v59 }
  0xfe   : > { %v3303_v7 = vsub.f32 %v3169_v5, %v466_v61  ;;  %v3306_v4 = vsub.f32 %v3172_v6, %v466_v61  ;;  %v545_v10 = vadd.f32 %v514_v3, %v513_v63 }
  0xff   : > { %v3309_v11 = vsub.f32 %v3177_v8, %v468_v0  ;;  %v3312_v16 = vsub.f32 %v3180_v9, %v468_v0  ;;  %v430_v17 = vpop.xlane.xlu0 %429  ;;  %v551_v30 = vadd.f32 %v518_v2, %v517_v1 }
 0x100   : > { %v469_v24 = vmul.f32 0.00390625, %v430_v17  ;;  %546 = vadd.xlane.f32.xlu0 %v545_v10  ;;  %v433_v27 = vpop.xlane.xlu1 %432  ;;  %v515_v33 = vmul.f32 %v3303_v7, %v3303_v7  ;;  %v516_v5 = vmul.f32 %v3306_v4, %v3306_v4 }
 0x101   : > { %v470_v6 = vmul.f32 0.00390625, %v433_v27  ;;  %v519_v36 = vmul.f32 %v3309_v11, %v3309_v11  ;;  %v520_v8 = vmul.f32 %v3312_v16, %v3312_v16 }
 0x102   : > { %v3323_v9 = vsub.f32 %v3187_v12, %v469_v24  ;;  %v3326_v39 = vsub.f32 %v3190_v13, %v469_v24  ;;  %v548_v42 = vadd.f32 %v516_v5, %v515_v33  ;;  %v2533_v33 = vld [vmem:[#allocation8 + $0x2ac] ss:$24 sps:$4 sm:$0xff]  }
 0x103   : > { %v3329_v45 = vsub.f32 %v3193_v14, %v470_v6  ;;  %v3332_v46 = vsub.f32 %v3196_v15, %v470_v6  ;;  %v436_v47 = vpop.xlane.xlu0 %435  ;;  %v554_v50 = vadd.f32 %v520_v8, %v519_v36  ;;  %v2535_v8 = vld [vmem:[#allocation8 + $0x2a0] ss:$24 sps:$4 sm:$0xff]   ;;  %1514 = vmatprep.subr.bf16.mxu1 %v2533_v33 }
 0x104   : > { %v471_v48 = vmul.f32 0.00390625, %v436_v47  ;;  %552 = vadd.xlane.f32.xlu0 %v551_v30  ;;  %549 = vadd.xlane.f32.xlu1 %v548_v42  ;;  %v439_v49 = vpop.xlane.xlu1 %438  ;;  %v521_v12 = vmul.f32 %v3323_v9, %v3323_v9  ;;  %v522_v13 = vmul.f32 %v3326_v39, %v3326_v39  ;;  %v2531_v30 = vld [vmem:[#allocation8 + $0x2a4] ss:$24 sps:$4 sm:$0xff]  }
 0x105   : > { %v472_v51 = vmul.f32 0.00390625, %v439_v49  ;;  %v523_v14 = vmul.f32 %v3329_v45, %v3329_v45  ;;  %v524_v15 = vmul.f32 %v3332_v46, %v3332_v46  ;;  %1401 = vmatprep.subr.bf16.mxu0 %v2531_v30 }
 0x106   : > { %v3343_v52 = vsub.f32 %v3203_v18, %v471_v48  ;;  %v3346_v53 = vsub.f32 %v3206_v19, %v471_v48  ;;  %v557_v54 = vadd.f32 %v522_v13, %v521_v12  ;;  %1402 = vmatpush2.bf16.msra.mxu0 %v2535_v8  ;;  %v2548_v8 = vld [vmem:[#allocation8 + $0x248] ss:$24 sps:$4 sm:$0xff]  }
 0x107   : > { %v3349_v55 = vsub.f32 %v3209_v20, %v472_v51  ;;  %v3352_v60 = vsub.f32 %v3212_v21, %v472_v51  ;;  %v442_v61 = vpop.xlane.xlu0 %441  ;;  %v560_v3 = vadd.f32 %v524_v15, %v523_v14 }
 0x108   : > { %v473_v62 = vmul.f32 0.00390625, %v442_v61  ;;  %555 = vadd.xlane.f32.xlu1 %v554_v50  ;;  %558 = vadd.xlane.f32.xlu0 %v557_v54  ;;  %v445_v63 = vpop.xlane.xlu1 %444  ;;  %v525_v18 = vmul.f32 %v3343_v52, %v3343_v52  ;;  %v526_v19 = vmul.f32 %v3346_v53, %v3346_v53  ;;  %v2537_v61 = vld [vmem:[#allocation8 + $0x274] ss:$24 sps:$4 sm:$0xff]  }
 0x109   : > { %v474_v0 = vmul.f32 0.00390625, %v445_v63  ;;  %v527_v20 = vmul.f32 %v3349_v55, %v3349_v55  ;;  %v528_v21 = vmul.f32 %v3352_v60, %v3352_v60  ;;  %1403 = vmatprep.subr.bf16.mxu0 %v2537_v61 }
 0x10a   : > { %v3363_v1 = vsub.f32 %v3215_v22, %v473_v62  ;;  %v3366_v2 = vsub.f32 %v3218_v23, %v473_v62  ;;  %v563_v10 = vadd.f32 %v526_v19, %v525_v18  ;;  %v2539_v62 = vld [vmem:[#allocation8 + $0x27c] ss:$24 sps:$4 sm:$0xff]   ;;  %v2542_v18 = vld [vmem:[#allocation8 + $0x278] ss:$24 sps:$4 sm:$0xff]  }
 0x10b   : > { %v3369_v17 = vsub.f32 %v3223_v25, %v474_v0  ;;  %v3372_v24 = vsub.f32 %v3226_v26, %v474_v0  ;;  %v448_v27 = vpop.xlane.xlu0 %447  ;;  %v566_v36 = vadd.f32 %v528_v21, %v527_v20  ;;  %v2536_v25 = vld [vmem:[#allocation8 + $0x2a8] ss:$24 sps:$4 sm:$0xff]  }
 0x10c   : > { %v475_v5 = vmul.f32 0.00390625, %v448_v27  ;;  %561 = vadd.xlane.f32.xlu1 %v560_v3  ;;  %564 = vadd.xlane.f32.xlu0 %v563_v10  ;;  %v451_v6 = vpop.xlane.xlu1 %450  ;;  %v529_v22 = vmul.f32 %v3363_v1, %v3363_v1  ;;  %v530_v23 = vmul.f32 %v3366_v2, %v3366_v2  ;;  %v2541_v3 = vld [vmem:[#allocation8 + $0x270] ss:$24 sps:$4 sm:$0xff]  }
 0x10d   : > { %v476_v42 = vmul.f32 0.00390625, %v451_v6  ;;  %v531_v26 = vmul.f32 %v3369_v17, %v3369_v17  ;;  %v532_v47 = vmul.f32 %v3372_v24, %v3372_v24  ;;  %1515 = vmatpush2.bf16.msra.mxu1 %v2536_v25  ;;  %1404 = vmatpush2.bf16.msra.mxu0 %v2541_v3  ;;  %v2543_v6 = vld [vmem:[#allocation8 + $0x244] ss:$24 sps:$4 sm:$0xff]   ;;  %v2561_v3 = vld [vmem:[#allocation8 + $0x1b4] ss:$24 sps:$4 sm:$0xff]  }
 0x10e   : > { %v3383_v48 = vsub.f32 %v3231_v28, %v475_v5  ;;  %v3386_v49 = vsub.f32 %v3234_v29, %v475_v5  ;;  %v569_v50 = vadd.f32 %v530_v23, %v529_v22  ;;  %1516 = vmatprep.subr.bf16.mxu1 %v2539_v62  ;;  %v2547_v23 = vld [vmem:[#allocation8 + $0x240] ss:$24 sps:$4 sm:$0xff]   ;;  %1405 = vmatprep.subr.bf16.mxu0 %v2543_v6  ;;  %v2555_v62 = vld [vmem:[#allocation8 + $0x1e4] ss:$24 sps:$4 sm:$0xff]  }
 0x10f   : > { %v3389_v12 = vsub.f32 %v3239_v31, %v476_v42  ;;  %v3392_v13 = vsub.f32 %v3242_v32, %v476_v42  ;;  %v454_v51 = vpop.xlane.xlu0 %453  ;;  %v572_v54 = vadd.f32 %v532_v47, %v531_v26 }
 0x110   : > { %v477_v14 = vmul.f32 0.00390625, %v454_v51  ;;  %567 = vadd.xlane.f32.xlu1 %v566_v36  ;;  %570 = vadd.xlane.f32.xlu0 %v569_v50  ;;  %v457_v15 = vpop.xlane.xlu1 %456  ;;  %v533_v28 = vmul.f32 %v3383_v48, %v3383_v48  ;;  %v534_v29 = vmul.f32 %v3386_v49, %v3386_v49 }
 0x111   : > { %v478_v63 = vmul.f32 0.00390625, %v457_v15  ;;  %v535_v31 = vmul.f32 %v3389_v12, %v3389_v12  ;;  %v536_v32 = vmul.f32 %v3392_v13, %v3392_v13  ;;  %1517 = vmatpush2.bf16.msra.mxu1 %v2542_v18  ;;  %1406 = vmatpush2.bf16.msra.mxu0 %v2547_v23  ;;  %v2551_v15 = vld [vmem:[#allocation8 + $0x21c] ss:$24 sps:$4 sm:$0xff]  }
 0x112   : > { %v3403_v19 = vsub.f32 %v3247_v34, %v477_v14  ;;  %v3406_v0 = vsub.f32 %v3250_v35, %v477_v14  ;;  %v575_v20 = vadd.f32 %v534_v29, %v533_v28  ;;  %v2549_v14 = vld [vmem:[#allocation8 + $0x214] ss:$24 sps:$4 sm:$0xff]   ;;  %v2554_v28 = vld [vmem:[#allocation8 + $0x218] ss:$24 sps:$4 sm:$0xff]  }
 0x113   : > { %v3409_v21 = vsub.f32 %v3255_v37, %v478_v63  ;;  %v3412_v10 = vsub.f32 %v3258_v38, %v478_v63  ;;  %v460_v27 = vpop.xlane.xlu0 %459  ;;  %v578_v33 = vadd.f32 %v536_v32, %v535_v31  ;;  %v2545_v37 = vld [vmem:[#allocation8 + $0x24c] ss:$24 sps:$4 sm:$0xff]   ;;  %1407 = vmatprep.subr.bf16.mxu0 %v2549_v14  ;;  %v2559_v31 = vld [vmem:[#allocation8 + $0x1e0] ss:$24 sps:$4 sm:$0xff]   ;;  %v2563_v18 = vld [vmem:[#allocation8 + $0x1bc] ss:$24 sps:$4 sm:$0xff]  }
 0x114   : > { %v479_v30 = vmul.f32 0.00390625, %v460_v27  ;;  %573 = vadd.xlane.f32.xlu1 %v572_v54  ;;  %576 = vadd.xlane.f32.xlu0 %v575_v20  ;;  %v463_v34 = vpop.xlane.xlu1 %462  ;;  %v537_v35 = vmul.f32 %v3403_v19, %v3403_v19  ;;  %v538_v5 = vmul.f32 %v3406_v0, %v3406_v0  ;;  %v2553_v54 = vld [vmem:[#allocation8 + $0x210] ss:$24 sps:$4 sm:$0xff]   ;;  %v2557_v63 = vld [vmem:[#allocation8 + $0x1ec] ss:$24 sps:$4 sm:$0xff]  }
 0x115   : > { %v480_v36 = vmul.f32 0.00390625, %v463_v34  ;;  %v539_v38 = vmul.f32 %v3409_v21, %v3409_v21  ;;  %v540_v22 = vmul.f32 %v3412_v10, %v3412_v10  ;;  %1518 = vmatprep.subr.bf16.mxu1 %v2545_v37  ;;  %1408 = vmatpush2.bf16.msra.mxu0 %v2553_v54  ;;  %v2560_v32 = vld [vmem:[#allocation8 + $0x1e8] ss:$24 sps:$4 sm:$0xff]   ;;  %v2566_v27 = vld [vmem:[#allocation8 + $0x1b8] ss:$24 sps:$4 sm:$0xff]  }
 0x116   : > { %v3423_v25 = vsub.f32 %v3263_v40, %v479_v30  ;;  %v3426_v42 = vsub.f32 %v3266_v41, %v479_v30  ;;  %v581_v26 = vadd.f32 %v538_v5, %v537_v35  ;;  %1519 = vmatpush2.bf16.msra.mxu1 %v2548_v8  ;;  %1409 = vmatprep.subr.bf16.mxu0 %v2555_v62  ;;  %v2565_v20 = vld [vmem:[#allocation8 + $0x1b0] ss:$24 sps:$4 sm:$0xff]   ;;  %v2567_v30 = vld [vmem:[#allocation8 + $0x184] ss:$24 sps:$4 sm:$0xff]  }
 0x117   : > { %v3429_v47 = vsub.f32 %v3271_v43, %v480_v36  ;;  %v3432_v50 = vsub.f32 %v3274_v44, %v480_v36  ;;  %v584_v51 = vadd.f32 %v540_v22, %v539_v38  ;;  %1520 = vmatprep.subr.bf16.mxu1 %v2551_v15  ;;  %v2569_v34 = vld [vmem:[#allocation8 + $0x18c] ss:$24 sps:$4 sm:$0xff]   ;;  %v2572_v35 = vld [vmem:[#allocation8 + $0x188] ss:$24 sps:$4 sm:$0xff]  }
 0x118   : > { %579 = vadd.xlane.f32.xlu1 %v578_v33  ;;  %582 = vadd.xlane.f32.xlu0 %v581_v26  ;;  %v541_v40 = vmul.f32 %v3423_v25, %v3423_v25  ;;  %v542_v41 = vmul.f32 %v3426_v42, %v3426_v42  ;;  %v2571_v33 = vld [vmem:[#allocation8 + $0x180] ss:$24 sps:$4 sm:$0xff]   ;;  %v2575_v5 = vld [vmem:[#allocation8 + $0x164] ss:$24 sps:$4 sm:$0xff]   ;;  %v674_v26 = vlaneseq }
 0x119   : > { %v543_v43 = vmul.f32 %v3429_v47, %v3429_v47  ;;  %v544_v44 = vmul.f32 %v3432_v50, %v3432_v50  ;;  %1410 = vmatpush2.bf16.msra.mxu0 %v2559_v31 }
 0x11a   : > { %v587_v29 = vadd.f32 %v542_v41, %v541_v40  ;;  %1521 = vmatpush2.bf16.msra.mxu1 %v2554_v28  ;;  %1411 = vmatprep.subr.bf16.mxu0 %v2561_v3 }
 0x11b   : > { %v590_v61 = vadd.f32 %v544_v44, %v543_v43  ;;  %1522 = vmatprep.subr.bf16.mxu1 %v2557_v63  ;;  %v3442_v44 = vshrl.u32 %v674_v26, 7 }
 0x11c   : > { %585 = vadd.xlane.f32.xlu1 %v584_v51  ;;  %588 = vadd.xlane.f32.xlu0 %v587_v29 }
 0x11d   : > { %1412 = vmatpush2.bf16.msra.mxu0 %v2565_v20  ;;  %v3445_v31 = vsub.s32 1, %v3442_v44 }
 0x11e   : > { %1523 = vmatpush2.bf16.msra.mxu1 %v2560_v32  ;;  %1413 = vmatprep.subr.bf16.mxu0 %v2567_v30  ;;  %v3448_v32 = vsub.s32 0, %v3442_v44 }
 0x11f   : > { %1524 = vmatprep.subr.bf16.mxu1 %v2563_v18  ;;  %v414_v18 = vld [vmem:[#allocation5] sm:$0x3] }
 0x120   : > { %591 = vadd.xlane.f32.xlu1 %v590_v61 }
 0x121   : > { %1414 = vmatpush2.bf16.msra.mxu0 %v2571_v33 }
 0x122   : > { %1525 = vmatpush2.bf16.msra.mxu1 %v2566_v27  ;;  %1609 = vmatprep.subr.bf16.mxu0 %v2575_v5 }
 0x123   : > { %1526 = vmatprep.subr.bf16.mxu1 %v2569_v34 }
 0x126   : > { %1527 = vmatpush2.bf16.msra.mxu1 %v2572_v35  ;;  %v415_v35 = vld [vmem:[#allocation7] sm:$0x3] }
 0x127   : > { %2318 = vmatprep.subr.bf16.mxu1 %v2575_v5  ;;  %v3451_v5 = vrot.slane %v414_v18, %v3445_v31  ;;  %v3459_v26 = vrot.slane %v415_v35, %v3445_v31 }
 0x189   : > { %v547_v6 = vpop.xlane.xlu0 %546 }
 0x18a   : > { %v593_v37 = vmul.f32 0.00390625, %v547_v6  ;;  %v3454_v6 = vrot.slane %v414_v18, %v3448_v32 }
 0x18c   : > { %v609_v36 = vadd.f32 1e-05, %v593_v37 }
 0x18d   : > { %v550_v38 = vpop.xlane.xlu1 %549  ;;  %v553_v22 = vpop.xlane.xlu0 %552 }
 0x18e   : > { %2621 = vrsqrt.f32 %v609_v36  ;;  %v594_v23 = vmul.f32 0.00390625, %v550_v38  ;;  %v595_v8 = vmul.f32 0.00390625, %v553_v22 }
 0x190   : > { %v610_v51 = vadd.f32 1e-05, %v594_v23  ;;  %v611_v40 = vadd.f32 1e-05, %v595_v8 }
 0x191   : > { %v556_v41 = vpop.xlane.xlu1 %555  ;;  %v559_v14 = vpop.xlane.xlu0 %558 }
 0x192   : > { %2623 = vrsqrt.f32 %v610_v51  ;;  %v596_v15 = vmul.f32 0.00390625, %v556_v41  ;;  %v597_v43 = vmul.f32 0.00390625, %v559_v14  ;;  %v3464_v14 = vrot.slane %v415_v35, %v3448_v32 }
 0x193   : > { %2625 = vrsqrt.f32 %v611_v40 }
 0x194   : > { %v612_v54 = vadd.f32 1e-05, %v596_v15  ;;  %v613_v28 = vadd.f32 1e-05, %v597_v43 }
 0x195   : > { %v562_v29 = vpop.xlane.xlu1 %561  ;;  %v565_v61 = vpop.xlane.xlu0 %564 }
 0x196   : > { %2627 = vrsqrt.f32 %v612_v54  ;;  %v598_v62 = vmul.f32 0.00390625, %v562_v29  ;;  %v599_v63 = vmul.f32 0.00390625, %v565_v61 }
 0x197   : > { %2629 = vrsqrt.f32 %v613_v28 }
 0x198   : > { %v614_v3 = vadd.f32 1e-05, %v598_v62  ;;  %v615_v34 = vadd.f32 1e-05, %v599_v63 }
 0x199   : > { %v568_v20 = vpop.xlane.xlu1 %567  ;;  %v571_v33 = vpop.xlane.xlu0 %570 }
 0x19a   : > { %2631 = vrsqrt.f32 %v614_v3  ;;  %v600_v27 = vmul.f32 0.00390625, %v568_v20  ;;  %v601_v23 = vmul.f32 0.00390625, %v571_v33 }
 0x19b   : > { %v2622_v30 = vpop.eup %2621 }
 0x19c   : > { %v616_v37 = vadd.f32 1e-05, %v600_v27  ;;  %v642_v36 = vmul.f32 %v2622_v30, %v3286_v57  ;;  %v641_v38 = vmul.f32 %v2622_v30, %v3283_v56  ;;  %v617_v28 = vadd.f32 1e-05, %v601_v23 }
 0x19d   : > { %v574_v22 = vpop.xlane.xlu1 %573  ;;  %v577_v20 = vpop.xlane.xlu0 %576 }
 0x19e   : > { %2633 = vrsqrt.f32 %v616_v37  ;;  %v602_v8 = vmul.f32 0.00390625, %v574_v22  ;;  %v685_v40 = vmul.f32 %v3451_v5, %v642_v36  ;;  %v684_v41 = vmul.f32 %v3454_v6, %v641_v38  ;;  %v2573_v36 = vld [vmem:[#allocation8 + $0x160] ss:$24 sps:$4 sm:$0xff]  }
 0x19f   : > { %v2624_v51 = vpop.eup %2623  ;;  %2635 = vrsqrt.f32 %v615_v34  ;;  %v603_v22 = vmul.f32 0.00390625, %v577_v20 }
 0x1a0   : > { %v2626_v15 = vpop.eup %2625  ;;  %v618_v57 = vadd.f32 1e-05, %v602_v8  ;;  %v644_v56 = vmul.f32 %v2624_v51, %v3306_v4  ;;  %v643_v43 = vmul.f32 %v2624_v51, %v3303_v7  ;;  %v728_v63 = vadd.f32 %v3459_v26, %v685_v40  ;;  %v2578_v8 = vld [vmem:[#allocation8 + $0x134] ss:$24 sps:$4 sm:$0xff]  }
 0x1a1   : > { %v646_v54 = vmul.f32 %v2626_v15, %v3292_v59  ;;  %v580_v29 = vpop.xlane.xlu1 %579  ;;  %v727_v18 = vadd.f32 %v3464_v14, %v684_v41  ;;  %v645_v7 = vmul.f32 %v2626_v15, %v3289_v58 }
 0x1a2   : > { %v687_v61 = vmul.f32 %v3451_v5, %v644_v56  ;;  %v686_v3 = vmul.f32 %v3454_v6, %v643_v43  ;;  %2637 = vrsqrt.f32 %v618_v57  ;;  %v604_v30 = vmul.f32 0.00390625, %v580_v29  ;;  %v2576_v43 = vld [vmem:[#allocation8 + $0x130] ss:$24 sps:$4 sm:$0xff]  }
 0x1a3   : > { %v2628_v62 = vpop.eup %2627  ;;  %v689_v33 = vmul.f32 %v3451_v5, %v646_v54  ;;  %2639 = vrsqrt.f32 %v617_v28  ;;  %v688_v51 = vmul.f32 %v3454_v6, %v645_v7  ;;  %v619_v29 = vadd.f32 1e-05, %v603_v22 }
 0x1a4   : > { %v730_v27 = vadd.f32 %v3459_v26, %v687_v61  ;;  %v648_v4 = vmul.f32 %v2628_v62, %v3312_v16  ;;  %v2630_v59 = vpop.eup %2629  ;;  %v729_v34 = vadd.f32 %v3464_v14, %v686_v3  ;;  %v647_v35 = vmul.f32 %v2628_v62, %v3309_v11  ;;  %v2581_v62 = vld [vmem:[#allocation8 + $0x104] ss:$24 sps:$4 sm:$0xff]  }
 0x1a5   : > { %v650_v11 = vmul.f32 %v2630_v59, %v3326_v39  ;;  %v620_v41 = vadd.f32 1e-05, %v604_v30  ;;  %v586_v15 = vpop.xlane.xlu1 %585  ;;  %v732_v57 = vadd.f32 %v3459_v26, %v689_v33  ;;  %v649_v7 = vmul.f32 %v2630_v59, %v3323_v9  ;;  %v2579_v33 = vld [vmem:[#allocation8 + $0x100] ss:$24 sps:$4 sm:$0xff]  }
 0x1a6   : > { %v3479_v37 = vpack.c.bf16 %v730_v27, %v728_v63  ;;  %v3481_v23 = vpack.c.bf16 %v729_v34, %v727_v18  ;;  %v691_v16 = vmul.f32 %v3451_v5, %v648_v4  ;;  %v690_v58 = vmul.f32 %v3454_v6, %v647_v35 }
 0x1a7   : > { %v2632_v38 = vpop.eup %2631  ;;  %v693_v63 = vmul.f32 %v3451_v5, %v650_v11  ;;  %v606_v20 = vmul.f32 0.00390625, %v586_v15  ;;  %v731_v27 = vadd.f32 %v3464_v14, %v688_v51  ;;  %2641 = vrsqrt.f32 %v620_v41  ;;  %v2582_v11 = vld [vmem:[#allocation8 + $0xd0] ss:$24 sps:$4 sm:$0xff]  }
 0x1a8   : > { %1415 = vmatprep.mubr.bf16.mxu0 %v3479_v37  ;;  %1528 = vmatprep.mubr.bf16.mxu1 %v3479_v37  ;;  %v652_v40 = vmul.f32 %v2632_v38, %v3332_v46  ;;  %v734_v56 = vadd.f32 %v3459_v26, %v691_v16  ;;  %v733_v54 = vadd.f32 %v3464_v14, %v690_v58  ;;  %v583_v46 = vpop.xlane.xlu0 %582  ;;  %2643 = vrsqrt.f32 %v619_v29  ;;  %v2584_v16 = vld [vmem:[#allocation8 + $0xd4] ss:$24 sps:$4 sm:$0xff]  }
 0x1a9   : > { %1416 = vmatmul.mubr.bf16.vlgmr.msra.gmra.mxu0 %v3481_v23  ;;  %1529 = vmatmul.mubr.bf16.vlgmr.msra.gmra.mxu1 %v3481_v23  ;;  %v651_v3 = vmul.f32 %v2632_v38, %v3329_v45  ;;  %v605_v34 = vmul.f32 0.00390625, %v583_v46  ;;  %v736_v35 = vadd.f32 %v3459_v26, %v693_v63  ;;  %v622_v22 = vadd.f32 1e-05, %v606_v20  ;;  %v592_v59 = vpop.xlane.xlu1 %591 }
 0x1aa   : > { %1610 = vmatpush1.bf16.msra.mxu0 %v2573_v36  ;;  %2334 = vmatpush1.bf16.msra.mxu1 %v2573_v36  ;;  %v695_v28 = vmul.f32 %v3451_v5, %v652_v40  ;;  %v3496_v61 = vpack.c.bf16 %v734_v56, %v732_v57  ;;  %v3506_v45 = vpack.c.bf16 %v733_v54, %v731_v27 }
 0x1ab   : > { %v2634_v39 = vpop.eup %2633  ;;  %1611 = vmatprep.subr.bf16.mxu0 %v2578_v8  ;;  %2319 = vmatprep.subr.bf16.mxu1 %v2578_v8  ;;  %v694_v36 = vmul.f32 %v3454_v6, %v651_v3  ;;  %v692_v8 = vmul.f32 %v3454_v6, %v649_v7  ;;  %v621_v51 = vadd.f32 1e-05, %v605_v34  ;;  %2645 = vrsqrt.f32 %v622_v22  ;;  %v2588_v7 = vld [vmem:[#allocation8 + $0x70] ss:$24 sps:$4 sm:$0xff]  }
 0x1ac   : > { %v2636_v18 = vpop.eup %2635  ;;  %1425 = vmatprep.mubr.bf16.mxu0 %v3496_v61  ;;  %1538 = vmatprep.mubr.bf16.mxu1 %v3496_v61  ;;  %v738_v4 = vadd.f32 %v3459_v26, %v695_v28  ;;  %v656_v30 = vmul.f32 %v2634_v39, %v3352_v60  ;;  %v655_v57 = vmul.f32 %v2634_v39, %v3349_v55  ;;  %v589_v56 = vpop.xlane.xlu0 %588 }
 0x1ad   : > { %v654_v38 = vmul.f32 %v2636_v18, %v3346_v53  ;;  %v2587_v53 = vld [vmem:[#allocation8 + $0xa4] ss:$24 sps:$4 sm:$0xff]   ;;  %v737_v41 = vadd.f32 %v3464_v14, %v694_v36  ;;  %v735_v54 = vadd.f32 %v3464_v14, %v692_v8  ;;  %v653_v29 = vmul.f32 %v2636_v18, %v3343_v52 }
 0x1ae   : > { %1612 = vmatpush1.bf16.msra.mxu0 %v2576_v43  ;;  %2335 = vmatpush1.bf16.msra.mxu1 %v2576_v43  ;;  %v3513_v60 = vpack.c.bf16 %v738_v4, %v736_v35  ;;  %v699_v58 = vmul.f32 %v3451_v5, %v656_v30  ;;  %v608_v43 = vmul.f32 0.00390625, %v592_v59  ;;  %2647 = vrsqrt.f32 %v621_v51  ;;  %v2590_v4 = vld [vmem:[#allocation8 + $0x74] ss:$24 sps:$4 sm:$0xff]  }
 0x1af   : > { %1613 = vmatprep.subr.bf16.mxu0 %v2581_v62  ;;  %2320 = vmatprep.subr.bf16.mxu1 %v2581_v62  ;;  %v2638_v9 = vpop.eup %2637  ;;  %v697_v15 = vmul.f32 %v3451_v5, %v654_v38  ;;  %v2585_v62 = vld [vmem:[#allocation8 + $0xa0] ss:$24 sps:$4 sm:$0xff]   ;;  %v607_v55 = vmul.f32 0.00390625, %v589_v56  ;;  %v3527_v39 = vpack.c.bf16 %v737_v41, %v735_v54  ;;  %v698_v20 = vmul.f32 %v3454_v6, %v655_v57 }
 0x1b0   : > { %v2640_v40 = vpop.eup %2639  ;;  %v742_v28 = vadd.f32 %v3459_v26, %v699_v58  ;;  %v660_v46 = vmul.f32 %v2638_v9, %v3372_v24  ;;  %v624_v27 = vadd.f32 1e-05, %v608_v43  ;;  %v696_v24 = vmul.f32 %v3454_v6, %v653_v29  ;;  %v2591_v58 = vld [vmem:[#allocation8 + $0x40] ss:$24 sps:$4 sm:$0xff]  }
 0x1b1   : > { %1426 = vmatmul.mubr.bf16.gmra.mxu0 %v3506_v45  ;;  %1539 = vmatmul.mubr.bf16.gmra.mxu1 %v3506_v45  ;;  %v658_v63 = vmul.f32 %v2640_v40, %v3366_v2  ;;  %v740_v3 = vadd.f32 %v3459_v26, %v697_v15  ;;  %v623_v34 = vadd.f32 1e-05, %v607_v55  ;;  %v741_v35 = vadd.f32 %v3464_v14, %v698_v20  ;;  %v2594_v15 = vld [vmem:[#allocation8 + $0x10] ss:$24 sps:$4 sm:$0xff]  }
 0x1b2   : > { %1614 = vmatpush1.bf16.msra.mxu0 %v2579_v33  ;;  %2336 = vmatpush1.bf16.msra.mxu1 %v2579_v33  ;;  %v703_v2 = vmul.f32 %v3451_v5, %v660_v46  ;;  %v2593_v33 = vld [vmem:[#allocation8 + $0x44] ss:$24 sps:$4 sm:$0xff]   ;;  %v659_v36 = vmul.f32 %v2638_v9, %v3369_v17  ;;  %2649 = vrsqrt.f32 %v624_v27  ;;  %v739_v22 = vadd.f32 %v3464_v14, %v696_v24  ;;  %v2602_v27 = vld [vmem:[#allocation8 + $0x2b4] ss:$24 sps:$4 sm:$0xff]   ;;  %v2600_v24 = vld [vmem:[#allocation8 + $0x2b0] ss:$24 sps:$4 sm:$0xff]  }
 0x1b3   : > { %1435 = vmatprep.mubr.bf16.mxu0 %v3513_v60  ;;  %1548 = vmatprep.mubr.bf16.mxu1 %v3513_v60  ;;  %v3533_v52 = vpack.c.bf16 %v742_v28, %v740_v3  ;;  %v701_v30 = vmul.f32 %v3451_v5, %v658_v63  ;;  %v657_v59 = vmul.f32 %v2640_v40, %v3363_v1  ;;  %2651 = vrsqrt.f32 %v623_v34  ;;  %v2597_v63 = vld [vmem:[#allocation8 + $0x2e0] ss:$24 sps:$4 sm:$0xff]  }
 0x1b4   : > { %1615 = vmatprep.subr.bf16.mxu0 %v2584_v16  ;;  %2321 = vmatprep.subr.bf16.mxu1 %v2584_v16  ;;  %v2642_v18 = vpop.eup %2641  ;;  %v746_v16 = vadd.f32 %v3459_v26, %v703_v2  ;;  %v3547_v17 = vpack.c.bf16 %v741_v35, %v739_v22  ;;  %v702_v9 = vmul.f32 %v3454_v6, %v659_v36  ;;  %v2603_v22 = vld [vmem:[#allocation8 + $0x280] ss:$24 sps:$4 sm:$0xff]  }
 0x1b5   : > { %v2644_v38 = vpop.eup %2643  ;;  %v664_v8 = vmul.f32 %v2642_v18, %v3392_v13  ;;  %v744_v51 = vadd.f32 %v3459_v26, %v701_v30  ;;  %v700_v13 = vmul.f32 %v3454_v6, %v657_v59  ;;  %v663_v54 = vmul.f32 %v2642_v18, %v3389_v12  ;;  %v2605_v18 = vld [vmem:[#allocation8 + $0x284] ss:$24 sps:$4 sm:$0xff]  }
 0x1b6   : > { %1616 = vmatpush1.bf16.msra.mxu0 %v2582_v11  ;;  %2337 = vmatpush1.bf16.msra.mxu1 %v2582_v11  ;;  %v662_v11 = vmul.f32 %v2644_v38, %v3386_v49  ;;  %v2599_v49 = vld [vmem:[#allocation8 + $0x2e4] ss:$24 sps:$4 sm:$0xff]   ;;  %v745_v56 = vadd.f32 %v3464_v14, %v702_v9  ;;  %v661_v46 = vmul.f32 %v2644_v38, %v3383_v48  ;;  %v2606_v9 = vld [vmem:[#allocation8 + $0x250] ss:$24 sps:$4 sm:$0xff]  }
 0x1b7   : > { %1617 = vmatprep.subr.bf16.mxu0 %v2587_v53  ;;  %2322 = vmatprep.subr.bf16.mxu1 %v2587_v53  ;;  %v2596_v53 = vld [vmem:[#allocation8 + $0x14] ss:$24 sps:$4 sm:$0xff]   ;;  %v3553_v1 = vpack.c.bf16 %v746_v16, %v744_v51  ;;  %v707_v40 = vmul.f32 %v3451_v5, %v664_v8  ;;  %v743_v28 = vadd.f32 %v3464_v14, %v700_v13 }
 0x1b8   : > { %v2646_v41 = vpop.eup %2645  ;;  %v705_v43 = vmul.f32 %v3451_v5, %v662_v11  ;;  %v706_v20 = vmul.f32 %v3454_v6, %v663_v54  ;;  %v2611_v11 = vld [vmem:[#allocation8 + $0x224] ss:$24 sps:$4 sm:$0xff]  }
 0x1b9   : > { %1436 = vmatmul.mubr.bf16.gmra.mxu0 %v3527_v39  ;;  %1549 = vmatmul.mubr.bf16.gmra.mxu1 %v3527_v39  ;;  %v750_v29 = vadd.f32 %v3459_v26, %v707_v40  ;;  %v3567_v3 = vpack.c.bf16 %v745_v56, %v743_v28  ;;  %v667_v30 = vmul.f32 %v2646_v41, %v3409_v21  ;;  %v2612_v28 = vld [vmem:[#allocation8 + $0x1f0] ss:$24 sps:$4 sm:$0xff]  }
 0x1ba   : > { %1618 = vmatpush1.bf16.msra.mxu0 %v2585_v62  ;;  %2338 = vmatpush1.bf16.msra.mxu1 %v2585_v62  ;;  %v668_v62 = vmul.f32 %v2646_v41, %v3412_v10  ;;  %v748_v12 = vadd.f32 %v3459_v26, %v705_v43  ;;  %v704_v10 = vmul.f32 %v3454_v6, %v661_v46  ;;  %v2614_v43 = vld [vmem:[#allocation8 + $0x1f4] ss:$24 sps:$4 sm:$0xff]   ;;  %v2615_v46 = vld [vmem:[#allocation8 + $0x1c0] ss:$24 sps:$4 sm:$0xff]  }
 0x1bb   : > { %1445 = vmatprep.mubr.bf16.mxu0 %v3533_v52  ;;  %1558 = vmatprep.mubr.bf16.mxu1 %v3533_v52  ;;  %v2648_v57 = vpop.eup %2647  ;;  %v710_v21 = vmul.f32 %v3454_v6, %v667_v30 }
 0x1bc   : > { %1619 = vmatprep.subr.bf16.mxu0 %v2590_v4  ;;  %2323 = vmatprep.subr.bf16.mxu1 %v2590_v4  ;;  %v666_v55 = vmul.f32 %v2648_v57, %v3406_v0  ;;  %v3573_v48 = vpack.c.bf16 %v750_v29, %v748_v12  ;;  %v711_v0 = vmul.f32 %v3451_v5, %v668_v62 }
 0x1bd   : > { %v665_v36 = vmul.f32 %v2648_v57, %v3403_v19  ;;  %v2609_v57 = vld [vmem:[#allocation8 + $0x220] ss:$24 sps:$4 sm:$0xff]  }
 0x1be   : > { %1620 = vmatpush1.bf16.msra.mxu0 %v2588_v7  ;;  %2339 = vmatpush1.bf16.msra.mxu1 %v2588_v7  ;;  %v709_v2 = vmul.f32 %v3451_v5, %v666_v55  ;;  %v749_v7 = vadd.f32 %v3464_v14, %v706_v20  ;;  %v754_v35 = vadd.f32 %v3459_v26, %v711_v0 }
 0x1bf   : > { %1621 = vmatprep.subr.bf16.mxu0 %v2593_v33  ;;  %2324 = vmatprep.subr.bf16.mxu1 %v2593_v33  ;;  %v2650_v4 = vpop.eup %2649  ;;  %v747_v33 = vadd.f32 %v3464_v14, %v704_v10 }
 0x1c0   : > { %v2652_v34 = vpop.eup %2651  ;;  %v672_v38 = vmul.f32 %v2650_v4, %v3432_v50  ;;  %v752_v16 = vadd.f32 %v3459_v26, %v709_v2  ;;  %v708_v50 = vmul.f32 %v3454_v6, %v665_v36  ;;  %v671_v41 = vmul.f32 %v2650_v4, %v3429_v47 }
 0x1c1   : > { %1446 = vmatmul.mubr.bf16.gmra.mxu0 %v3547_v17  ;;  %1559 = vmatmul.mubr.bf16.gmra.mxu1 %v3547_v17  ;;  %v3587_v59 = vpack.c.bf16 %v749_v7, %v747_v33  ;;  %v670_v8 = vmul.f32 %v2652_v34, %v3426_v42  ;;  %v753_v42 = vadd.f32 %v3464_v14, %v710_v21 }
 0x1c2   : > { %1622 = vmatpush1.bf16.msra.mxu0 %v2591_v58  ;;  %2340 = vmatpush1.bf16.msra.mxu1 %v2591_v58  ;;  %v2608_v58 = vld [vmem:[#allocation8 + $0x254] ss:$24 sps:$4 sm:$0xff]   ;;  %v3593_v19 = vpack.c.bf16 %v754_v35, %v752_v16  ;;  %v715_v51 = vmul.f32 %v3451_v5, %v672_v38  ;;  %v751_v13 = vadd.f32 %v3464_v14, %v708_v50 }
 0x1c3   : > { %1455 = vmatprep.mubr.bf16.mxu0 %v3553_v1  ;;  %1568 = vmatprep.mubr.bf16.mxu1 %v3553_v1 }
 0x1c4   : > { %1623 = vmatprep.subr.bf16.mxu0 %v2596_v53  ;;  %2325 = vmatprep.subr.bf16.mxu1 %v2596_v53  ;;  %v713_v53 = vmul.f32 %v3451_v5, %v670_v8  ;;  %v758_v40 = vadd.f32 %v3459_v26, %v715_v51  ;;  %v714_v5 = vmul.f32 %v3454_v6, %v671_v41 }
 0x1c6   : > { %1624 = vmatpush1.bf16.msra.mxu0 %v2594_v15  ;;  %2341 = vmatpush1.bf16.msra.mxu1 %v2594_v15  ;;  %v669_v15 = vmul.f32 %v2652_v34, %v3423_v25  ;;  %v756_v56 = vadd.f32 %v3459_v26, %v713_v53  ;;  %v2617_v25 = vld [vmem:[#allocation8 + $0x1c4] ss:$24 sps:$4 sm:$0xff]   ;;  %v757_v29 = vadd.f32 %v3464_v14, %v714_v5 }
 0x1c7   : > { %1625 = vmatprep.subr.bf16.mxu0 %v2599_v49  ;;  %2326 = vmatprep.subr.bf16.mxu1 %v2599_v49  ;;  %v771_v49 = vpack.c.bf16 %v753_v42, %v751_v13 }
 0x1c8   : > { %v774_v47 = vpack.c.bf16 %v758_v40, %v756_v56  ;;  %v712_v54 = vmul.f32 %v3454_v6, %v669_v15  ;;  %v2618_v6 = vld [vmem:[#allocation8 + $0x190] ss:$24 sps:$4 sm:$0xff]  }
 0x1c9   : > { %1456 = vmatmul.mubr.bf16.gmra.mxu0 %v3567_v3  ;;  %1569 = vmatmul.mubr.bf16.gmra.mxu1 %v3567_v3 }
 0x1ca   : > { %1626 = vmatpush2.bf16.msra.mxu0 %v2597_v63  ;;  %2342 = vmatpush2.bf16.msra.mxu1 %v2597_v63  ;;  %v755_v26 = vadd.f32 %v3464_v14, %v712_v54  ;;  %v2620_v63 = vld [vmem:[#allocation8 + $0x194] ss:$24 sps:$4 sm:$0xff]   ;;  %v883_v14 = vsub.s32 2, %v3442_v44 }
 0x1cb   : > { %1465 = vmatprep.mubr.bf16.mxu0 %v3573_v48  ;;  %1578 = vmatprep.mubr.bf16.mxu1 %v3573_v48 }
 0x1cc   : > { %1627 = vmatprep.subr.bf16.mxu0 %v2602_v27  ;;  %2327 = vmatprep.subr.bf16.mxu1 %v2602_v27  ;;  %v773_v62 = vpack.c.bf16 %v757_v29, %v755_v26 }
 0x1ce   : > { %1628 = vmatpush2.bf16.msra.mxu0 %v2600_v24  ;;  %2343 = vmatpush2.bf16.msra.mxu1 %v2600_v24 }
 0x1cf   : > { %1629 = vmatprep.subr.bf16.mxu0 %v2605_v18  ;;  %2328 = vmatprep.subr.bf16.mxu1 %v2605_v18 }
 0x1d1   : > { %1466 = vmatmul.mubr.bf16.gmra.mxu0 %v3587_v59  ;;  %1579 = vmatmul.mubr.bf16.gmra.mxu1 %v3587_v59 }
 0x1d2   : > { %1630 = vmatpush2.bf16.msra.mxu0 %v2603_v22  ;;  %2344 = vmatpush2.bf16.msra.mxu1 %v2603_v22 }
 0x1d3   : > { %1475 = vmatprep.mubr.bf16.mxu0 %v3593_v19  ;;  %1588 = vmatprep.mubr.bf16.mxu1 %v3593_v19 }
 0x1d4   : > { %1631 = vmatprep.subr.bf16.mxu0 %v2608_v58  ;;  %2329 = vmatprep.subr.bf16.mxu1 %v2608_v58 }
 0x1d6   : > { %1632 = vmatpush2.bf16.msra.mxu0 %v2606_v9  ;;  %2345 = vmatpush2.bf16.msra.mxu1 %v2606_v9 }
 0x1d7   : > { %1633 = vmatprep.subr.bf16.mxu0 %v2611_v11  ;;  %2330 = vmatprep.subr.bf16.mxu1 %v2611_v11 }
 0x1d9   : > { %1476 = vmatmul.mubr.bf16.gmra.mxu0 %v771_v49  ;;  %1589 = vmatmul.mubr.bf16.gmra.mxu1 %v771_v49 }
 0x1da   : > { %1634 = vmatpush2.bf16.msra.mxu0 %v2609_v57  ;;  %2346 = vmatpush2.bf16.msra.mxu1 %v2609_v57 }
 0x1db   : > { %1485 = vmatprep.mubr.bf16.mxu0 %v774_v47  ;;  %1598 = vmatprep.mubr.bf16.mxu1 %v774_v47 }
 0x1dc   : > { %1635 = vmatprep.subr.bf16.mxu0 %v2614_v43  ;;  %2331 = vmatprep.subr.bf16.mxu1 %v2614_v43 }
 0x1de   : > { %1636 = vmatpush2.bf16.msra.mxu0 %v2612_v28  ;;  %2347 = vmatpush2.bf16.msra.mxu1 %v2612_v28 }
 0x1df   : > { %1637 = vmatprep.subr.bf16.mxu0 %v2617_v25  ;;  %2332 = vmatprep.subr.bf16.mxu1 %v2617_v25 }
 0x1e1   : > { %1486 = vmatmul.mubr.bf16.gmra.mxu0 %v773_v62  ;;  %1599 = vmatmul.mubr.bf16.gmra.mxu1 %v773_v62 }
 0x1e2   : > { %1638 = vmatpush2.bf16.msra.mxu0 %v2615_v46  ;;  %2348 = vmatpush2.bf16.msra.mxu1 %v2615_v46 }
 0x1e3   : > { %1641 = vmatprep.mubr.bf16.mxu0 %v3479_v37  ;;  %1681 = vmatprep.mubr.bf16.mxu1 %v3553_v1  ;;  %v3627_v37 = vld [vmem:[%s3981_s4] sm:$0x3f] }
 0x1e4   : > { %1639 = vmatprep.subr.bf16.mxu0 %v2620_v63  ;;  %2333 = vmatprep.subr.bf16.mxu1 %v2620_v63 }
 0x1e6   : > { %1640 = vmatpush2.bf16.msra.mxu0 %v2618_v6  ;;  %2349 = vmatpush2.bf16.msra.mxu1 %v2618_v6 }
 0x1e9   : > { %1642 = vmatmul.mubr.bf16.vlgmr.msra.gmra.mxu0 %v3481_v23  ;;  %1682 = vmatmul.mubr.bf16.vlgmr.msra.gmra.mxu1 %v3567_v3  ;;  %v887_v23 = vsub.s32 3, %v3442_v44 }
 0x1ea   : > { %1651 = vmatprep.mubr.bf16.mxu0 %v3496_v61  ;;  %1691 = vmatprep.mubr.bf16.mxu1 %v3573_v48  ;;  %v3631_v61 = vrot.slane %v3627_v37, %v883_v14 }
 0x1f1   : > { %1652 = vmatmul.mubr.bf16.gmra.mxu0 %v3506_v45  ;;  %1692 = vmatmul.mubr.bf16.gmra.mxu1 %v3587_v59  ;;  %v3635_v45 = vrot.slane %v3627_v37, %v3448_v32 }
 0x1f2   : > { %1661 = vmatprep.mubr.bf16.mxu0 %v3513_v60  ;;  %1701 = vmatprep.mubr.bf16.mxu1 %v3593_v19  ;;  %v3639_v60 = vrot.slane %v3627_v37, %v3445_v31 }
 0x1f9   : > { %1662 = vmatmul.mubr.bf16.gmra.mxu0 %v3527_v39  ;;  %1702 = vmatmul.mubr.bf16.gmra.mxu1 %v771_v49  ;;  %v3642_v39 = vrot.slane %v3627_v37, %v887_v23 }
 0x1fa   : > { %1671 = vmatprep.mubr.bf16.mxu0 %v3533_v52  ;;  %1711 = vmatprep.mubr.bf16.mxu1 %v774_v47 }
 0x201   : > { %1672 = vmatmul.mubr.bf16.gmra.mxu0 %v3547_v17  ;;  %1712 = vmatmul.mubr.bf16.gmra.mxu1 %v773_v62 }
 0x269   : > { %v1417_v52 = vpop.f32.mrf.mxu0  ;;  %v1530_v17 = vpop.f32.mrf.mxu1 }
 0x26a   : > { %v1531_v1 = vadd.f32 %v1530_v17, %v3631_v61  ;;  %v1418_v12 = vadd.f32 %v1417_v52, %v3635_v45 }
 0x26b   : > { %v1419_v55 = vpop.f32.mrf.mxu0  ;;  %v1532_v3 = vpop.f32.mrf.mxu1 }
 0x26c   : > { %1834 = vst [vmem:[%s3648_s13] sm:$0xff] %v1531_v1  ;;  %v1420_v31 = vadd.f32 %v1419_v55, %v3639_v60  ;;  %v1533_v32 = vadd.f32 %v1532_v3, %v3642_v39 }
 0x26d   : > { %v1421_v20 = vpop.f32.mrf.mxu0  ;;  %v1534_v27 = vpop.f32.mrf.mxu1 }
 0x26e   : > { %v2299_v4 = vpack.c.bf16 %v1420_v31, %v1418_v12  ;;  %1835 = vst [vmem:[%s3648_s13 + $0x8] sm:$0xff] %v1533_v32  ;;  %v1535_v48 = vadd.f32 %v1534_v27, %v3631_v61  ;;  %v1422_v24 = vadd.f32 %v1421_v20, %v3635_v45 }
 0x26f   : > { %v1423_v10 = vpop.f32.mrf.mxu0  ;;  %v1536_v0 = vpop.f32.mrf.mxu1 }
 0x270   : > { %1818 = vst [vmem:[%s3655_s17] sm:$0xff] %v2299_v4  ;;  %1836 = vst [vmem:[%s3648_s13 + $0x10] sm:$0xff] %v1535_v48  ;;  %v1424_v2 = vadd.f32 %v1423_v10, %v3639_v60  ;;  %v1537_v18 = vadd.f32 %v1536_v0, %v3642_v39 }
 0x271   : > { %v1427_v7 = vpop.f32.mrf.mxu0  ;;  %v1540_v30 = vpop.f32.mrf.mxu1 }
 0x272   : > { %v2300_v34 = vpack.c.bf16 %v1424_v2, %v1422_v24  ;;  %1837 = vst [vmem:[%s3648_s13 + $0x18] sm:$0xff] %v1537_v18  ;;  %v1541_v33 = vadd.f32 %v1540_v30, %v3631_v61  ;;  %v1428_v38 = vadd.f32 %v1427_v7, %v3635_v45 }
 0x273   : > { %v1429_v35 = vpop.f32.mrf.mxu0  ;;  %v1542_v36 = vpop.f32.mrf.mxu1 }
 0x274   : > { %1819 = vst [vmem:[%s3655_s17 + $0x8] sm:$0xff] %v2300_v34  ;;  %1838 = vst [vmem:[%s3648_s13 + $0x20] sm:$0xff] %v1541_v33  ;;  %v1430_v22 = vadd.f32 %v1429_v35, %v3639_v60  ;;  %v1543_v16 = vadd.f32 %v1542_v36, %v3642_v39 }
 0x275   : > { %v1431_v59 = vpop.f32.mrf.mxu0  ;;  %v1544_v21 = vpop.f32.mrf.mxu1 }
 0x276   : > { %v2301_v8 = vpack.c.bf16 %v1430_v22, %v1428_v38  ;;  %1839 = vst [vmem:[%s3648_s13 + $0x28] sm:$0xff] %v1543_v16  ;;  %v1545_v58 = vadd.f32 %v1544_v21, %v3631_v61  ;;  %v1432_v51 = vadd.f32 %v1431_v59, %v3635_v45 }
 0x277   : > { %v1433_v19 = vpop.f32.mrf.mxu0  ;;  %v1546_v50 = vpop.f32.mrf.mxu1 }
 0x278   : > { %1820 = vst [vmem:[%s3655_s17 + $0x10] sm:$0xff] %v2301_v8  ;;  %1840 = vst [vmem:[%s3648_s13 + $0x30] sm:$0xff] %v1545_v58  ;;  %v1434_v9 = vadd.f32 %v1433_v19, %v3639_v60  ;;  %v1547_v11 = vadd.f32 %v1546_v50, %v3642_v39 }
 0x279   : > { %v1437_v42 = vpop.f32.mrf.mxu0  ;;  %v1550_v53 = vpop.f32.mrf.mxu1 }
 0x27a   : > { %v2302_v41 = vpack.c.bf16 %v1434_v9, %v1432_v51  ;;  %1841 = vst [vmem:[%s3648_s13 + $0x38] sm:$0xff] %v1547_v11  ;;  %v1551_v13 = vadd.f32 %v1550_v53, %v3631_v61  ;;  %v1438_v57 = vadd.f32 %v1437_v42, %v3635_v45 }
 0x27b   : > { %v1439_v40 = vpop.f32.mrf.mxu0  ;;  %v1552_v15 = vpop.f32.mrf.mxu1 }
 0x27c   : > { %1821 = vst [vmem:[%s3655_s17 + $0x18] sm:$0xff] %v2302_v41  ;;  %1842 = vst [vmem:[%s3648_s13 + $0x40] sm:$0xff] %v1551_v13  ;;  %v1440_v49 = vadd.f32 %v1439_v40, %v3639_v60  ;;  %v1553_v56 = vadd.f32 %v1552_v15, %v3642_v39 }
 0x27d   : > { %v1441_v5 = vpop.f32.mrf.mxu0  ;;  %v1554_v43 = vpop.f32.mrf.mxu1 }
 0x27e   : > { %v2303_v47 = vpack.c.bf16 %v1440_v49, %v1438_v57  ;;  %1843 = vst [vmem:[%s3648_s13 + $0x48] sm:$0xff] %v1553_v56  ;;  %v1555_v54 = vadd.f32 %v1554_v43, %v3631_v61  ;;  %v1442_v29 = vadd.f32 %v1441_v5, %v3635_v45 }
 0x27f   : > { %v1443_v28 = vpop.f32.mrf.mxu0  ;;  %v1556_v25 = vpop.f32.mrf.mxu1 }
 0x280   : > { %1822 = vst [vmem:[%s3655_s17 + $0x20] sm:$0xff] %v2303_v47  ;;  %1844 = vst [vmem:[%s3648_s13 + $0x50] sm:$0xff] %v1555_v54  ;;  %v1444_v26 = vadd.f32 %v1443_v28, %v3639_v60  ;;  %v1557_v46 = vadd.f32 %v1556_v25, %v3642_v39 }
 0x281   : > { %v1447_v62 = vpop.f32.mrf.mxu0  ;;  %v1560_v63 = vpop.f32.mrf.mxu1 }
 0x282   : > { %v2304_v6 = vpack.c.bf16 %v1444_v26, %v1442_v29  ;;  %1845 = vst [vmem:[%s3648_s13 + $0x58] sm:$0xff] %v1557_v46  ;;  %v1561_v14 = vadd.f32 %v1560_v63, %v3631_v61  ;;  %v1448_v17 = vadd.f32 %v1447_v62, %v3635_v45 }
 0x283   : > { %v1449_v23 = vpop.f32.mrf.mxu0  ;;  %v1562_v52 = vpop.f32.mrf.mxu1 }
 0x284   : > { %1823 = vst [vmem:[%s3655_s17 + $0x28] sm:$0xff] %v2304_v6  ;;  %1846 = vst [vmem:[%s3648_s13 + $0x60] sm:$0xff] %v1561_v14  ;;  %v1450_v1 = vadd.f32 %v1449_v23, %v3639_v60  ;;  %v1563_v55 = vadd.f32 %v1562_v52, %v3642_v39 }
 0x285   : > { %v1451_v3 = vpop.f32.mrf.mxu0  ;;  %v1564_v12 = vpop.f32.mrf.mxu1 }
 0x286   : > { %v2305_v31 = vpack.c.bf16 %v1450_v1, %v1448_v17  ;;  %1847 = vst [vmem:[%s3648_s13 + $0x68] sm:$0xff] %v1563_v55  ;;  %v1565_v32 = vadd.f32 %v1564_v12, %v3631_v61  ;;  %v1452_v4 = vadd.f32 %v1451_v3, %v3635_v45 }
 0x287   : > { %v1453_v20 = vpop.f32.mrf.mxu0  ;;  %v1566_v27 = vpop.f32.mrf.mxu1 }
 0x288   : > { %1824 = vst [vmem:[%s3655_s17 + $0x30] sm:$0xff] %v2305_v31  ;;  %1848 = vst [vmem:[%s3648_s13 + $0x70] sm:$0xff] %v1565_v32  ;;  %v1454_v48 = vadd.f32 %v1453_v20, %v3639_v60  ;;  %v1567_v10 = vadd.f32 %v1566_v27, %v3642_v39 }
 0x289   : > { %v1457_v0 = vpop.f32.mrf.mxu0  ;;  %v1570_v24 = vpop.f32.mrf.mxu1 }
 0x28a   : > { %v2306_v2 = vpack.c.bf16 %v1454_v48, %v1452_v4  ;;  %1849 = vst [vmem:[%s3648_s13 + $0x78] sm:$0xff] %v1567_v10  ;;  %v1571_v18 = vadd.f32 %v1570_v24, %v3631_v61  ;;  %v1458_v34 = vadd.f32 %v1457_v0, %v3635_v45  ;;  %v891_v0 = vsub.s32 4, %v3442_v44 }
 0x28b   : > { %v1459_v7 = vpop.f32.mrf.mxu0  ;;  %v1572_v30 = vpop.f32.mrf.mxu1 }
 0x28c   : > { %1825 = vst [vmem:[%s3655_s17 + $0x38] sm:$0xff] %v2306_v2  ;;  %1850 = vst [vmem:[%s3648_s13 + $0x80] sm:$0xff] %v1571_v18  ;;  %v1460_v33 = vadd.f32 %v1459_v7, %v3639_v60  ;;  %v1573_v35 = vadd.f32 %v1572_v30, %v3642_v39 }
 0x28d   : > { %v1461_v36 = vpop.f32.mrf.mxu0  ;;  %v1574_v38 = vpop.f32.mrf.mxu1 }
 0x28e   : > { %v2307_v22 = vpack.c.bf16 %v1460_v33, %v1458_v34  ;;  %1851 = vst [vmem:[%s3648_s13 + $0x88] sm:$0xff] %v1573_v35  ;;  %v1575_v16 = vadd.f32 %v1574_v38, %v3631_v61  ;;  %v1462_v8 = vadd.f32 %v1461_v36, %v3635_v45  ;;  %v895_v34 = vsub.s32 5, %v3442_v44 }
 0x28f   : > { %v1463_v59 = vpop.f32.mrf.mxu0  ;;  %v1576_v21 = vpop.f32.mrf.mxu1 }
 0x290   : > { %1826 = vst [vmem:[%s3655_s17 + $0x40] sm:$0xff] %v2307_v22  ;;  %1852 = vst [vmem:[%s3648_s13 + $0x90] sm:$0xff] %v1575_v16  ;;  %v1464_v58 = vadd.f32 %v1463_v59, %v3639_v60  ;;  %v1577_v19 = vadd.f32 %v1576_v21, %v3642_v39  ;;  %v3767_v22 = vrot.slane %v3627_v37, %v891_v0 }
 0x291   : > { %v1467_v50 = vpop.f32.mrf.mxu0  ;;  %v1580_v51 = vpop.f32.mrf.mxu1 }
 0x292   : > { %v2308_v9 = vpack.c.bf16 %v1464_v58, %v1462_v8  ;;  %1853 = vst [vmem:[%s3648_s13 + $0x98] sm:$0xff] %v1577_v19  ;;  %v1581_v11 = vadd.f32 %v1580_v51, %v3631_v61  ;;  %v1468_v41 = vadd.f32 %v1467_v50, %v3635_v45  ;;  %v3784_v8 = vrot.slane %v3627_v37, %v895_v34 }
 0x293   : > { %v1469_v42 = vpop.f32.mrf.mxu0  ;;  %v1582_v53 = vpop.f32.mrf.mxu1 }
 0x294   : > { %1827 = vst [vmem:[%s3655_s17 + $0x48] sm:$0xff] %v2308_v9  ;;  %1854 = vst [vmem:[%s3648_s13 + $0xa0] sm:$0xff] %v1581_v11  ;;  %v1470_v13 = vadd.f32 %v1469_v42, %v3639_v60  ;;  %v1583_v40 = vadd.f32 %v1582_v53, %v3642_v39 }
 0x295   : > { %v1471_v15 = vpop.f32.mrf.mxu0  ;;  %v1584_v57 = vpop.f32.mrf.mxu1 }
 0x296   : > { %v2309_v49 = vpack.c.bf16 %v1470_v13, %v1468_v41  ;;  %1855 = vst [vmem:[%s3648_s13 + $0xa8] sm:$0xff] %v1583_v40  ;;  %v1585_v56 = vadd.f32 %v1584_v57, %v3631_v61  ;;  %v1472_v47 = vadd.f32 %v1471_v15, %v3635_v45 }
 0x297   : > { %v1473_v5 = vpop.f32.mrf.mxu0  ;;  %v1586_v43 = vpop.f32.mrf.mxu1 }
 0x298   : > { %1828 = vst [vmem:[%s3655_s17 + $0x50] sm:$0xff] %v2309_v49  ;;  %1856 = vst [vmem:[%s3648_s13 + $0xb0] sm:$0xff] %v1585_v56  ;;  %v1474_v54 = vadd.f32 %v1473_v5, %v3639_v60  ;;  %v1587_v28 = vadd.f32 %v1586_v43, %v3642_v39 }
 0x299   : > { %v1477_v25 = vpop.f32.mrf.mxu0  ;;  %v1590_v29 = vpop.f32.mrf.mxu1 }
 0x29a   : > { %v2310_v26 = vpack.c.bf16 %v1474_v54, %v1472_v47  ;;  %1857 = vst [vmem:[%s3648_s13 + $0xb8] sm:$0xff] %v1587_v28  ;;  %v1591_v46 = vadd.f32 %v1590_v29, %v3631_v61  ;;  %v1478_v6 = vadd.f32 %v1477_v25, %v3635_v45 }
 0x29b   : > { %v1479_v62 = vpop.f32.mrf.mxu0  ;;  %v1592_v63 = vpop.f32.mrf.mxu1 }
 0x29c   : > { %1829 = vst [vmem:[%s3655_s17 + $0x58] sm:$0xff] %v2310_v26  ;;  %1858 = vst [vmem:[%s3648_s13 + $0xc0] sm:$0xff] %v1591_v46  ;;  %v1480_v14 = vadd.f32 %v1479_v62, %v3639_v60  ;;  %v1593_v23 = vadd.f32 %v1592_v63, %v3642_v39 }
 0x29d   : > { %v1481_v52 = vpop.f32.mrf.mxu0  ;;  %v1594_v17 = vpop.f32.mrf.mxu1 }
 0x29e   : > { %v2311_v1 = vpack.c.bf16 %v1480_v14, %v1478_v6  ;;  %1859 = vst [vmem:[%s3648_s13 + $0xc8] sm:$0xff] %v1593_v23  ;;  %v1595_v55 = vadd.f32 %v1594_v17, %v3631_v61  ;;  %v1482_v31 = vadd.f32 %v1481_v52, %v3635_v45 }
 0x29f   : > { %v1483_v3 = vpop.f32.mrf.mxu0  ;;  %v1596_v12 = vpop.f32.mrf.mxu1 }
 0x2a0   : > { %1830 = vst [vmem:[%s3655_s17 + $0x60] sm:$0xff] %v2311_v1  ;;  %1860 = vst [vmem:[%s3648_s13 + $0xd0] sm:$0xff] %v1595_v55  ;;  %v1484_v32 = vadd.f32 %v1483_v3, %v3639_v60  ;;  %v1597_v20 = vadd.f32 %v1596_v12, %v3642_v39 }
 0x2a1   : > { %v1487_v27 = vpop.f32.mrf.mxu0  ;;  %v1600_v4 = vpop.f32.mrf.mxu1 }
 0x2a2   : > { %v2312_v48 = vpack.c.bf16 %v1484_v32, %v1482_v31  ;;  %1861 = vst [vmem:[%s3648_s13 + $0xd8] sm:$0xff] %v1597_v20  ;;  %v1601_v10 = vadd.f32 %v1600_v4, %v3631_v61  ;;  %v1488_v18 = vadd.f32 %v1487_v27, %v3635_v45 }
 0x2a3   : > { %v1489_v24 = vpop.f32.mrf.mxu0  ;;  %v1602_v2 = vpop.f32.mrf.mxu1 }
 0x2a4   : > { %1831 = vst [vmem:[%s3655_s17 + $0x68] sm:$0xff] %v2312_v48  ;;  %1862 = vst [vmem:[%s3648_s13 + $0xe0] sm:$0xff] %v1601_v10  ;;  %v1490_v7 = vadd.f32 %v1489_v24, %v3639_v60  ;;  %v1603_v30 = vadd.f32 %v1602_v2, %v3642_v39 }
 0x2a5   : > { %v1491_v33 = vpop.f32.mrf.mxu0  ;;  %v1604_v35 = vpop.f32.mrf.mxu1 }
 0x2a6   : > { %v2313_v36 = vpack.c.bf16 %v1490_v7, %v1488_v18  ;;  %1863 = vst [vmem:[%s3648_s13 + $0xe8] sm:$0xff] %v1603_v30  ;;  %v1605_v38 = vadd.f32 %v1604_v35, %v3631_v61  ;;  %v1492_v44 = vadd.f32 %v1491_v33, %v3635_v45 }
 0x2a7   : > { %v1493_v16 = vpop.f32.mrf.mxu0  ;;  %v1606_v59 = vpop.f32.mrf.mxu1 }
 0x2a8   : > { %1832 = vst [vmem:[%s3655_s17 + $0x70] sm:$0xff] %v2313_v36  ;;  %1864 = vst [vmem:[%s3648_s13 + $0xf0] sm:$0xff] %v1605_v38  ;;  %v1494_v61 = vadd.f32 %v1493_v16, %v3639_v60  ;;  %v1607_v21 = vadd.f32 %v1606_v59, %v3642_v39 }
 0x2a9   : > { %v1643_v58 = vpop.f32.mrf.mxu0  ;;  %v1683_v19 = vpop.f32.mrf.mxu1 }
 0x2aa   : > { %v2314_v45 = vpack.c.bf16 %v1494_v61, %v1492_v44  ;;  %1865 = vst [vmem:[%s3648_s13 + $0xf8] sm:$0xff] %v1607_v21  ;;  %v1644_v60 = vadd.f32 %v1643_v58, %v3767_v22  ;;  %v1684_v50 = vadd.f32 %v1683_v19, %v3767_v22 }
 0x2ab   : > { %v1645_v39 = vpop.f32.mrf.mxu0  ;;  %v1685_v51 = vpop.f32.mrf.mxu1 }
 0x2ac   : > { %2772 = shalt.err (!%p2769_p9)
}
 0x2ad   : > { %s2773_s9 = scalar_lea.hbm %s3776_s5, 4096  ;;  %s2777_s19 = scalar_lea.hbm %s3983_s6, 16384 }
 0x2ae   : > { %p2774_p12 = scmp.ne.s32.totalorder %s3776_s5, %s2773_s9  ;;  %p2778_p1 = scmp.lt.s32.totalorder %s3776_s5, %s3983_s6 }
 0x2af   : > { %p2779_p2 = scmp.lt.s32.totalorder %s2777_s19, %s2773_s9 }
 0x2b0   : > { %p2775_p10 = pnand %p2774_p12, %p3096_p13 }
 0x2b1   : > { %p2780_p3 = por %p2779_p2, %p2778_p1 }
 0x2b2   : > { %p2776_p0 = pneg %p2775_p10 }
 0x2b4   : > { %p2781_p4 = pnand %p2780_p3, %p2776_p0 }
 0x2b6   : > { %2784 = shalt.err (!%p2781_p4)
}
 0x2b7   : > { %s2930_s23 = smov 256   ;;  %s2931_s15 = smov 16   ;;  %1833 = vst [vmem:[%s3655_s17 + $0x78] sm:$0xff] %v2314_v45  ;;  %v1646_v37 = vadd.f32 %v1645_v39, %v3784_v8  ;;  %v1686_v9 = vadd.f32 %v1685_v51, %v3784_v8  ;;  %v1647_v11 = vpop.f32.mrf.mxu0  ;;  %v1687_v42 = vpop.f32.mrf.mxu1 }
 0x2b8   : > { %2365 = dma.vmem_to_hbm [thread:$0]  (%p3096_p13), %s3762_s28, 4096, %s3776_s5, %s3798_s11, %s2930_s23, %s2930_s23, %s2931_s15  }
 0x2b9   : > { %s3826_s1 = scalar_lea.vmem [#allocation13], %s3136_s29  ;;  %s1899_s12 = scalar_lea.sflag [#allocation4], %s3133_s24 }
 0x2ba   : > { %1866 = vst [vmem:[%s3826_s1] sm:$0xff] %v1644_v60  ;;  %1882 = vst [vmem:[%s3826_s1 + $0x80] sm:$0xff] %v1684_v50  ;;  %s2785_s9 = scalar_lea.vmem %s3791_s10, 2048  ;;  %s2932_s17 = smov [#allocation10]  }
 0x2bb   : > { %p2786_p6 = scmp.ne.s32.totalorder %s3791_s10, %s2785_s9  ;;  %s2789_s29 = sshll.u32 %s2932_s17, 4  ;;  %s2790_s29 = int_to_ptr.vmem [resolvable:$false] %s2789_s29 }
 0x2bc   : > { %s2791_s28 = scalar_lea.vmem %s2790_s29, 4096  ;;  %p2792_p5 = scmp.lt.s32.totalorder %s3791_s10, %s2790_s29 }
 0x2bd   : > { %p2787_p8 = pnand %p2786_p6, %p3096_p13  ;;  %p2793_p7 = scmp.lt.s32.totalorder %s2791_s28, %s2785_s9 }
 0x2bf   : > { %p2788_p11 = pneg %p2787_p8  ;;  %p2794_p9 = por %p2793_p7, %p2792_p5 }
 0x2c1   : > { %p2795_p12 = pnand %p2794_p9, %p2788_p11 }
 0x2c3   : > { %2798 = shalt.err (!%p2795_p12)
}
 0x2c4   : > { %s2799_s5 = scalar_lea.hbm %s3789_s7, 2048  ;;  %s2803_s19 = scalar_lea.hbm %s4021_s3, 8192 }
 0x2c5   : > { %p2800_p10 = scmp.ne.s32.totalorder %s3789_s7, %s2799_s5  ;;  %p2804_p2 = scmp.lt.s32.totalorder %s3789_s7, %s4021_s3 }
 0x2c6   : > { %p2805_p3 = scmp.lt.s32.totalorder %s2803_s19, %s2799_s5 }
 0x2c7   : > { %p2801_p0 = pnand %p2800_p10, %p3096_p13 }
 0x2c8   : > { %p2806_p4 = por %p2805_p3, %p2804_p2 }
 0x2c9   : > { %p2802_p1 = pneg %p2801_p0 }
 0x2cb   : > { %p2807_p6 = pnand %p2806_p4, %p2802_p1 }
 0x2cd   : > { %2810 = shalt.err (!%p2807_p6)
}
 0x2ce   : > { %s2933_s9 = smov 128   ;;  %s2934_s17 = smov 8   ;;  %1867 = vst [vmem:[%s3826_s1 + $0x8] sm:$0xff] %v1646_v37  ;;  %1883 = vst [vmem:[%s3826_s1 + $0x88] sm:$0xff] %v1686_v9  ;;  %v1648_v53 = vadd.f32 %v1647_v11, %v3767_v22  ;;  %v1688_v41 = vadd.f32 %v1687_v42, %v3767_v22  ;;  %v1649_v13 = vpop.f32.mrf.mxu0  ;;  %v1689_v40 = vpop.f32.mrf.mxu1 }
 0x2cf   : > { %2364 = dma.vmem_to_hbm [thread:$0]  (%p3096_p13), %s3791_s10, 2048, %s3789_s7, %s1899_s12, %s2933_s9, %s2933_s9, %s2934_s17   ;;  %v1650_v15 = vadd.f32 %v1649_v13, %v3784_v8  ;;  %v1690_v57 = vadd.f32 %v1689_v40, %v3784_v8 }
 0x2d0   : > { %1868 = vst [vmem:[%s3826_s1 + $0x10] sm:$0xff] %v1648_v53  ;;  %1884 = vst [vmem:[%s3826_s1 + $0x90] sm:$0xff] %v1688_v41  ;;  %v1653_v49 = vpop.f32.mrf.mxu0  ;;  %v1693_v56 = vpop.f32.mrf.mxu1  ;;  %s1963_s24 = sshll.u32 %s3826_s1, 4  ;;  %s4022_s12 = sld [smem:[#allocation27_spill]]  ;;  %s3919_s24 = int_to_ptr.vmem [resolvable:$true] %s1963_s24 }
 0x2d1   : > { %1869 = vst [vmem:[%s3826_s1 + $0x18] sm:$0xff] %v1650_v15  ;;  %1885 = vst [vmem:[%s3826_s1 + $0x98] sm:$0xff] %v1690_v57  ;;  %v1654_v5 = vadd.f32 %v1653_v49, %v3767_v22  ;;  %v1694_v43 = vadd.f32 %v1693_v56, %v3767_v22  ;;  %s2811_s28 = scalar_lea.vmem %s3919_s24, 4096  ;;  %s2935_s5 = smov [#allocation13]  }
 0x2d2   : > { %v1655_v47 = vpop.f32.mrf.mxu0  ;;  %v1695_v54 = vpop.f32.mrf.mxu1  ;;  %p2812_p8 = scmp.ne.s32.totalorder %s3919_s24, %s2811_s28  ;;  %s2815_s13 = sshll.u32 %s2935_s5, 4  ;;  %s2816_s13 = int_to_ptr.vmem [resolvable:$false] %s2815_s13 }
 0x2d3   : > { %1870 = vst [vmem:[%s3826_s1 + $0x20] sm:$0xff] %v1654_v5  ;;  %1886 = vst [vmem:[%s3826_s1 + $0xa0] sm:$0xff] %v1694_v43  ;;  %v1656_v28 = vadd.f32 %v1655_v47, %v3784_v8  ;;  %v1696_v25 = vadd.f32 %v1695_v54, %v3784_v8  ;;  %s2817_s22 = scalar_lea.vmem %s2816_s13, 8192  ;;  %p2818_p7 = scmp.lt.s32.totalorder %s3919_s24, %s2816_s13 }
 0x2d4   : > { %v1657_v29 = vpop.f32.mrf.mxu0  ;;  %v1697_v26 = vpop.f32.mrf.mxu1  ;;  %p2813_p11 = pnand %p2812_p8, %p3096_p13  ;;  %p2819_p9 = scmp.lt.s32.totalorder %s2817_s22, %s2811_s28 }
 0x2d5   : > { %1871 = vst [vmem:[%s3826_s1 + $0x28] sm:$0xff] %v1656_v28  ;;  %1887 = vst [vmem:[%s3826_s1 + $0xa8] sm:$0xff] %v1696_v25  ;;  %v1658_v46 = vadd.f32 %v1657_v29, %v3767_v22  ;;  %v1698_v62 = vadd.f32 %v1697_v26, %v3767_v22 }
 0x2d6   : > { %v1659_v63 = vpop.f32.mrf.mxu0  ;;  %v1699_v6 = vpop.f32.mrf.mxu1  ;;  %s3917_s29 = scalar_lea.hbm %s4022_s12, %s2291_s2  ;;  %p2814_p5 = pneg %p2813_p11 }
 0x2d7   : > { %1872 = vst [vmem:[%s3826_s1 + $0x30] sm:$0xff] %v1658_v46  ;;  %1888 = vst [vmem:[%s3826_s1 + $0xb0] sm:$0xff] %v1698_v62  ;;  %v1660_v14 = vadd.f32 %v1659_v63, %v3784_v8  ;;  %v1700_v23 = vadd.f32 %v1699_v6, %v3784_v8  ;;  %p2820_p12 = por %p2819_p9, %p2818_p7 }
 0x2d8   : > { %v1663_v52 = vpop.f32.mrf.mxu0  ;;  %v1703_v17 = vpop.f32.mrf.mxu1 }
 0x2d9   : > { %1873 = vst [vmem:[%s3826_s1 + $0x38] sm:$0xff] %v1660_v14  ;;  %1889 = vst [vmem:[%s3826_s1 + $0xb8] sm:$0xff] %v1700_v23  ;;  %v1664_v1 = vadd.f32 %v1663_v52, %v3767_v22  ;;  %v1704_v55 = vadd.f32 %v1703_v17, %v3767_v22  ;;  %p2821_p10 = pnand %p2820_p12, %p2814_p5 }
 0x2da   : > { %v1665_v3 = vpop.f32.mrf.mxu0  ;;  %v1705_v12 = vpop.f32.mrf.mxu1 }
 0x2db   : > { %1874 = vst [vmem:[%s3826_s1 + $0x40] sm:$0xff] %v1664_v1  ;;  %1890 = vst [vmem:[%s3826_s1 + $0xc0] sm:$0xff] %v1704_v55  ;;  %v1666_v31 = vadd.f32 %v1665_v3, %v3784_v8  ;;  %v1706_v32 = vadd.f32 %v1705_v12, %v3784_v8 }
 0x2dc   : > { %v1667_v20 = vpop.f32.mrf.mxu0  ;;  %v1707_v27 = vpop.f32.mrf.mxu1 }
 0x2dd   : > { %1875 = vst [vmem:[%s3826_s1 + $0x48] sm:$0xff] %v1666_v31  ;;  %1891 = vst [vmem:[%s3826_s1 + $0xc8] sm:$0xff] %v1706_v32  ;;  %v1668_v4 = vadd.f32 %v1667_v20, %v3767_v22  ;;  %v1708_v48 = vadd.f32 %v1707_v27, %v3767_v22 }
 0x2de   : > { %v1669_v10 = vpop.f32.mrf.mxu0  ;;  %v1709_v0 = vpop.f32.mrf.mxu1 }
 0x2df   : > { %1876 = vst [vmem:[%s3826_s1 + $0x50] sm:$0xff] %v1668_v4  ;;  %1892 = vst [vmem:[%s3826_s1 + $0xd0] sm:$0xff] %v1708_v48  ;;  %v1670_v24 = vadd.f32 %v1669_v10, %v3784_v8  ;;  %v1710_v2 = vadd.f32 %v1709_v0, %v3784_v8 }
 0x2e0   : > { %v1673_v18 = vpop.f32.mrf.mxu0  ;;  %v1713_v7 = vpop.f32.mrf.mxu1 }
 0x2e1   : > { %1877 = vst [vmem:[%s3826_s1 + $0x58] sm:$0xff] %v1670_v24  ;;  %1893 = vst [vmem:[%s3826_s1 + $0xd8] sm:$0xff] %v1710_v2  ;;  %v1674_v30 = vadd.f32 %v1673_v18, %v3767_v22  ;;  %v1714_v34 = vadd.f32 %v1713_v7, %v3767_v22 }
 0x2e2   : > { %v1675_v33 = vpop.f32.mrf.mxu0  ;;  %v1715_v35 = vpop.f32.mrf.mxu1 }
 0x2e3   : > { %1878 = vst [vmem:[%s3826_s1 + $0x60] sm:$0xff] %v1674_v30  ;;  %1894 = vst [vmem:[%s3826_s1 + $0xe0] sm:$0xff] %v1714_v34  ;;  %v1676_v36 = vadd.f32 %v1675_v33, %v3784_v8  ;;  %v1716_v38 = vadd.f32 %v1715_v35, %v3784_v8 }
 0x2e4   : > { %v1677_v16 = vpop.f32.mrf.mxu0  ;;  %v1717_v59 = vpop.f32.mrf.mxu1 }
 0x2e5   : > { %1879 = vst [vmem:[%s3826_s1 + $0x68] sm:$0xff] %v1676_v36  ;;  %1895 = vst [vmem:[%s3826_s1 + $0xe8] sm:$0xff] %v1716_v38  ;;  %v1678_v44 = vadd.f32 %v1677_v16, %v3767_v22  ;;  %v1718_v61 = vadd.f32 %v1717_v59, %v3767_v22 }
 0x2e6   : > { %v1679_v21 = vpop.f32.mrf.mxu0  ;;  %v1719_v58 = vpop.f32.mrf.mxu1 }
 0x2e7   : > { %1880 = vst [vmem:[%s3826_s1 + $0x70] sm:$0xff] %v1678_v44  ;;  %1896 = vst [vmem:[%s3826_s1 + $0xf0] sm:$0xff] %v1718_v61  ;;  %v1680_v19 = vadd.f32 %v1679_v21, %v3784_v8  ;;  %v1720_v45 = vadd.f32 %v1719_v58, %v3784_v8 }
 0x2e9   : > { %1881 = vst [vmem:[%s3826_s1 + $0x78] sm:$0xff] %v1680_v19  ;;  %1897 = vst [vmem:[%s3826_s1 + $0xf8] sm:$0xff] %v1720_v45 }
 0x2ea   : > { %2824 = shalt.err (!%p2821_p10)
}
 0x2eb   : > { %s2825_s2 = scalar_lea.hbm %s3917_s29, 4096  ;;  %s2829_s19 = scalar_lea.hbm %s4022_s12, 16384 }
 0x2ec   : > { %p2826_p0 = scmp.ne.s32.totalorder %s3917_s29, %s2825_s2  ;;  %p2830_p3 = scmp.lt.s32.totalorder %s3917_s29, %s4022_s12 }
 0x2ed   : > { %p2831_p4 = scmp.lt.s32.totalorder %s2829_s19, %s2825_s2 }
 0x2ee   : > { %p2827_p1 = pnand %p2826_p0, %p3096_p13 }
 0x2ef   : > { %p2832_p6 = por %p2831_p4, %p2830_p3 }
 0x2f0   : > { %p2828_p2 = pneg %p2827_p1 }
 0x2f2   : > { %p2833_p8 = pnand %p2832_p6, %p2828_p2 }
 0x2f4   : > { %2836 = shalt.err (!%p2833_p8)
}
 0x2f5   : > { %2366 = dma.vmem_to_hbm [thread:$0]  (%p3096_p13), %s3919_s24, 4096, %s3917_s29, %s3798_s11, %s2930_s23, %s2930_s23, %s2931_s15  }
 0x2f6 PF: > { %s4023_s9 = sld [smem:[#allocation19_spill]]  ;;  %p2401_p11 = scmp.ge.s32.totalorder %s2919_s8, 2 }
 0x2f7   : > { %s4024_s17 = sld [smem:[#allocation21_spill]] }
 0x2fc   : > { %s1978_s10 = sand.u32 1, %s4023_s9  }
 0x2fd   : > { %p4025_p5 = scmp.ne.s32.totalorder %s4024_s17, 0  ;;  %s1979_s7 = scalar_lea.sflag [#allocation4], %s1978_s10 }
 0x2ff   : > { %p2385_p7 = pnand %p2401_p11, %p4025_p5 }
 0x301   : > { %p2386_p9 = pneg %p2385_p7 }
 0x303   : > { %2882 = dma.done.wait (%p2386_p9), %s1979_s7, 2048  }
 0x304   : > { %2884 = vsyncadd (%p2386_p9), %s1979_s7, 4294965248  ;;  %s4026_s18 = sadd.s32 4294967294, %s2919_s8  }
 0x305   : > { %s1987_s28 = sand.u32 1, %s4026_s18  }
 0x306   : > { %s1988_s5 = scalar_lea.sflag [#allocation12], %s1987_s28 }
 0x307   : > { %2886 = dma.done.wait (%p2386_p9), %s1988_s5, 8192  }
 0x308   : > { %2888 = vsyncadd (%p2386_p9), %s1988_s5, 4294959104  ;;  %s29_s8 = sadd.s32 1, %s2919_s8   ;;  %s4027_s27 = sld [smem:[#allocation20_spill]] }
 0x309   : > { %p26_p13 = scmp.ge.s32.totalorder %s29_s8, 6   ;;  %s4028_s29 = sld [smem:[#allocation22_spill]] }
 0x30a   : > { %s4029_s24 = smov %s2895_s25  ;;  %s4030_s25 = smov %s2899_s26 }
 0x30b   : > { %s4031_s26 = smov %s3113_s14  ;;  %s4032_s28 = smov %s2915_s30 }
 0x30c   : > { %s4033_s30 = smov %s4039_s16  ;;  %28 = sbr.rel (!%p26_p13) target bundleno = 17 (0x11), region = 129 }
 0x311   :  { %2002 = vsyncpa [#allocation3], 1 }
 0x312   :  { %2004 = vsyncpa [#allocation3 + $0x1], 1 }
 0x313   :  { %2005 = vsyncpa [#allocation6], 1 }
 0x314   :  { %2006 = vsyncpa [#allocation9], 1 }
 0x315   :  { %2007 = vsyncpa [#allocation4], 1 }
 0x316   :  { %2009 = vsyncpa [#allocation4 + $0x1], 1 }
 0x317   :  { %2010 = vsyncpa [#allocation12], 1 }
 0x318   :  { %2012 = vsyncpa [#allocation12 + $0x1], 1 }

// kernel: tpu_custom_call.1
= control target key start
LH: loop header
LB: loop body
LE: loop exit
PB: predicated region body
PF: predicated region fallthrough
CT: control target
= control target key end

     0   :  { %s3977_s0 = inlined_call_operand.hbm [shape: f32[2,256,256], index: 0, kind: input, shape index: {}]   ;;  %s3978_s1 = inlined_call_operand.hbm [shape: f32[1,256], index: 1, kind: input, shape index: {}]   ;;  %s3979_s2 = inlined_call_operand.hbm [shape: f32[1,256], index: 2, kind: input, shape index: {}]   ;;  %s3980_s3 = inlined_call_operand.hbm [shape: bf16[256,768], index: 3, kind: input, shape index: {}]   ;;  %s3981_s4 = inlined_call_operand.vmem [shape: f32[1,768], index: 4, kind: input, shape index: {}]   ;;  %s3982_s5 = inlined_call_operand.hbm [shape: bf16[2,256,256], index: 5, kind: output, shape index: {0}]   ;;  %s3983_s6 = inlined_call_operand.hbm [shape: f32[2,256,256], index: 6, kind: output, shape index: {1}]   ;;  %s3984_s7 = inlined_call_operand.hbm [shape: f32[2,256,256], index: 7, kind: output, shape index: {2}]  }
   0x1   :  { %3995 = sst [smem:[#allocation23_spill]] %s3978_s1 }
   0x2   :  { %3996 = sst [smem:[#allocation24_spill]] %s3979_s2 }
   0x3   :  { %3997 = sst [smem:[#allocation25_spill]] %s3980_s3 }
   0x4   :  { %3998 = sst [smem:[#allocation26_spill]] %s3982_s5 }
   0x5   :  { %3999 = sst [smem:[#allocation27_spill]] %s3984_s7 }
   0x6   :  { %13 = vsyncpa [#allocation3], 0 }
   0x7   :  { %15 = vsyncpa [#allocation3 + $0x1], 0 }
   0x8   :  { %16 = vsyncpa [#allocation6], 0 }
   0x9   :  { %17 = vsyncpa [#allocation9], 0 }
   0xa   :  { %18 = vsyncpa [#allocation4], 0 }
   0xb   :  { %20 = vsyncpa [#allocation4 + $0x1], 0 }
   0xc   :  { %21 = vsyncpa [#allocation12], 0 }
   0xd   :  { %23 = vsyncpa [#allocation12 + $0x1], 0  ;;  %s2976_s24 = smov 0   ;;  %s2978_s25 = smov 0  }
   0xe   :  { %s2980_s26 = smov 0   ;;  %s2982_s27 = smov 0  }
   0xf   :  { %s2984_s28 = smov 0   ;;  %s2986_s29 = smov 0  }
  0x10   :  { %s2988_s30 = smov 0   ;;  %s2990_s8 = smov 0  }
  0x11 LB: > { %4000 = sst [smem:[#allocation19_spill]] %s2891_s24  ;;  %s3017_s9 = sadd.s32 4294967295, %s2919_s8   ;;  %s2919_s8 = sphi %s2990_s8, %s29_s8   ;;  %s2915_s30 = sphi %s2988_s30, %s4033_s30   ;;  %s2911_s29 = sphi %s2986_s29, %s4028_s29   ;;  %s2907_s28 = sphi %s2984_s28, %s4032_s28   ;;  %s2903_s27 = sphi %s2982_s27, %s4027_s27   ;;  %s2899_s26 = sphi %s2980_s26, %s4031_s26   ;;  %s2895_s25 = sphi %s2978_s25, %s4030_s25   ;;  %s2891_s24 = sphi %s2976_s24, %s4029_s24  }
  0x12   : > { %4001 = sst [smem:[#allocation20_spill]] %s2911_s29  ;;  %s3988_s10 = sadd.s32 4294967294, %s2919_s8  }
  0x13   : > { %p63_p0 = scmp.ne.s32.totalorder %s2895_s25, %s2891_s24  ;;  %p3985_p1 = scmp.eq.s32.totalorder %s3017_s9, 0 }
  0x14   : > { %p179_p3 = scmp.eq.s32.totalorder %s3988_s10, 3  ;;  %p2151_p5 = scmp.ge.s32.totalorder %s2919_s8, 1 }
  0x15   : > { %p3028_p4 = por %p3985_p1, %p63_p0  ;;  %p242_p7 = scmp.lt.s32.totalorder %s2919_s8, 5 }
  0x16   : > { %p3033_p6 = por %p179_p3, %p63_p0  ;;  %s2921_s14 = smov [#allocation5]  }
  0x17   : > { %s4002_s11 = scalar_select %p3028_p4, 1, 0 }
  0x18   : > { %s4003_s12 = scalar_select %p3033_p6, 1, 0 }
  0x19   : > { %p3038_p8 = pnand %p2151_p5, %p242_p7  ;;  %s255_s15 = sshll.u32 %s2921_s14, 4  ;;  %s256_s15 = int_to_ptr.vmem [resolvable:$true] %s255_s15 }
  0x1a   : > { %4004 = sst [smem:[#allocation21_spill]] %s4003_s12  ;;  %s2922_s16 = smov [#allocation7]  }
  0x1b   : > { %s4005_s13 = scalar_select %p3038_p8, 1, 0 }
  0x1c   : > { %p2370_p9 = pneg %p3038_p8  ;;  %s266_s17 = sshll.u32 %s2922_s16, 4  ;;  %s267_s17 = int_to_ptr.vmem [resolvable:$true] %s266_s17 }
  0x1d   : > { %s2923_s19 = smov [#allocation8]   ;;  %s2664_s21 = scalar_lea.vmem %s256_s15, 32 }
  0x1e   : > { %p3046_p10 = pnand %p2370_p9, %p3985_p1  ;;  %s276_s20 = sshll.u32 %s2923_s19, 4  ;;  %s3050_s20 = int_to_ptr.vmem [resolvable:$true] %s276_s20 }
  0x1f   : > { %p2665_p12 = scmp.ne.s32.totalorder %s256_s15, %s2664_s21  ;;  %p2672_p3 = scmp.lt.s32.totalorder %s256_s15, %s256_s15 }
  0x20   : > { %p2655_p11 = pneg %p3046_p10  ;;  %p2673_p5 = scmp.lt.s32.totalorder %s2664_s21, %s2664_s21 }
  0x22   : > { %p2667_p13 = pnand %p2665_p12, %p2655_p11  ;;  %p2674_p7 = por %p2673_p5, %p2672_p3 }
  0x24   : > { %p2668_p0 = pneg %p2667_p13 }
  0x26   : > { %p2675_p9 = pnand %p2674_p7, %p2668_p0 }
  0x28   : > { %2678 = shalt.err (!%p2675_p9)
}
  0x29   : > { %s4007_s1 = sld [smem:[#allocation23_spill]]  ;;  %s2690_s14 = scalar_lea.vmem %s267_s17, 32 }
  0x2a   : > { %p2691_p1 = scmp.ne.s32.totalorder %s267_s17, %s2690_s14  ;;  %p2698_p12 = scmp.lt.s32.totalorder %s267_s17, %s267_s17 }
  0x2b   : > { %p2699_p13 = scmp.lt.s32.totalorder %s2690_s14, %s2690_s14 }
  0x2c   : > { %p2693_p2 = pnand %p2691_p1, %p2655_p11 }
  0x2d   : > { %p2700_p4 = por %p2699_p13, %p2698_p12 }
  0x2e   : > { %p2694_p6 = pneg %p2693_p2 }
  0x2f   : > { %2373 = dma.hbm_to_vmem [thread:$0]  (!%p3046_p10), %s4007_s1, 32, %s256_s15, [#allocation6]  }
  0x30   : > { %p2701_p8 = pnand %p2700_p4, %p2694_p6 }
  0x32   : > { %2704 = shalt.err (!%p2701_p8)
}
  0x33   : > { %s4008_s2 = sld [smem:[#allocation24_spill]]  ;;  %s2716_s15 = scalar_lea.vmem %s3050_s20, 12288 }
  0x34   : > { %p2717_p0 = scmp.ne.s32.totalorder %s3050_s20, %s2716_s15  ;;  %p2724_p3 = scmp.lt.s32.totalorder %s3050_s20, %s3050_s20 }
  0x35   : > { %p2725_p4 = scmp.lt.s32.totalorder %s2716_s15, %s2716_s15 }
  0x36   : > { %p2719_p1 = pnand %p2717_p0, %p2655_p11 }
  0x37   : > { %p2726_p6 = por %p2725_p4, %p2724_p3 }
  0x38   : > { %p2720_p2 = pneg %p2719_p1 }
  0x39   : > { %2376 = dma.hbm_to_vmem [thread:$0]  (!%p3046_p10), %s4008_s2, 32, %s267_s17, [#allocation6]  }
  0x3a   : > { %p2727_p8 = pnand %p2726_p6, %p2720_p2 }
  0x3c   : > { %2730 = shalt.err (!%p2727_p8)
}
  0x3d   : > { %s2924_s21 = smov 384   ;;  %s2925_s17 = smov 24  }
  0x3e   : > { %s4009_s3 = sld [smem:[#allocation25_spill]]  ;;  %s38_s14 = sadd.s32 1, %s2911_s29 }
  0x3f   : > { %p39_p11 = scmp.ge.s32.totalorder %s38_s14, 2  ;;  %s41_s16 = sadd.s32 1, %s2915_s30 }
  0x40   : > { %s50_s19 = sadd.s32 1, %s2899_s26  ;;  %p57_p5 = scmp.ne.s32.totalorder %s2899_s26, %s2895_s25 }
  0x41   : > { %s4035_s14 = smov (%p39_p11, %s38_s14), 0  ;;  %s4037_s16 = smov (!%p39_p11, %s41_s16), %s2915_s30 }
  0x42   : > { %4010 = sst [smem:[#allocation22_spill]] %s4035_s14  ;;  %s46_s15 = ssub.s32 %s2911_s29, %s4035_s14 }
  0x43   : > { %p58_p7 = scmp.eq.s32.totalorder %s2919_s8, 0  ;;  %p43_p9 = scmp.ge.s32.totalorder %s4037_s16, 2 }
  0x44   : > { %2379 = dma.hbm_to_vmem [thread:$0]  (!%p3046_p10), %s4009_s3, 12288, %s3050_s20, [#allocation9], %s2924_s21, %s2924_s21, %s2925_s17  }
  0x45   : > { %p4011_p12 = scmp.eq.s32.totalorder %s3017_s9, 3  ;;  %p3100_p10 = por %p58_p7, %p57_p5 }
  0x46   : > { %p2397_p0 = scmp.lt.s32.totalorder %s2919_s8, 4  ;;  %s4039_s16 = smov (%p43_p9, %s4037_s16), 0 }
  0x47   : > { %p3096_p13 = por %p4011_p12, %p57_p5  ;;  %s293_s21 = sand.u32 1, %s2899_s26  }
  0x48   : > { %s2298_s17 = sshll.u32 %s2911_s29, 5  ;;  %s45_s22 = ssub.s32 %s2915_s30, %s4039_s16 }
  0x49   : > { %s47_s23 = sor.u32 %s46_s15, %s45_s22  ;;  %s2156_s10 = sshll.u32 %s293_s21, 8 }
  0x4a   : > { %p48_p1 = scmp.eq.s32.totalorder %s47_s23, 0  ;;  %s2159_s1 = sshll.u32 %s2915_s30, 6 }
  0x4b   : > { %s297_s2 = scalar_lea.vmem [#allocation2], %s2156_s10  ;;  %s304_s12 = sadd.s32 %s2298_s17, %s2159_s1 }
  0x4c   : > { %s307_s3 = sshll.u32 %s297_s2, 4  ;;  %s2160_s24 = sshll.u32 %s304_s12, 7  ;;  %s308_s3 = int_to_ptr.vmem [resolvable:$true] %s307_s3 }
  0x4d   : > { %s3113_s14 = scalar_select %p48_p1, %s2899_s26, %s50_s19  }
  0x4e   : > { %p3119_p2 = pnand %p2397_p0, %p3100_p10  ;;  %s306_s15 = scalar_lea.hbm %s3977_s0, %s2160_s24 }
  0x4f   : > { %s294_s22 = scalar_lea.sflag [#allocation3], %s293_s21  ;;  %s2744_s2 = scalar_lea.vmem %s308_s3, 4096 }
  0x50   : > { %p2733_p3 = pneg %p3119_p2  ;;  %p2745_p4 = scmp.ne.s32.totalorder %s308_s3, %s2744_s2 }
  0x51   : > { %s2926_s1 = smov [#allocation2]  }
  0x52   : > { %p2747_p6 = pnand %p2745_p4, %p2733_p3  ;;  %s2749_s10 = sshll.u32 %s2926_s1, 4  ;;  %s2750_s10 = int_to_ptr.vmem [resolvable:$false] %s2749_s10 }
  0x53   : > { %s2751_s12 = scalar_lea.vmem %s2750_s10, 8192  ;;  %p2752_p11 = scmp.lt.s32.totalorder %s308_s3, %s2750_s10 }
  0x54   : > { %p2748_p8 = pneg %p2747_p6  ;;  %p2753_p5 = scmp.lt.s32.totalorder %s2751_s12, %s2744_s2 }
  0x56   : > { %p2754_p7 = por %p2753_p5, %p2752_p11 }
  0x58   : > { %p2755_p9 = pnand %p2754_p7, %p2748_p8 }
  0x5a   : > { %2758 = shalt.err (!%p2755_p9)
}
  0x5b   : > { %s2927_s19 = smov 256   ;;  %s2928_s5 = smov 16  }
  0x5c   : > { %2383 = dma.hbm_to_vmem [thread:$0]  (!%p3119_p2), %s306_s15, 4096, %s308_s3, %s294_s22, %s2927_s19, %s2927_s19, %s2928_s5  }
  0x5d   : > { %p4015_p12 = scmp.ne.s32.totalorder %s4005_s13, 0 }
  0x5e   : > { %s3133_s24 = sand.u32 (!%p4015_p12), 1, %s2895_s25   ;;  %p4016_p10 = scmp.ne.s32.totalorder (!%p4015_p12), %s4002_s11, 0 }
  0x5f   : > { %319 = sbr.rel (%p4015_p12) target bundleno = 758 (0x2f6), region = 40  ;;  %s3136_s29 = sshll.u32 (!%p4015_p12), %s3133_s24, 8 }
  0x60   : > { %s322_s20 = scalar_lea.sflag (!%p4015_p12), [#allocation3], %s3133_s24  ;;  %s3140_s21 = scalar_lea.vmem (!%p4015_p12), [#allocation2], %s3136_s29 }
  0x64   : > { %2870 = dma.done.wait (%p4016_p10), %s322_s20, 4096  }
  0x65   : > { %2872 = vsyncadd (%p4016_p10), %s322_s20, 4294963200  ;;  %p4017_p0 = scmp.eq.s32.totalorder %s3017_s9, 0 }
  0x67   : > { %2874 = dma.done.wait (%p4017_p0), [#allocation6], 64   ;;  %p4018_p1 = pmov %p4017_p0 }
  0x68   : > { %p4019_p2 = pmov %p4017_p0 }
  0x69   : > { %2876 = vsyncadd (%p4018_p1), [#allocation6], 4294967232 }
  0x6a   : > { %2878 = dma.done.wait (%p4019_p2), [#allocation9], 12288   ;;  %p4020_p3 = pmov %p4017_p0 }
  0x6b   : > { %v3155_v0 = vld [vmem:[%s3140_s21] sm:$0xff]  ;;  %v3158_v1 = vld [vmem:[%s3140_s21 + $0x8] sm:$0xff]  ;;  %v3169_v5 = vld [vmem:[%s3140_s21 + $0x10] sm:$0xff]  ;;  %s2166_s11 = sshll.u32 %s3133_s24, 7  ;;  %s3648_s13 = scalar_lea.vmem [#allocation11], %s3136_s29 }
  0x6c   : > { %2880 = vsyncadd (%p4020_p3), [#allocation9], 4294955008  ;;  %v3161_v2 = vld [vmem:[%s3140_s21 + $0x20] sm:$0xff]  ;;  %v416_v3 = vadd.f32 %v3158_v1, %v3155_v0  ;;  %v3166_v4 = vld [vmem:[%s3140_s21 + $0x28] sm:$0xff]  ;;  %s3655_s17 = scalar_lea.vmem [#allocation10], %s2166_s11  ;;  %s2315_s23 = sshll.u32 %s2903_s27, 5 }
  0x6d   : > { %v3172_v6 = vld [vmem:[%s3140_s21 + $0x18] sm:$0xff]  ;;  %v422_v7 = vadd.f32 %v3166_v4, %v3161_v2  ;;  %v3177_v8 = vld [vmem:[%s3140_s21 + $0x30] sm:$0xff]  ;;  %v3187_v12 = vld [vmem:[%s3140_s21 + $0x40] sm:$0xff]  ;;  %s2286_s15 = sshll.u32 %s2907_s28, 6  ;;  %s1903_s27 = sand.u32 1, %s3017_s9  }
  0x6e   : > { %v3180_v9 = vld [vmem:[%s3140_s21 + $0x38] sm:$0xff]  ;;  %417 = vadd.xlane.f32.xlu0 %v416_v3  ;;  %v419_v10 = vadd.f32 %v3172_v6, %v3169_v5  ;;  %v3190_v13 = vld [vmem:[%s3140_s21 + $0x48] sm:$0xff]  ;;  %v3193_v14 = vld [vmem:[%s3140_s21 + $0x50] sm:$0xff]  ;;  %s3748_s22 = sadd.s32 %s2315_s23, %s2286_s15  ;;  %s1944_s28 = sshll.u32 %s3648_s13, 4  ;;  %s3762_s28 = int_to_ptr.vmem [resolvable:$true] %s1944_s28 }
  0x6f   : > { %423 = vadd.xlane.f32.xlu1 %v422_v7  ;;  %v425_v11 = vadd.f32 %v3180_v9, %v3177_v8  ;;  %v3196_v15 = vld [vmem:[%s3140_s21 + $0x58] sm:$0xff]  ;;  %v428_v16 = vadd.f32 %v3190_v13, %v3187_v12  ;;  %v3203_v18 = vld [vmem:[%s3140_s21 + $0x60] sm:$0xff]  ;;  %v3206_v19 = vld [vmem:[%s3140_s21 + $0x68] sm:$0xff]  ;;  %s2291_s2 = sshll.u32 %s3748_s22, 7  ;;  %s2287_s1 = sshll.u32 %s3748_s22, 6 }
  0x70   : > { %v431_v17 = vadd.f32 %v3196_v15, %v3193_v14  ;;  %v3209_v20 = vld [vmem:[%s3140_s21 + $0x70] sm:$0xff]  ;;  %v3212_v21 = vld [vmem:[%s3140_s21 + $0x78] sm:$0xff]  ;;  %v3215_v22 = vld [vmem:[%s3140_s21 + $0x80] sm:$0xff]  ;;  %v434_v24 = vadd.f32 %v3206_v19, %v3203_v18  ;;  %s1925_s10 = sshll.u32 %s3655_s17, 4  ;;  %s3776_s5 = scalar_lea.hbm %s3983_s6, %s2291_s2  ;;  %s3791_s10 = int_to_ptr.vmem [resolvable:$true] %s1925_s10 }
  0x71   : > { %v3218_v23 = vld [vmem:[%s3140_s21 + $0x88] sm:$0xff]  ;;  %v3223_v25 = vld [vmem:[%s3140_s21 + $0x90] sm:$0xff]  ;;  %v3226_v26 = vld [vmem:[%s3140_s21 + $0x98] sm:$0xff]  ;;  %v437_v27 = vadd.f32 %v3212_v21, %v3209_v20  ;;  %s4021_s3 = sld [smem:[#allocation26_spill]]  ;;  %s3798_s11 = scalar_lea.sflag [#allocation12], %s1903_s27 }
  0x72   : > { %420 = vadd.xlane.f32.xlu0 %v419_v10  ;;  %v3231_v28 = vld [vmem:[%s3140_s21 + $0xa0] sm:$0xff]  ;;  %v3234_v29 = vld [vmem:[%s3140_s21 + $0xa8] sm:$0xff]  ;;  %v440_v30 = vadd.f32 %v3218_v23, %v3215_v22  ;;  %v3239_v31 = vld [vmem:[%s3140_s21 + $0xb0] sm:$0xff]  ;;  %v443_v33 = vadd.f32 %v3226_v26, %v3223_v25  ;;  %s2759_s23 = scalar_lea.vmem %s3762_s28, 4096  ;;  %s2929_s15 = smov [#allocation11]  }
  0x73   : > { %426 = vadd.xlane.f32.xlu1 %v425_v11  ;;  %v3242_v32 = vld [vmem:[%s3140_s21 + $0xb8] sm:$0xff]  ;;  %v3247_v34 = vld [vmem:[%s3140_s21 + $0xc0] sm:$0xff]  ;;  %v3250_v35 = vld [vmem:[%s3140_s21 + $0xc8] sm:$0xff]  ;;  %v446_v36 = vadd.f32 %v3234_v29, %v3231_v28  ;;  %p2760_p4 = scmp.ne.s32.totalorder %s3762_s28, %s2759_s23 }
  0x74   : > { %v3255_v37 = vld [vmem:[%s3140_s21 + $0xd0] sm:$0xff]  ;;  %v3258_v38 = vld [vmem:[%s3140_s21 + $0xd8] sm:$0xff]  ;;  %v449_v39 = vadd.f32 %v3242_v32, %v3239_v31  ;;  %v3263_v40 = vld [vmem:[%s3140_s21 + $0xe0] sm:$0xff]  ;;  %v452_v42 = vadd.f32 %v3250_v35, %v3247_v34 }
  0x75   : > { %v3266_v41 = vld [vmem:[%s3140_s21 + $0xe8] sm:$0xff]  ;;  %v3271_v43 = vld [vmem:[%s3140_s21 + $0xf0] sm:$0xff]  ;;  %v3274_v44 = vld [vmem:[%s3140_s21 + $0xf8] sm:$0xff]  ;;  %v455_v45 = vadd.f32 %v3258_v38, %v3255_v37  ;;  %p2761_p6 = pnand %p2760_p4, %p3096_p13 }
  0x76   : > { %429 = vadd.xlane.f32.xlu0 %v428_v16  ;;  %v458_v46 = vadd.f32 %v3266_v41, %v3263_v40  ;;  %v461_v47 = vadd.f32 %v3274_v44, %v3271_v43  ;;  %v2477_v48 = vld [vmem:[#allocation8 + $0x154] ss:$24 sps:$4 sm:$0xff]   ;;  %v2481_v50 = vld [vmem:[#allocation8 + $0x150] ss:$24 sps:$4 sm:$0xff]   ;;  %v2483_v52 = vld [vmem:[#allocation8 + $0x124] ss:$24 sps:$4 sm:$0xff]  }
  0x77   : > { %432 = vadd.xlane.f32.xlu1 %v431_v17  ;;  %v2479_v49 = vld [vmem:[#allocation8 + $0x15c] ss:$24 sps:$4 sm:$0xff]   ;;  %v2482_v51 = vld [vmem:[#allocation8 + $0x158] ss:$24 sps:$4 sm:$0xff]   ;;  %v2485_v53 = vld [vmem:[#allocation8 + $0x12c] ss:$24 sps:$4 sm:$0xff]   ;;  %1383 = vmatprep.subr.bf16.mxu0 %v2477_v48  ;;  %s3789_s7 = scalar_lea.hbm %s4021_s3, %s2287_s1  ;;  %p2762_p8 = pneg %p2761_p6 }
  0x78   : > { %1496 = vmatprep.subr.bf16.mxu1 %v2479_v49  ;;  %1384 = vmatpush1.bf16.msra.mxu0 %v2481_v50  ;;  %v2487_v54 = vld [vmem:[#allocation8 + $0x120] ss:$24 sps:$4 sm:$0xff]   ;;  %v2489_v56 = vld [vmem:[#allocation8 + $0xf4] ss:$24 sps:$4 sm:$0xff]   ;;  %v2493_v58 = vld [vmem:[#allocation8 + $0xf0] ss:$24 sps:$4 sm:$0xff]  }
  0x79   : > { %1497 = vmatpush1.bf16.msra.mxu1 %v2482_v51  ;;  %v2488_v55 = vld [vmem:[#allocation8 + $0x128] ss:$24 sps:$4 sm:$0xff]   ;;  %1385 = vmatprep.subr.bf16.mxu0 %v2483_v52  ;;  %v2491_v57 = vld [vmem:[#allocation8 + $0xfc] ss:$24 sps:$4 sm:$0xff]   ;;  %v2494_v59 = vld [vmem:[#allocation8 + $0xf8] ss:$24 sps:$4 sm:$0xff]  }
  0x7a   : > { %435 = vadd.xlane.f32.xlu0 %v434_v24  ;;  %1498 = vmatprep.subr.bf16.mxu1 %v2485_v53  ;;  %v2495_v60 = vld [vmem:[#allocation8 + $0xc4] ss:$24 sps:$4 sm:$0xff]   ;;  %v2499_v62 = vld [vmem:[#allocation8 + $0xc0] ss:$24 sps:$4 sm:$0xff]   ;;  %v2501_v3 = vld [vmem:[#allocation8 + $0x94] ss:$24 sps:$4 sm:$0xff]  }
  0x7b   : > { %438 = vadd.xlane.f32.xlu1 %v437_v27  ;;  %v2497_v61 = vld [vmem:[#allocation8 + $0xcc] ss:$24 sps:$4 sm:$0xff]   ;;  %v2500_v63 = vld [vmem:[#allocation8 + $0xc8] ss:$24 sps:$4 sm:$0xff]   ;;  %v2503_v7 = vld [vmem:[#allocation8 + $0x9c] ss:$24 sps:$4 sm:$0xff]  }
  0x7c   : > { %1386 = vmatpush1.bf16.msra.mxu0 %v2487_v54  ;;  %v2505_v10 = vld [vmem:[#allocation8 + $0x90] ss:$24 sps:$4 sm:$0xff]   ;;  %v2507_v16 = vld [vmem:[#allocation8 + $0x64] ss:$24 sps:$4 sm:$0xff]   ;;  %v2511_v24 = vld [vmem:[#allocation8 + $0x60] ss:$24 sps:$4 sm:$0xff]  }
  0x7d   : > { %1499 = vmatpush1.bf16.msra.mxu1 %v2488_v55  ;;  %1387 = vmatprep.subr.bf16.mxu0 %v2489_v56  ;;  %v2506_v11 = vld [vmem:[#allocation8 + $0x98] ss:$24 sps:$4 sm:$0xff]   ;;  %v2509_v17 = vld [vmem:[#allocation8 + $0x6c] ss:$24 sps:$4 sm:$0xff]   ;;  %v2512_v27 = vld [vmem:[#allocation8 + $0x68] ss:$24 sps:$4 sm:$0xff]  }
  0x7e   : > { %441 = vadd.xlane.f32.xlu0 %v440_v30  ;;  %1500 = vmatprep.subr.bf16.mxu1 %v2491_v57  ;;  %v2513_v30 = vld [vmem:[#allocation8 + $0x34] ss:$24 sps:$4 sm:$0xff]   ;;  %v2529_v50 = vld [vmem:[#allocation8 + $0x2d0] ss:$24 sps:$4 sm:$0xff]   ;;  %s2763_s1 = sshll.u32 %s2929_s15, 4  ;;  %s2764_s1 = int_to_ptr.vmem [resolvable:$false] %s2763_s1 }
  0x7f   : > { %444 = vadd.xlane.f32.xlu1 %v443_v33  ;;  %v2515_v33 = vld [vmem:[#allocation8 + $0x3c] ss:$24 sps:$4 sm:$0xff]   ;;  %v2530_v51 = vld [vmem:[#allocation8 + $0x2d8] ss:$24 sps:$4 sm:$0xff]   ;;  %s2765_s12 = scalar_lea.vmem %s2764_s1, 8192  ;;  %p2766_p11 = scmp.lt.s32.totalorder %s3762_s28, %s2764_s1 }
  0x80   : > { %1388 = vmatpush1.bf16.msra.mxu0 %v2493_v58  ;;  %v2525_v48 = vld [vmem:[#allocation8 + $0x2d4] ss:$24 sps:$4 sm:$0xff]   ;;  %p2767_p5 = scmp.lt.s32.totalorder %s2765_s12, %s2759_s23 }
  0x81   : > { %1501 = vmatpush1.bf16.msra.mxu1 %v2494_v59  ;;  %1389 = vmatprep.subr.bf16.mxu0 %v2495_v60  ;;  %v2527_v49 = vld [vmem:[#allocation8 + $0x2dc] ss:$24 sps:$4 sm:$0xff]  }
  0x82   : > { %447 = vadd.xlane.f32.xlu0 %v446_v36  ;;  %1502 = vmatprep.subr.bf16.mxu1 %v2497_v61  ;;  %v2517_v36 = vld [vmem:[#allocation8 + $0x30] ss:$24 sps:$4 sm:$0xff]   ;;  %p2768_p7 = por %p2767_p5, %p2766_p11 }
  0x83   : > { %450 = vadd.xlane.f32.xlu1 %v449_v39  ;;  %v2518_v39 = vld [vmem:[#allocation8 + $0x38] ss:$24 sps:$4 sm:$0xff]  }
  0x84   : > { %1390 = vmatpush1.bf16.msra.mxu0 %v2499_v62  ;;  %p2769_p9 = pnand %p2768_p7, %p2762_p8 }
  0x85   : > { %1503 = vmatpush1.bf16.msra.mxu1 %v2500_v63  ;;  %1391 = vmatprep.subr.bf16.mxu0 %v2501_v3 }
  0x86   : > { %453 = vadd.xlane.f32.xlu0 %v452_v42  ;;  %1504 = vmatprep.subr.bf16.mxu1 %v2503_v7  ;;  %v2519_v42 = vld [vmem:[#allocation8 + $0x4] ss:$24 sps:$4 sm:$0xff]  }
  0x87   : > { %456 = vadd.xlane.f32.xlu1 %v455_v45  ;;  %v2521_v45 = vld [vmem:[#allocation8 + $0xc] ss:$24 sps:$4 sm:$0xff]  }
  0x88   : > { %1392 = vmatpush1.bf16.msra.mxu0 %v2505_v10 }
  0x89   : > { %1505 = vmatpush1.bf16.msra.mxu1 %v2506_v11  ;;  %1393 = vmatprep.subr.bf16.mxu0 %v2507_v16 }
  0x8a   : > { %459 = vadd.xlane.f32.xlu0 %v458_v46  ;;  %1506 = vmatprep.subr.bf16.mxu1 %v2509_v17  ;;  %v2523_v46 = vld [vmem:[#allocation8] ss:$24 sps:$4 sm:$0xff]  }
  0x8b   : > { %462 = vadd.xlane.f32.xlu1 %v461_v47  ;;  %v2524_v47 = vld [vmem:[#allocation8 + $0x8] ss:$24 sps:$4 sm:$0xff]  }
  0x8c   : > { %1394 = vmatpush1.bf16.msra.mxu0 %v2511_v24 }
  0x8d   : > { %1507 = vmatpush1.bf16.msra.mxu1 %v2512_v27  ;;  %1395 = vmatprep.subr.bf16.mxu0 %v2513_v30 }
  0x8e   : > { %1508 = vmatprep.subr.bf16.mxu1 %v2515_v33 }
  0x90   : > { %1396 = vmatpush1.bf16.msra.mxu0 %v2517_v36 }
  0x91   : > { %1509 = vmatpush1.bf16.msra.mxu1 %v2518_v39  ;;  %1397 = vmatprep.subr.bf16.mxu0 %v2519_v42 }
  0x92   : > { %1510 = vmatprep.subr.bf16.mxu1 %v2521_v45 }
  0x94   : > { %1398 = vmatpush1.bf16.msra.mxu0 %v2523_v46 }
  0x95   : > { %1511 = vmatpush1.bf16.msra.mxu1 %v2524_v47  ;;  %1399 = vmatprep.subr.bf16.mxu0 %v2525_v48 }
  0x96   : > { %1512 = vmatprep.subr.bf16.mxu1 %v2527_v49 }
  0x98   : > { %1400 = vmatpush2.bf16.msra.mxu0 %v2529_v50 }
  0x99   : > { %1513 = vmatpush2.bf16.msra.mxu1 %v2530_v51 }
  0xf7   : > { %v418_v52 = vpop.xlane.xlu0 %417 }
  0xf8   : > { %v465_v53 = vmul.f32 0.00390625, %v418_v52  ;;  %v424_v54 = vpop.xlane.xlu1 %423 }
  0xf9   : > { %v467_v55 = vmul.f32 0.00390625, %v424_v54 }
  0xfa   : > { %v3283_v56 = vsub.f32 %v3155_v0, %v465_v53  ;;  %v3286_v57 = vsub.f32 %v3158_v1, %v465_v53 }
  0xfb   : > { %v3289_v58 = vsub.f32 %v3161_v2, %v467_v55  ;;  %v3292_v59 = vsub.f32 %v3166_v4, %v467_v55  ;;  %v421_v60 = vpop.xlane.xlu0 %420 }
  0xfc   : > { %v466_v61 = vmul.f32 0.00390625, %v421_v60  ;;  %v427_v62 = vpop.xlane.xlu1 %426  ;;  %v513_v63 = vmul.f32 %v3283_v56, %v3283_v56  ;;  %v514_v3 = vmul.f32 %v3286_v57, %v3286_v57 }
  0xfd   : > { %v468_v0 = vmul.f32 0.00390625, %v427_v62  ;;  %v517_v1 = vmul.f32 %v3289_v58, %v3289_v58  ;;  %v518_v2 = vmul.f32 %v3292_v59, %v3292_v59 }
  0xfe   : > { %v3303_v7 = vsub.f32 %v3169_v5, %v466_v61  ;;  %v3306_v4 = vsub.f32 %v3172_v6, %v466_v61  ;;  %v545_v10 = vadd.f32 %v514_v3, %v513_v63 }
  0xff   : > { %v3309_v11 = vsub.f32 %v3177_v8, %v468_v0  ;;  %v3312_v16 = vsub.f32 %v3180_v9, %v468_v0  ;;  %v430_v17 = vpop.xlane.xlu0 %429  ;;  %v551_v30 = vadd.f32 %v518_v2, %v517_v1 }
 0x100   : > { %v469_v24 = vmul.f32 0.00390625, %v430_v17  ;;  %546 = vadd.xlane.f32.xlu0 %v545_v10  ;;  %v433_v27 = vpop.xlane.xlu1 %432  ;;  %v515_v33 = vmul.f32 %v3303_v7, %v3303_v7  ;;  %v516_v5 = vmul.f32 %v3306_v4, %v3306_v4 }
 0x101   : > { %v470_v6 = vmul.f32 0.00390625, %v433_v27  ;;  %v519_v36 = vmul.f32 %v3309_v11, %v3309_v11  ;;  %v520_v8 = vmul.f32 %v3312_v16, %v3312_v16 }
 0x102   : > { %v3323_v9 = vsub.f32 %v3187_v12, %v469_v24  ;;  %v3326_v39 = vsub.f32 %v3190_v13, %v469_v24  ;;  %v548_v42 = vadd.f32 %v516_v5, %v515_v33  ;;  %v2533_v33 = vld [vmem:[#allocation8 + $0x2ac] ss:$24 sps:$4 sm:$0xff]  }
 0x103   : > { %v3329_v45 = vsub.f32 %v3193_v14, %v470_v6  ;;  %v3332_v46 = vsub.f32 %v3196_v15, %v470_v6  ;;  %v436_v47 = vpop.xlane.xlu0 %435  ;;  %v554_v50 = vadd.f32 %v520_v8, %v519_v36  ;;  %v2535_v8 = vld [vmem:[#allocation8 + $0x2a0] ss:$24 sps:$4 sm:$0xff]   ;;  %1514 = vmatprep.subr.bf16.mxu1 %v2533_v33 }
 0x104   : > { %v471_v48 = vmul.f32 0.00390625, %v436_v47  ;;  %552 = vadd.xlane.f32.xlu0 %v551_v30  ;;  %549 = vadd.xlane.f32.xlu1 %v548_v42  ;;  %v439_v49 = vpop.xlane.xlu1 %438  ;;  %v521_v12 = vmul.f32 %v3323_v9, %v3323_v9  ;;  %v522_v13 = vmul.f32 %v3326_v39, %v3326_v39  ;;  %v2531_v30 = vld [vmem:[#allocation8 + $0x2a4] ss:$24 sps:$4 sm:$0xff]  }
 0x105   : > { %v472_v51 = vmul.f32 0.00390625, %v439_v49  ;;  %v523_v14 = vmul.f32 %v3329_v45, %v3329_v45  ;;  %v524_v15 = vmul.f32 %v3332_v46, %v3332_v46  ;;  %1401 = vmatprep.subr.bf16.mxu0 %v2531_v30 }
 0x106   : > { %v3343_v52 = vsub.f32 %v3203_v18, %v471_v48  ;;  %v3346_v53 = vsub.f32 %v3206_v19, %v471_v48  ;;  %v557_v54 = vadd.f32 %v522_v13, %v521_v12  ;;  %1402 = vmatpush2.bf16.msra.mxu0 %v2535_v8  ;;  %v2548_v8 = vld [vmem:[#allocation8 + $0x248] ss:$24 sps:$4 sm:$0xff]  }
 0x107   : > { %v3349_v55 = vsub.f32 %v3209_v20, %v472_v51  ;;  %v3352_v60 = vsub.f32 %v3212_v21, %v472_v51  ;;  %v442_v61 = vpop.xlane.xlu0 %441  ;;  %v560_v3 = vadd.f32 %v524_v15, %v523_v14 }
 0x108   : > { %v473_v62 = vmul.f32 0.00390625, %v442_v61  ;;  %555 = vadd.xlane.f32.xlu1 %v554_v50  ;;  %558 = vadd.xlane.f32.xlu0 %v557_v54  ;;  %v445_v63 = vpop.xlane.xlu1 %444  ;;  %v525_v18 = vmul.f32 %v3343_v52, %v3343_v52  ;;  %v526_v19 = vmul.f32 %v3346_v53, %v3346_v53  ;;  %v2537_v61 = vld [vmem:[#allocation8 + $0x274] ss:$24 sps:$4 sm:$0xff]  }
 0x109   : > { %v474_v0 = vmul.f32 0.00390625, %v445_v63  ;;  %v527_v20 = vmul.f32 %v3349_v55, %v3349_v55  ;;  %v528_v21 = vmul.f32 %v3352_v60, %v3352_v60  ;;  %1403 = vmatprep.subr.bf16.mxu0 %v2537_v61 }
 0x10a   : > { %v3363_v1 = vsub.f32 %v3215_v22, %v473_v62  ;;  %v3366_v2 = vsub.f32 %v3218_v23, %v473_v62  ;;  %v563_v10 = vadd.f32 %v526_v19, %v525_v18  ;;  %v2539_v62 = vld [vmem:[#allocation8 + $0x27c] ss:$24 sps:$4 sm:$0xff]   ;;  %v2542_v18 = vld [vmem:[#allocation8 + $0x278] ss:$24 sps:$4 sm:$0xff]  }
 0x10b   : > { %v3369_v17 = vsub.f32 %v3223_v25, %v474_v0  ;;  %v3372_v24 = vsub.f32 %v3226_v26, %v474_v0  ;;  %v448_v27 = vpop.xlane.xlu0 %447  ;;  %v566_v36 = vadd.f32 %v528_v21, %v527_v20  ;;  %v2536_v25 = vld [vmem:[#allocation8 + $0x2a8] ss:$24 sps:$4 sm:$0xff]  }
 0x10c   : > { %v475_v5 = vmul.f32 0.00390625, %v448_v27  ;;  %561 = vadd.xlane.f32.xlu1 %v560_v3  ;;  %564 = vadd.xlane.f32.xlu0 %v563_v10  ;;  %v451_v6 = vpop.xlane.xlu1 %450  ;;  %v529_v22 = vmul.f32 %v3363_v1, %v3363_v1  ;;  %v530_v23 = vmul.f32 %v3366_v2, %v3366_v2  ;;  %v2541_v3 = vld [vmem:[#allocation8 + $0x270] ss:$24 sps:$4 sm:$0xff]  }
 0x10d   : > { %v476_v42 = vmul.f32 0.00390625, %v451_v6  ;;  %v531_v26 = vmul.f32 %v3369_v17, %v3369_v17  ;;  %v532_v47 = vmul.f32 %v3372_v24, %v3372_v24  ;;  %1515 = vmatpush2.bf16.msra.mxu1 %v2536_v25  ;;  %1404 = vmatpush2.bf16.msra.mxu0 %v2541_v3  ;;  %v2543_v6 = vld [vmem:[#allocation8 + $0x244] ss:$24 sps:$4 sm:$0xff]   ;;  %v2561_v3 = vld [vmem:[#allocation8 + $0x1b4] ss:$24 sps:$4 sm:$0xff]  }
 0x10e   : > { %v3383_v48 = vsub.f32 %v3231_v28, %v475_v5  ;;  %v3386_v49 = vsub.f32 %v3234_v29, %v475_v5  ;;  %v569_v50 = vadd.f32 %v530_v23, %v529_v22  ;;  %1516 = vmatprep.subr.bf16.mxu1 %v2539_v62  ;;  %v2547_v23 = vld [vmem:[#allocation8 + $0x240] ss:$24 sps:$4 sm:$0xff]   ;;  %1405 = vmatprep.subr.bf16.mxu0 %v2543_v6  ;;  %v2555_v62 = vld [vmem:[#allocation8 + $0x1e4] ss:$24 sps:$4 sm:$0xff]  }
 0x10f   : > { %v3389_v12 = vsub.f32 %v3239_v31, %v476_v42  ;;  %v3392_v13 = vsub.f32 %v3242_v32, %v476_v42  ;;  %v454_v51 = vpop.xlane.xlu0 %453  ;;  %v572_v54 = vadd.f32 %v532_v47, %v531_v26 }
 0x110   : > { %v477_v14 = vmul.f32 0.00390625, %v454_v51  ;;  %567 = vadd.xlane.f32.xlu1 %v566_v36  ;;  %570 = vadd.xlane.f32.xlu0 %v569_v50  ;;  %v457_v15 = vpop.xlane.xlu1 %456  ;;  %v533_v28 = vmul.f32 %v3383_v48, %v3383_v48  ;;  %v534_v29 = vmul.f32 %v3386_v49, %v3386_v49 }
 0x111   : > { %v478_v63 = vmul.f32 0.00390625, %v457_v15  ;;  %v535_v31 = vmul.f32 %v3389_v12, %v3389_v12  ;;  %v536_v32 = vmul.f32 %v3392_v13, %v3392_v13  ;;  %1517 = vmatpush2.bf16.msra.mxu1 %v2542_v18  ;;  %1406 = vmatpush2.bf16.msra.mxu0 %v2547_v23  ;;  %v2551_v15 = vld [vmem:[#allocation8 + $0x21c] ss:$24 sps:$4 sm:$0xff]  }
 0x112   : > { %v3403_v19 = vsub.f32 %v3247_v34, %v477_v14  ;;  %v3406_v0 = vsub.f32 %v3250_v35, %v477_v14  ;;  %v575_v20 = vadd.f32 %v534_v29, %v533_v28  ;;  %v2549_v14 = vld [vmem:[#allocation8 + $0x214] ss:$24 sps:$4 sm:$0xff]   ;;  %v2554_v28 = vld [vmem:[#allocation8 + $0x218] ss:$24 sps:$4 sm:$0xff]  }
 0x113   : > { %v3409_v21 = vsub.f32 %v3255_v37, %v478_v63  ;;  %v3412_v10 = vsub.f32 %v3258_v38, %v478_v63  ;;  %v460_v27 = vpop.xlane.xlu0 %459  ;;  %v578_v33 = vadd.f32 %v536_v32, %v535_v31  ;;  %v2545_v37 = vld [vmem:[#allocation8 + $0x24c] ss:$24 sps:$4 sm:$0xff]   ;;  %1407 = vmatprep.subr.bf16.mxu0 %v2549_v14  ;;  %v2559_v31 = vld [vmem:[#allocation8 + $0x1e0] ss:$24 sps:$4 sm:$0xff]   ;;  %v2563_v18 = vld [vmem:[#allocation8 + $0x1bc] ss:$24 sps:$4 sm:$0xff]  }
 0x114   : > { %v479_v30 = vmul.f32 0.00390625, %v460_v27  ;;  %573 = vadd.xlane.f32.xlu1 %v572_v54  ;;  %576 = vadd.xlane.f32.xlu0 %v575_v20  ;;  %v463_v34 = vpop.xlane.xlu1 %462  ;;  %v537_v35 = vmul.f32 %v3403_v19, %v3403_v19  ;;  %v538_v5 = vmul.f32 %v3406_v0, %v3406_v0  ;;  %v2553_v54 = vld [vmem:[#allocation8 + $0x210] ss:$24 sps:$4 sm:$0xff]   ;;  %v2557_v63 = vld [vmem:[#allocation8 + $0x1ec] ss:$24 sps:$4 sm:$0xff]  }
 0x115   : > { %v480_v36 = vmul.f32 0.00390625, %v463_v34  ;;  %v539_v38 = vmul.f32 %v3409_v21, %v3409_v21  ;;  %v540_v22 = vmul.f32 %v3412_v10, %v3412_v10  ;;  %1518 = vmatprep.subr.bf16.mxu1 %v2545_v37  ;;  %1408 = vmatpush2.bf16.msra.mxu0 %v2553_v54  ;;  %v2560_v32 = vld [vmem:[#allocation8 + $0x1e8] ss:$24 sps:$4 sm:$0xff]   ;;  %v2566_v27 = vld [vmem:[#allocation8 + $0x1b8] ss:$24 sps:$4 sm:$0xff]  }
 0x116   : > { %v3423_v25 = vsub.f32 %v3263_v40, %v479_v30  ;;  %v3426_v42 = vsub.f32 %v3266_v41, %v479_v30  ;;  %v581_v26 = vadd.f32 %v538_v5, %v537_v35  ;;  %1519 = vmatpush2.bf16.msra.mxu1 %v2548_v8  ;;  %1409 = vmatprep.subr.bf16.mxu0 %v2555_v62  ;;  %v2565_v20 = vld [vmem:[#allocation8 + $0x1b0] ss:$24 sps:$4 sm:$0xff]   ;;  %v2567_v30 = vld [vmem:[#allocation8 + $0x184] ss:$24 sps:$4 sm:$0xff]  }
 0x117   : > { %v3429_v47 = vsub.f32 %v3271_v43, %v480_v36  ;;  %v3432_v50 = vsub.f32 %v3274_v44, %v480_v36  ;;  %v584_v51 = vadd.f32 %v540_v22, %v539_v38  ;;  %1520 = vmatprep.subr.bf16.mxu1 %v2551_v15  ;;  %v2569_v34 = vld [vmem:[#allocation8 + $0x18c] ss:$24 sps:$4 sm:$0xff]   ;;  %v2572_v35 = vld [vmem:[#allocation8 + $0x188] ss:$24 sps:$4 sm:$0xff]  }
 0x118   : > { %579 = vadd.xlane.f32.xlu1 %v578_v33  ;;  %582 = vadd.xlane.f32.xlu0 %v581_v26  ;;  %v541_v40 = vmul.f32 %v3423_v25, %v3423_v25  ;;  %v542_v41 = vmul.f32 %v3426_v42, %v3426_v42  ;;  %v2571_v33 = vld [vmem:[#allocation8 + $0x180] ss:$24 sps:$4 sm:$0xff]   ;;  %v2575_v5 = vld [vmem:[#allocation8 + $0x164] ss:$24 sps:$4 sm:$0xff]   ;;  %v674_v26 = vlaneseq }
 0x119   : > { %v543_v43 = vmul.f32 %v3429_v47, %v3429_v47  ;;  %v544_v44 = vmul.f32 %v3432_v50, %v3432_v50  ;;  %1410 = vmatpush2.bf16.msra.mxu0 %v2559_v31 }
 0x11a   : > { %v587_v29 = vadd.f32 %v542_v41, %v541_v40  ;;  %1521 = vmatpush2.bf16.msra.mxu1 %v2554_v28  ;;  %1411 = vmatprep.subr.bf16.mxu0 %v2561_v3 }
 0x11b   : > { %v590_v61 = vadd.f32 %v544_v44, %v543_v43  ;;  %1522 = vmatprep.subr.bf16.mxu1 %v2557_v63  ;;  %v3442_v44 = vshrl.u32 %v674_v26, 7 }
 0x11c   : > { %585 = vadd.xlane.f32.xlu1 %v584_v51  ;;  %588 = vadd.xlane.f32.xlu0 %v587_v29 }
 0x11d   : > { %1412 = vmatpush2.bf16.msra.mxu0 %v2565_v20  ;;  %v3445_v31 = vsub.s32 1, %v3442_v44 }
 0x11e   : > { %1523 = vmatpush2.bf16.msra.mxu1 %v2560_v32  ;;  %1413 = vmatprep.subr.bf16.mxu0 %v2567_v30  ;;  %v3448_v32 = vsub.s32 0, %v3442_v44 }
 0x11f   : > { %1524 = vmatprep.subr.bf16.mxu1 %v2563_v18  ;;  %v414_v18 = vld [vmem:[#allocation5] sm:$0x3] }
 0x120   : > { %591 = vadd.xlane.f32.xlu1 %v590_v61 }
 0x121   : > { %1414 = vmatpush2.bf16.msra.mxu0 %v2571_v33 }
 0x122   : > { %1525 = vmatpush2.bf16.msra.mxu1 %v2566_v27  ;;  %1609 = vmatprep.subr.bf16.mxu0 %v2575_v5 }
 0x123   : > { %1526 = vmatprep.subr.bf16.mxu1 %v2569_v34 }
 0x126   : > { %1527 = vmatpush2.bf16.msra.mxu1 %v2572_v35  ;;  %v415_v35 = vld [vmem:[#allocation7] sm:$0x3] }
 0x127   : > { %2318 = vmatprep.subr.bf16.mxu1 %v2575_v5  ;;  %v3451_v5 = vrot.slane %v414_v18, %v3445_v31  ;;  %v3459_v26 = vrot.slane %v415_v35, %v3445_v31 }
 0x189   : > { %v547_v6 = vpop.xlane.xlu0 %546 }
 0x18a   : > { %v593_v37 = vmul.f32 0.00390625, %v547_v6  ;;  %v3454_v6 = vrot.slane %v414_v18, %v3448_v32 }
 0x18c   : > { %v609_v36 = vadd.f32 1e-05, %v593_v37 }
 0x18d   : > { %v550_v38 = vpop.xlane.xlu1 %549  ;;  %v553_v22 = vpop.xlane.xlu0 %552 }
 0x18e   : > { %2621 = vrsqrt.f32 %v609_v36  ;;  %v594_v23 = vmul.f32 0.00390625, %v550_v38  ;;  %v595_v8 = vmul.f32 0.00390625, %v553_v22 }
 0x190   : > { %v610_v51 = vadd.f32 1e-05, %v594_v23  ;;  %v611_v40 = vadd.f32 1e-05, %v595_v8 }
 0x191   : > { %v556_v41 = vpop.xlane.xlu1 %555  ;;  %v559_v14 = vpop.xlane.xlu0 %558 }
 0x192   : > { %2623 = vrsqrt.f32 %v610_v51  ;;  %v596_v15 = vmul.f32 0.00390625, %v556_v41  ;;  %v597_v43 = vmul.f32 0.00390625, %v559_v14  ;;  %v3464_v14 = vrot.slane %v415_v35, %v3448_v32 }
 0x193   : > { %2625 = vrsqrt.f32 %v611_v40 }
 0x194   : > { %v612_v54 = vadd.f32 1e-05, %v596_v15  ;;  %v613_v28 = vadd.f32 1e-05, %v597_v43 }
 0x195   : > { %v562_v29 = vpop.xlane.xlu1 %561  ;;  %v565_v61 = vpop.xlane.xlu0 %564 }
 0x196   : > { %2627 = vrsqrt.f32 %v612_v54  ;;  %v598_v62 = vmul.f32 0.00390625, %v562_v29  ;;  %v599_v63 = vmul.f32 0.00390625, %v565_v61 }
 0x197   : > { %2629 = vrsqrt.f32 %v613_v28 }
 0x198   : > { %v614_v3 = vadd.f32 1e-05, %v598_v62  ;;  %v615_v34 = vadd.f32 1e-05, %v599_v63 }
 0x199   : > { %v568_v20 = vpop.xlane.xlu1 %567  ;;  %v571_v33 = vpop.xlane.xlu0 %570 }
 0x19a   : > { %2631 = vrsqrt.f32 %v614_v3  ;;  %v600_v27 = vmul.f32 0.00390625, %v568_v20  ;;  %v601_v23 = vmul.f32 0.00390625, %v571_v33 }
 0x19b   : > { %v2622_v30 = vpop.eup %2621 }
 0x19c   : > { %v616_v37 = vadd.f32 1e-05, %v600_v27  ;;  %v642_v36 = vmul.f32 %v2622_v30, %v3286_v57  ;;  %v641_v38 = vmul.f32 %v2622_v30, %v3283_v56  ;;  %v617_v28 = vadd.f32 1e-05, %v601_v23 }
 0x19d   : > { %v574_v22 = vpop.xlane.xlu1 %573  ;;  %v577_v20 = vpop.xlane.xlu0 %576 }
 0x19e   : > { %2633 = vrsqrt.f32 %v616_v37  ;;  %v602_v8 = vmul.f32 0.00390625, %v574_v22  ;;  %v685_v40 = vmul.f32 %v3451_v5, %v642_v36  ;;  %v684_v41 = vmul.f32 %v3454_v6, %v641_v38  ;;  %v2573_v36 = vld [vmem:[#allocation8 + $0x160] ss:$24 sps:$4 sm:$0xff]  }
 0x19f   : > { %v2624_v51 = vpop.eup %2623  ;;  %2635 = vrsqrt.f32 %v615_v34  ;;  %v603_v22 = vmul.f32 0.00390625, %v577_v20 }
 0x1a0   : > { %v2626_v15 = vpop.eup %2625  ;;  %v618_v57 = vadd.f32 1e-05, %v602_v8  ;;  %v644_v56 = vmul.f32 %v2624_v51, %v3306_v4  ;;  %v643_v43 = vmul.f32 %v2624_v51, %v3303_v7  ;;  %v728_v63 = vadd.f32 %v3459_v26, %v685_v40  ;;  %v2578_v8 = vld [vmem:[#allocation8 + $0x134] ss:$24 sps:$4 sm:$0xff]  }
 0x1a1   : > { %v646_v54 = vmul.f32 %v2626_v15, %v3292_v59  ;;  %v580_v29 = vpop.xlane.xlu1 %579  ;;  %v727_v18 = vadd.f32 %v3464_v14, %v684_v41  ;;  %v645_v7 = vmul.f32 %v2626_v15, %v3289_v58 }
 0x1a2   : > { %v687_v61 = vmul.f32 %v3451_v5, %v644_v56  ;;  %v686_v3 = vmul.f32 %v3454_v6, %v643_v43  ;;  %2637 = vrsqrt.f32 %v618_v57  ;;  %v604_v30 = vmul.f32 0.00390625, %v580_v29  ;;  %v2576_v43 = vld [vmem:[#allocation8 + $0x130] ss:$24 sps:$4 sm:$0xff]  }
 0x1a3   : > { %v2628_v62 = vpop.eup %2627  ;;  %v689_v33 = vmul.f32 %v3451_v5, %v646_v54  ;;  %2639 = vrsqrt.f32 %v617_v28  ;;  %v688_v51 = vmul.f32 %v3454_v6, %v645_v7  ;;  %v619_v29 = vadd.f32 1e-05, %v603_v22 }
 0x1a4   : > { %v730_v27 = vadd.f32 %v3459_v26, %v687_v61  ;;  %v648_v4 = vmul.f32 %v2628_v62, %v3312_v16  ;;  %v2630_v59 = vpop.eup %2629  ;;  %v729_v34 = vadd.f32 %v3464_v14, %v686_v3  ;;  %v647_v35 = vmul.f32 %v2628_v62, %v3309_v11  ;;  %v2581_v62 = vld [vmem:[#allocation8 + $0x104] ss:$24 sps:$4 sm:$0xff]  }
 0x1a5   : > { %v650_v11 = vmul.f32 %v2630_v59, %v3326_v39  ;;  %v620_v41 = vadd.f32 1e-05, %v604_v30  ;;  %v586_v15 = vpop.xlane.xlu1 %585  ;;  %v732_v57 = vadd.f32 %v3459_v26, %v689_v33  ;;  %v649_v7 = vmul.f32 %v2630_v59, %v3323_v9  ;;  %v2579_v33 = vld [vmem:[#allocation8 + $0x100] ss:$24 sps:$4 sm:$0xff]  }
 0x1a6   : > { %v3479_v37 = vpack.c.bf16 %v730_v27, %v728_v63  ;;  %v3481_v23 = vpack.c.bf16 %v729_v34, %v727_v18  ;;  %v691_v16 = vmul.f32 %v3451_v5, %v648_v4  ;;  %v690_v58 = vmul.f32 %v3454_v6, %v647_v35 }
 0x1a7   : > { %v2632_v38 = vpop.eup %2631  ;;  %v693_v63 = vmul.f32 %v3451_v5, %v650_v11  ;;  %v606_v20 = vmul.f32 0.00390625, %v586_v15  ;;  %v731_v27 = vadd.f32 %v3464_v14, %v688_v51  ;;  %2641 = vrsqrt.f32 %v620_v41  ;;  %v2582_v11 = vld [vmem:[#allocation8 + $0xd0] ss:$24 sps:$4 sm:$0xff]  }
 0x1a8   : > { %1415 = vmatprep.mubr.bf16.mxu0 %v3479_v37  ;;  %1528 = vmatprep.mubr.bf16.mxu1 %v3479_v37  ;;  %v652_v40 = vmul.f32 %v2632_v38, %v3332_v46  ;;  %v734_v56 = vadd.f32 %v3459_v26, %v691_v16  ;;  %v733_v54 = vadd.f32 %v3464_v14, %v690_v58  ;;  %v583_v46 = vpop.xlane.xlu0 %582  ;;  %2643 = vrsqrt.f32 %v619_v29  ;;  %v2584_v16 = vld [vmem:[#allocation8 + $0xd4] ss:$24 sps:$4 sm:$0xff]  }
 0x1a9   : > { %1416 = vmatmul.mubr.bf16.vlgmr.msra.gmra.mxu0 %v3481_v23  ;;  %1529 = vmatmul.mubr.bf16.vlgmr.msra.gmra.mxu1 %v3481_v23  ;;  %v651_v3 = vmul.f32 %v2632_v38, %v3329_v45  ;;  %v605_v34 = vmul.f32 0.00390625, %v583_v46  ;;  %v736_v35 = vadd.f32 %v3459_v26, %v693_v63  ;;  %v622_v22 = vadd.f32 1e-05, %v606_v20  ;;  %v592_v59 = vpop.xlane.xlu1 %591 }
 0x1aa   : > { %1610 = vmatpush1.bf16.msra.mxu0 %v2573_v36  ;;  %2334 = vmatpush1.bf16.msra.mxu1 %v2573_v36  ;;  %v695_v28 = vmul.f32 %v3451_v5, %v652_v40  ;;  %v3496_v61 = vpack.c.bf16 %v734_v56, %v732_v57  ;;  %v3506_v45 = vpack.c.bf16 %v733_v54, %v731_v27 }
 0x1ab   : > { %v2634_v39 = vpop.eup %2633  ;;  %1611 = vmatprep.subr.bf16.mxu0 %v2578_v8  ;;  %2319 = vmatprep.subr.bf16.mxu1 %v2578_v8  ;;  %v694_v36 = vmul.f32 %v3454_v6, %v651_v3  ;;  %v692_v8 = vmul.f32 %v3454_v6, %v649_v7  ;;  %v621_v51 = vadd.f32 1e-05, %v605_v34  ;;  %2645 = vrsqrt.f32 %v622_v22  ;;  %v2588_v7 = vld [vmem:[#allocation8 + $0x70] ss:$24 sps:$4 sm:$0xff]  }
 0x1ac   : > { %v2636_v18 = vpop.eup %2635  ;;  %1425 = vmatprep.mubr.bf16.mxu0 %v3496_v61  ;;  %1538 = vmatprep.mubr.bf16.mxu1 %v3496_v61  ;;  %v738_v4 = vadd.f32 %v3459_v26, %v695_v28  ;;  %v656_v30 = vmul.f32 %v2634_v39, %v3352_v60  ;;  %v655_v57 = vmul.f32 %v2634_v39, %v3349_v55  ;;  %v589_v56 = vpop.xlane.xlu0 %588 }
 0x1ad   : > { %v654_v38 = vmul.f32 %v2636_v18, %v3346_v53  ;;  %v2587_v53 = vld [vmem:[#allocation8 + $0xa4] ss:$24 sps:$4 sm:$0xff]   ;;  %v737_v41 = vadd.f32 %v3464_v14, %v694_v36  ;;  %v735_v54 = vadd.f32 %v3464_v14, %v692_v8  ;;  %v653_v29 = vmul.f32 %v2636_v18, %v3343_v52 }
 0x1ae   : > { %1612 = vmatpush1.bf16.msra.mxu0 %v2576_v43  ;;  %2335 = vmatpush1.bf16.msra.mxu1 %v2576_v43  ;;  %v3513_v60 = vpack.c.bf16 %v738_v4, %v736_v35  ;;  %v699_v58 = vmul.f32 %v3451_v5, %v656_v30  ;;  %v608_v43 = vmul.f32 0.00390625, %v592_v59  ;;  %2647 = vrsqrt.f32 %v621_v51  ;;  %v2590_v4 = vld [vmem:[#allocation8 + $0x74] ss:$24 sps:$4 sm:$0xff]  }
 0x1af   : > { %1613 = vmatprep.subr.bf16.mxu0 %v2581_v62  ;;  %2320 = vmatprep.subr.bf16.mxu1 %v2581_v62  ;;  %v2638_v9 = vpop.eup %2637  ;;  %v697_v15 = vmul.f32 %v3451_v5, %v654_v38  ;;  %v2585_v62 = vld [vmem:[#allocation8 + $0xa0] ss:$24 sps:$4 sm:$0xff]   ;;  %v607_v55 = vmul.f32 0.00390625, %v589_v56  ;;  %v3527_v39 = vpack.c.bf16 %v737_v41, %v735_v54  ;;  %v698_v20 = vmul.f32 %v3454_v6, %v655_v57 }
 0x1b0   : > { %v2640_v40 = vpop.eup %2639  ;;  %v742_v28 = vadd.f32 %v3459_v26, %v699_v58  ;;  %v660_v46 = vmul.f32 %v2638_v9, %v3372_v24  ;;  %v624_v27 = vadd.f32 1e-05, %v608_v43  ;;  %v696_v24 = vmul.f32 %v3454_v6, %v653_v29  ;;  %v2591_v58 = vld [vmem:[#allocation8 + $0x40] ss:$24 sps:$4 sm:$0xff]  }
 0x1b1   : > { %1426 = vmatmul.mubr.bf16.gmra.mxu0 %v3506_v45  ;;  %1539 = vmatmul.mubr.bf16.gmra.mxu1 %v3506_v45  ;;  %v658_v63 = vmul.f32 %v2640_v40, %v3366_v2  ;;  %v740_v3 = vadd.f32 %v3459_v26, %v697_v15  ;;  %v623_v34 = vadd.f32 1e-05, %v607_v55  ;;  %v741_v35 = vadd.f32 %v3464_v14, %v698_v20  ;;  %v2594_v15 = vld [vmem:[#allocation8 + $0x10] ss:$24 sps:$4 sm:$0xff]  }
 0x1b2   : > { %1614 = vmatpush1.bf16.msra.mxu0 %v2579_v33  ;;  %2336 = vmatpush1.bf16.msra.mxu1 %v2579_v33  ;;  %v703_v2 = vmul.f32 %v3451_v5, %v660_v46  ;;  %v2593_v33 = vld [vmem:[#allocation8 + $0x44] ss:$24 sps:$4 sm:$0xff]   ;;  %v659_v36 = vmul.f32 %v2638_v9, %v3369_v17  ;;  %2649 = vrsqrt.f32 %v624_v27  ;;  %v739_v22 = vadd.f32 %v3464_v14, %v696_v24  ;;  %v2602_v27 = vld [vmem:[#allocation8 + $0x2b4] ss:$24 sps:$4 sm:$0xff]   ;;  %v2600_v24 = vld [vmem:[#allocation8 + $0x2b0] ss:$24 sps:$4 sm:$0xff]  }
 0x1b3   : > { %1435 = vmatprep.mubr.bf16.mxu0 %v3513_v60  ;;  %1548 = vmatprep.mubr.bf16.mxu1 %v3513_v60  ;;  %v3533_v52 = vpack.c.bf16 %v742_v28, %v740_v3  ;;  %v701_v30 = vmul.f32 %v3451_v5, %v658_v63  ;;  %v657_v59 = vmul.f32 %v2640_v40, %v3363_v1  ;;  %2651 = vrsqrt.f32 %v623_v34  ;;  %v2597_v63 = vld [vmem:[#allocation8 + $0x2e0] ss:$24 sps:$4 sm:$0xff]  }
 0x1b4   : > { %1615 = vmatprep.subr.bf16.mxu0 %v2584_v16  ;;  %2321 = vmatprep.subr.bf16.mxu1 %v2584_v16  ;;  %v2642_v18 = vpop.eup %2641  ;;  %v746_v16 = vadd.f32 %v3459_v26, %v703_v2  ;;  %v3547_v17 = vpack.c.bf16 %v741_v35, %v739_v22  ;;  %v702_v9 = vmul.f32 %v3454_v6, %v659_v36  ;;  %v2603_v22 = vld [vmem:[#allocation8 + $0x280] ss:$24 sps:$4 sm:$0xff]  }
 0x1b5   : > { %v2644_v38 = vpop.eup %2643  ;;  %v664_v8 = vmul.f32 %v2642_v18, %v3392_v13  ;;  %v744_v51 = vadd.f32 %v3459_v26, %v701_v30  ;;  %v700_v13 = vmul.f32 %v3454_v6, %v657_v59  ;;  %v663_v54 = vmul.f32 %v2642_v18, %v3389_v12  ;;  %v2605_v18 = vld [vmem:[#allocation8 + $0x284] ss:$24 sps:$4 sm:$0xff]  }
 0x1b6   : > { %1616 = vmatpush1.bf16.msra.mxu0 %v2582_v11  ;;  %2337 = vmatpush1.bf16.msra.mxu1 %v2582_v11  ;;  %v662_v11 = vmul.f32 %v2644_v38, %v3386_v49  ;;  %v2599_v49 = vld [vmem:[#allocation8 + $0x2e4] ss:$24 sps:$4 sm:$0xff]   ;;  %v745_v56 = vadd.f32 %v3464_v14, %v702_v9  ;;  %v661_v46 = vmul.f32 %v2644_v38, %v3383_v48  ;;  %v2606_v9 = vld [vmem:[#allocation8 + $0x250] ss:$24 sps:$4 sm:$0xff]  }
 0x1b7   : > { %1617 = vmatprep.subr.bf16.mxu0 %v2587_v53  ;;  %2322 = vmatprep.subr.bf16.mxu1 %v2587_v53  ;;  %v2596_v53 = vld [vmem:[#allocation8 + $0x14] ss:$24 sps:$4 sm:$0xff]   ;;  %v3553_v1 = vpack.c.bf16 %v746_v16, %v744_v51  ;;  %v707_v40 = vmul.f32 %v3451_v5, %v664_v8  ;;  %v743_v28 = vadd.f32 %v3464_v14, %v700_v13 }
 0x1b8   : > { %v2646_v41 = vpop.eup %2645  ;;  %v705_v43 = vmul.f32 %v3451_v5, %v662_v11  ;;  %v706_v20 = vmul.f32 %v3454_v6, %v663_v54  ;;  %v2611_v11 = vld [vmem:[#allocation8 + $0x224] ss:$24 sps:$4 sm:$0xff]  }
 0x1b9   : > { %1436 = vmatmul.mubr.bf16.gmra.mxu0 %v3527_v39  ;;  %1549 = vmatmul.mubr.bf16.gmra.mxu1 %v3527_v39  ;;  %v750_v29 = vadd.f32 %v3459_v26, %v707_v40  ;;  %v3567_v3 = vpack.c.bf16 %v745_v56, %v743_v28  ;;  %v667_v30 = vmul.f32 %v2646_v41, %v3409_v21  ;;  %v2612_v28 = vld [vmem:[#allocation8 + $0x1f0] ss:$24 sps:$4 sm:$0xff]  }
 0x1ba   : > { %1618 = vmatpush1.bf16.msra.mxu0 %v2585_v62  ;;  %2338 = vmatpush1.bf16.msra.mxu1 %v2585_v62  ;;  %v668_v62 = vmul.f32 %v2646_v41, %v3412_v10  ;;  %v748_v12 = vadd.f32 %v3459_v26, %v705_v43  ;;  %v704_v10 = vmul.f32 %v3454_v6, %v661_v46  ;;  %v2614_v43 = vld [vmem:[#allocation8 + $0x1f4] ss:$24 sps:$4 sm:$0xff]   ;;  %v2615_v46 = vld [vmem:[#allocation8 + $0x1c0] ss:$24 sps:$4 sm:$0xff]  }
 0x1bb   : > { %1445 = vmatprep.mubr.bf16.mxu0 %v3533_v52  ;;  %1558 = vmatprep.mubr.bf16.mxu1 %v3533_v52  ;;  %v2648_v57 = vpop.eup %2647  ;;  %v710_v21 = vmul.f32 %v3454_v6, %v667_v30 }
 0x1bc   : > { %1619 = vmatprep.subr.bf16.mxu0 %v2590_v4  ;;  %2323 = vmatprep.subr.bf16.mxu1 %v2590_v4  ;;  %v666_v55 = vmul.f32 %v2648_v57, %v3406_v0  ;;  %v3573_v48 = vpack.c.bf16 %v750_v29, %v748_v12  ;;  %v711_v0 = vmul.f32 %v3451_v5, %v668_v62 }
 0x1bd   : > { %v665_v36 = vmul.f32 %v2648_v57, %v3403_v19  ;;  %v2609_v57 = vld [vmem:[#allocation8 + $0x220] ss:$24 sps:$4 sm:$0xff]  }
 0x1be   : > { %1620 = vmatpush1.bf16.msra.mxu0 %v2588_v7  ;;  %2339 = vmatpush1.bf16.msra.mxu1 %v2588_v7  ;;  %v709_v2 = vmul.f32 %v3451_v5, %v666_v55  ;;  %v749_v7 = vadd.f32 %v3464_v14, %v706_v20  ;;  %v754_v35 = vadd.f32 %v3459_v26, %v711_v0 }
 0x1bf   : > { %1621 = vmatprep.subr.bf16.mxu0 %v2593_v33  ;;  %2324 = vmatprep.subr.bf16.mxu1 %v2593_v33  ;;  %v2650_v4 = vpop.eup %2649  ;;  %v747_v33 = vadd.f32 %v3464_v14, %v704_v10 }
 0x1c0   : > { %v2652_v34 = vpop.eup %2651  ;;  %v672_v38 = vmul.f32 %v2650_v4, %v3432_v50  ;;  %v752_v16 = vadd.f32 %v3459_v26, %v709_v2  ;;  %v708_v50 = vmul.f32 %v3454_v6, %v665_v36  ;;  %v671_v41 = vmul.f32 %v2650_v4, %v3429_v47 }
 0x1c1   : > { %1446 = vmatmul.mubr.bf16.gmra.mxu0 %v3547_v17  ;;  %1559 = vmatmul.mubr.bf16.gmra.mxu1 %v3547_v17  ;;  %v3587_v59 = vpack.c.bf16 %v749_v7, %v747_v33  ;;  %v670_v8 = vmul.f32 %v2652_v34, %v3426_v42  ;;  %v753_v42 = vadd.f32 %v3464_v14, %v710_v21 }
 0x1c2   : > { %1622 = vmatpush1.bf16.msra.mxu0 %v2591_v58  ;;  %2340 = vmatpush1.bf16.msra.mxu1 %v2591_v58  ;;  %v2608_v58 = vld [vmem:[#allocation8 + $0x254] ss:$24 sps:$4 sm:$0xff]   ;;  %v3593_v19 = vpack.c.bf16 %v754_v35, %v752_v16  ;;  %v715_v51 = vmul.f32 %v3451_v5, %v672_v38  ;;  %v751_v13 = vadd.f32 %v3464_v14, %v708_v50 }
 0x1c3   : > { %1455 = vmatprep.mubr.bf16.mxu0 %v3553_v1  ;;  %1568 = vmatprep.mubr.bf16.mxu1 %v3553_v1 }
 0x1c4   : > { %1623 = vmatprep.subr.bf16.mxu0 %v2596_v53  ;;  %2325 = vmatprep.subr.bf16.mxu1 %v2596_v53  ;;  %v713_v53 = vmul.f32 %v3451_v5, %v670_v8  ;;  %v758_v40 = vadd.f32 %v3459_v26, %v715_v51  ;;  %v714_v5 = vmul.f32 %v3454_v6, %v671_v41 }
 0x1c6   : > { %1624 = vmatpush1.bf16.msra.mxu0 %v2594_v15  ;;  %2341 = vmatpush1.bf16.msra.mxu1 %v2594_v15  ;;  %v669_v15 = vmul.f32 %v2652_v34, %v3423_v25  ;;  %v756_v56 = vadd.f32 %v3459_v26, %v713_v53  ;;  %v2617_v25 = vld [vmem:[#allocation8 + $0x1c4] ss:$24 sps:$4 sm:$0xff]   ;;  %v757_v29 = vadd.f32 %v3464_v14, %v714_v5 }
 0x1c7   : > { %1625 = vmatprep.subr.bf16.mxu0 %v2599_v49  ;;  %2326 = vmatprep.subr.bf16.mxu1 %v2599_v49  ;;  %v771_v49 = vpack.c.bf16 %v753_v42, %v751_v13 }
 0x1c8   : > { %v774_v47 = vpack.c.bf16 %v758_v40, %v756_v56  ;;  %v712_v54 = vmul.f32 %v3454_v6, %v669_v15  ;;  %v2618_v6 = vld [vmem:[#allocation8 + $0x190] ss:$24 sps:$4 sm:$0xff]  }
 0x1c9   : > { %1456 = vmatmul.mubr.bf16.gmra.mxu0 %v3567_v3  ;;  %1569 = vmatmul.mubr.bf16.gmra.mxu1 %v3567_v3 }
 0x1ca   : > { %1626 = vmatpush2.bf16.msra.mxu0 %v2597_v63  ;;  %2342 = vmatpush2.bf16.msra.mxu1 %v2597_v63  ;;  %v755_v26 = vadd.f32 %v3464_v14, %v712_v54  ;;  %v2620_v63 = vld [vmem:[#allocation8 + $0x194] ss:$24 sps:$4 sm:$0xff]   ;;  %v883_v14 = vsub.s32 2, %v3442_v44 }
 0x1cb   : > { %1465 = vmatprep.mubr.bf16.mxu0 %v3573_v48  ;;  %1578 = vmatprep.mubr.bf16.mxu1 %v3573_v48 }
 0x1cc   : > { %1627 = vmatprep.subr.bf16.mxu0 %v2602_v27  ;;  %2327 = vmatprep.subr.bf16.mxu1 %v2602_v27  ;;  %v773_v62 = vpack.c.bf16 %v757_v29, %v755_v26 }
 0x1ce   : > { %1628 = vmatpush2.bf16.msra.mxu0 %v2600_v24  ;;  %2343 = vmatpush2.bf16.msra.mxu1 %v2600_v24 }
 0x1cf   : > { %1629 = vmatprep.subr.bf16.mxu0 %v2605_v18  ;;  %2328 = vmatprep.subr.bf16.mxu1 %v2605_v18 }
 0x1d1   : > { %1466 = vmatmul.mubr.bf16.gmra.mxu0 %v3587_v59  ;;  %1579 = vmatmul.mubr.bf16.gmra.mxu1 %v3587_v59 }
 0x1d2   : > { %1630 = vmatpush2.bf16.msra.mxu0 %v2603_v22  ;;  %2344 = vmatpush2.bf16.msra.mxu1 %v2603_v22 }
 0x1d3   : > { %1475 = vmatprep.mubr.bf16.mxu0 %v3593_v19  ;;  %1588 = vmatprep.mubr.bf16.mxu1 %v3593_v19 }
 0x1d4   : > { %1631 = vmatprep.subr.bf16.mxu0 %v2608_v58  ;;  %2329 = vmatprep.subr.bf16.mxu1 %v2608_v58 }
 0x1d6   : > { %1632 = vmatpush2.bf16.msra.mxu0 %v2606_v9  ;;  %2345 = vmatpush2.bf16.msra.mxu1 %v2606_v9 }
 0x1d7   : > { %1633 = vmatprep.subr.bf16.mxu0 %v2611_v11  ;;  %2330 = vmatprep.subr.bf16.mxu1 %v2611_v11 }
 0x1d9   : > { %1476 = vmatmul.mubr.bf16.gmra.mxu0 %v771_v49  ;;  %1589 = vmatmul.mubr.bf16.gmra.mxu1 %v771_v49 }
 0x1da   : > { %1634 = vmatpush2.bf16.msra.mxu0 %v2609_v57  ;;  %2346 = vmatpush2.bf16.msra.mxu1 %v2609_v57 }
 0x1db   : > { %1485 = vmatprep.mubr.bf16.mxu0 %v774_v47  ;;  %1598 = vmatprep.mubr.bf16.mxu1 %v774_v47 }
 0x1dc   : > { %1635 = vmatprep.subr.bf16.mxu0 %v2614_v43  ;;  %2331 = vmatprep.subr.bf16.mxu1 %v2614_v43 }
 0x1de   : > { %1636 = vmatpush2.bf16.msra.mxu0 %v2612_v28  ;;  %2347 = vmatpush2.bf16.msra.mxu1 %v2612_v28 }
 0x1df   : > { %1637 = vmatprep.subr.bf16.mxu0 %v2617_v25  ;;  %2332 = vmatprep.subr.bf16.mxu1 %v2617_v25 }
 0x1e1   : > { %1486 = vmatmul.mubr.bf16.gmra.mxu0 %v773_v62  ;;  %1599 = vmatmul.mubr.bf16.gmra.mxu1 %v773_v62 }
 0x1e2   : > { %1638 = vmatpush2.bf16.msra.mxu0 %v2615_v46  ;;  %2348 = vmatpush2.bf16.msra.mxu1 %v2615_v46 }
 0x1e3   : > { %1641 = vmatprep.mubr.bf16.mxu0 %v3479_v37  ;;  %1681 = vmatprep.mubr.bf16.mxu1 %v3553_v1  ;;  %v3627_v37 = vld [vmem:[%s3981_s4] sm:$0x3f] }
 0x1e4   : > { %1639 = vmatprep.subr.bf16.mxu0 %v2620_v63  ;;  %2333 = vmatprep.subr.bf16.mxu1 %v2620_v63 }
 0x1e6   : > { %1640 = vmatpush2.bf16.msra.mxu0 %v2618_v6  ;;  %2349 = vmatpush2.bf16.msra.mxu1 %v2618_v6 }
 0x1e9   : > { %1642 = vmatmul.mubr.bf16.vlgmr.msra.gmra.mxu0 %v3481_v23  ;;  %1682 = vmatmul.mubr.bf16.vlgmr.msra.gmra.mxu1 %v3567_v3  ;;  %v887_v23 = vsub.s32 3, %v3442_v44 }
 0x1ea   : > { %1651 = vmatprep.mubr.bf16.mxu0 %v3496_v61  ;;  %1691 = vmatprep.mubr.bf16.mxu1 %v3573_v48  ;;  %v3631_v61 = vrot.slane %v3627_v37, %v883_v14 }
 0x1f1   : > { %1652 = vmatmul.mubr.bf16.gmra.mxu0 %v3506_v45  ;;  %1692 = vmatmul.mubr.bf16.gmra.mxu1 %v3587_v59  ;;  %v3635_v45 = vrot.slane %v3627_v37, %v3448_v32 }
 0x1f2   : > { %1661 = vmatprep.mubr.bf16.mxu0 %v3513_v60  ;;  %1701 = vmatprep.mubr.bf16.mxu1 %v3593_v19  ;;  %v3639_v60 = vrot.slane %v3627_v37, %v3445_v31 }
 0x1f9   : > { %1662 = vmatmul.mubr.bf16.gmra.mxu0 %v3527_v39  ;;  %1702 = vmatmul.mubr.bf16.gmra.mxu1 %v771_v49  ;;  %v3642_v39 = vrot.slane %v3627_v37, %v887_v23 }
 0x1fa   : > { %1671 = vmatprep.mubr.bf16.mxu0 %v3533_v52  ;;  %1711 = vmatprep.mubr.bf16.mxu1 %v774_v47 }
 0x201   : > { %1672 = vmatmul.mubr.bf16.gmra.mxu0 %v3547_v17  ;;  %1712 = vmatmul.mubr.bf16.gmra.mxu1 %v773_v62 }
 0x269   : > { %v1417_v52 = vpop.f32.mrf.mxu0  ;;  %v1530_v17 = vpop.f32.mrf.mxu1 }
 0x26a   : > { %v1531_v1 = vadd.f32 %v1530_v17, %v3631_v61  ;;  %v1418_v12 = vadd.f32 %v1417_v52, %v3635_v45 }
 0x26b   : > { %v1419_v55 = vpop.f32.mrf.mxu0  ;;  %v1532_v3 = vpop.f32.mrf.mxu1 }
 0x26c   : > { %1834 = vst [vmem:[%s3648_s13] sm:$0xff] %v1531_v1  ;;  %v1420_v31 = vadd.f32 %v1419_v55, %v3639_v60  ;;  %v1533_v32 = vadd.f32 %v1532_v3, %v3642_v39 }
 0x26d   : > { %v1421_v20 = vpop.f32.mrf.mxu0  ;;  %v1534_v27 = vpop.f32.mrf.mxu1 }
 0x26e   : > { %v2299_v4 = vpack.c.bf16 %v1420_v31, %v1418_v12  ;;  %1835 = vst [vmem:[%s3648_s13 + $0x8] sm:$0xff] %v1533_v32  ;;  %v1535_v48 = vadd.f32 %v1534_v27, %v3631_v61  ;;  %v1422_v24 = vadd.f32 %v1421_v20, %v3635_v45 }
 0x26f   : > { %v1423_v10 = vpop.f32.mrf.mxu0  ;;  %v1536_v0 = vpop.f32.mrf.mxu1 }
 0x270   : > { %1818 = vst [vmem:[%s3655_s17] sm:$0xff] %v2299_v4  ;;  %1836 = vst [vmem:[%s3648_s13 + $0x10] sm:$0xff] %v1535_v48  ;;  %v1424_v2 = vadd.f32 %v1423_v10, %v3639_v60  ;;  %v1537_v18 = vadd.f32 %v1536_v0, %v3642_v39 }
 0x271   : > { %v1427_v7 = vpop.f32.mrf.mxu0  ;;  %v1540_v30 = vpop.f32.mrf.mxu1 }
 0x272   : > { %v2300_v34 = vpack.c.bf16 %v1424_v2, %v1422_v24  ;;  %1837 = vst [vmem:[%s3648_s13 + $0x18] sm:$0xff] %v1537_v18  ;;  %v1541_v33 = vadd.f32 %v1540_v30, %v3631_v61  ;;  %v1428_v38 = vadd.f32 %v1427_v7, %v3635_v45 }
 0x273   : > { %v1429_v35 = vpop.f32.mrf.mxu0  ;;  %v1542_v36 = vpop.f32.mrf.mxu1 }
 0x274   : > { %1819 = vst [vmem:[%s3655_s17 + $0x8] sm:$0xff] %v2300_v34  ;;  %1838 = vst [vmem:[%s3648_s13 + $0x20] sm:$0xff] %v1541_v33  ;;  %v1430_v22 = vadd.f32 %v1429_v35, %v3639_v60  ;;  %v1543_v16 = vadd.f32 %v1542_v36, %v3642_v39 }
 0x275   : > { %v1431_v59 = vpop.f32.mrf.mxu0  ;;  %v1544_v21 = vpop.f32.mrf.mxu1 }
 0x276   : > { %v2301_v8 = vpack.c.bf16 %v1430_v22, %v1428_v38  ;;  %1839 = vst [vmem:[%s3648_s13 + $0x28] sm:$0xff] %v1543_v16  ;;  %v1545_v58 = vadd.f32 %v1544_v21, %v3631_v61  ;;  %v1432_v51 = vadd.f32 %v1431_v59, %v3635_v45 }
 0x277   : > { %v1433_v19 = vpop.f32.mrf.mxu0  ;;  %v1546_v50 = vpop.f32.mrf.mxu1 }
 0x278   : > { %1820 = vst [vmem:[%s3655_s17 + $0x10] sm:$0xff] %v2301_v8  ;;  %1840 = vst [vmem:[%s3648_s13 + $0x30] sm:$0xff] %v1545_v58  ;;  %v1434_v9 = vadd.f32 %v1433_v19, %v3639_v60  ;;  %v1547_v11 = vadd.f32 %v1546_v50, %v3642_v39 }
 0x279   : > { %v1437_v42 = vpop.f32.mrf.mxu0  ;;  %v1550_v53 = vpop.f32.mrf.mxu1 }
 0x27a   : > { %v2302_v41 = vpack.c.bf16 %v1434_v9, %v1432_v51  ;;  %1841 = vst [vmem:[%s3648_s13 + $0x38] sm:$0xff] %v1547_v11  ;;  %v1551_v13 = vadd.f32 %v1550_v53, %v3631_v61  ;;  %v1438_v57 = vadd.f32 %v1437_v42, %v3635_v45 }
 0x27b   : > { %v1439_v40 = vpop.f32.mrf.mxu0  ;;  %v1552_v15 = vpop.f32.mrf.mxu1 }
 0x27c   : > { %1821 = vst [vmem:[%s3655_s17 + $0x18] sm:$0xff] %v2302_v41  ;;  %1842 = vst [vmem:[%s3648_s13 + $0x40] sm:$0xff] %v1551_v13  ;;  %v1440_v49 = vadd.f32 %v1439_v40, %v3639_v60  ;;  %v1553_v56 = vadd.f32 %v1552_v15, %v3642_v39 }
 0x27d   : > { %v1441_v5 = vpop.f32.mrf.mxu0  ;;  %v1554_v43 = vpop.f32.mrf.mxu1 }
 0x27e   : > { %v2303_v47 = vpack.c.bf16 %v1440_v49, %v1438_v57  ;;  %1843 = vst [vmem:[%s3648_s13 + $0x48] sm:$0xff] %v1553_v56  ;;  %v1555_v54 = vadd.f32 %v1554_v43, %v3631_v61  ;;  %v1442_v29 = vadd.f32 %v1441_v5, %v3635_v45 }
 0x27f   : > { %v1443_v28 = vpop.f32.mrf.mxu0  ;;  %v1556_v25 = vpop.f32.mrf.mxu1 }
 0x280   : > { %1822 = vst [vmem:[%s3655_s17 + $0x20] sm:$0xff] %v2303_v47  ;;  %1844 = vst [vmem:[%s3648_s13 + $0x50] sm:$0xff] %v1555_v54  ;;  %v1444_v26 = vadd.f32 %v1443_v28, %v3639_v60  ;;  %v1557_v46 = vadd.f32 %v1556_v25, %v3642_v39 }
 0x281   : > { %v1447_v62 = vpop.f32.mrf.mxu0  ;;  %v1560_v63 = vpop.f32.mrf.mxu1 }
 0x282   : > { %v2304_v6 = vpack.c.bf16 %v1444_v26, %v1442_v29  ;;  %1845 = vst [vmem:[%s3648_s13 + $0x58] sm:$0xff] %v1557_v46  ;;  %v1561_v14 = vadd.f32 %v1560_v63, %v3631_v61  ;;  %v1448_v17 = vadd.f32 %v1447_v62, %v3635_v45 }
 0x283   : > { %v1449_v23 = vpop.f32.mrf.mxu0  ;;  %v1562_v52 = vpop.f32.mrf.mxu1 }
 0x284   : > { %1823 = vst [vmem:[%s3655_s17 + $0x28] sm:$0xff] %v2304_v6  ;;  %1846 = vst [vmem:[%s3648_s13 + $0x60] sm:$0xff] %v1561_v14  ;;  %v1450_v1 = vadd.f32 %v1449_v23, %v3639_v60  ;;  %v1563_v55 = vadd.f32 %v1562_v52, %v3642_v39 }
 0x285   : > { %v1451_v3 = vpop.f32.mrf.mxu0  ;;  %v1564_v12 = vpop.f32.mrf.mxu1 }
 0x286   : > { %v2305_v31 = vpack.c.bf16 %v1450_v1, %v1448_v17  ;;  %1847 = vst [vmem:[%s3648_s13 + $0x68] sm:$0xff] %v1563_v55  ;;  %v1565_v32 = vadd.f32 %v1564_v12, %v3631_v61  ;;  %v1452_v4 = vadd.f32 %v1451_v3, %v3635_v45 }
 0x287   : > { %v1453_v20 = vpop.f32.mrf.mxu0  ;;  %v1566_v27 = vpop.f32.mrf.mxu1 }
 0x288   : > { %1824 = vst [vmem:[%s3655_s17 + $0x30] sm:$0xff] %v2305_v31  ;;  %1848 = vst [vmem:[%s3648_s13 + $0x70] sm:$0xff] %v1565_v32  ;;  %v1454_v48 = vadd.f32 %v1453_v20, %v3639_v60  ;;  %v1567_v10 = vadd.f32 %v1566_v27, %v3642_v39 }
 0x289   : > { %v1457_v0 = vpop.f32.mrf.mxu0  ;;  %v1570_v24 = vpop.f32.mrf.mxu1 }
 0x28a   : > { %v2306_v2 = vpack.c.bf16 %v1454_v48, %v1452_v4  ;;  %1849 = vst [vmem:[%s3648_s13 + $0x78] sm:$0xff] %v1567_v10  ;;  %v1571_v18 = vadd.f32 %v1570_v24, %v3631_v61  ;;  %v1458_v34 = vadd.f32 %v1457_v0, %v3635_v45  ;;  %v891_v0 = vsub.s32 4, %v3442_v44 }
 0x28b   : > { %v1459_v7 = vpop.f32.mrf.mxu0  ;;  %v1572_v30 = vpop.f32.mrf.mxu1 }
 0x28c   : > { %1825 = vst [vmem:[%s3655_s17 + $0x38] sm:$0xff] %v2306_v2  ;;  %1850 = vst [vmem:[%s3648_s13 + $0x80] sm:$0xff] %v1571_v18  ;;  %v1460_v33 = vadd.f32 %v1459_v7, %v3639_v60  ;;  %v1573_v35 = vadd.f32 %v1572_v30, %v3642_v39 }
 0x28d   : > { %v1461_v36 = vpop.f32.mrf.mxu0  ;;  %v1574_v38 = vpop.f32.mrf.mxu1 }
 0x28e   : > { %v2307_v22 = vpack.c.bf16 %v1460_v33, %v1458_v34  ;;  %1851 = vst [vmem:[%s3648_s13 + $0x88] sm:$0xff] %v1573_v35  ;;  %v1575_v16 = vadd.f32 %v1574_v38, %v3631_v61  ;;  %v1462_v8 = vadd.f32 %v1461_v36, %v3635_v45  ;;  %v895_v34 = vsub.s32 5, %v3442_v44 }
 0x28f   : > { %v1463_v59 = vpop.f32.mrf.mxu0  ;;  %v1576_v21 = vpop.f32.mrf.mxu1 }
 0x290   : > { %1826 = vst [vmem:[%s3655_s17 + $0x40] sm:$0xff] %v2307_v22  ;;  %1852 = vst [vmem:[%s3648_s13 + $0x90] sm:$0xff] %v1575_v16  ;;  %v1464_v58 = vadd.f32 %v1463_v59, %v3639_v60  ;;  %v1577_v19 = vadd.f32 %v1576_v21, %v3642_v39  ;;  %v3767_v22 = vrot.slane %v3627_v37, %v891_v0 }
 0x291   : > { %v1467_v50 = vpop.f32.mrf.mxu0  ;;  %v1580_v51 = vpop.f32.mrf.mxu1 }
 0x292   : > { %v2308_v9 = vpack.c.bf16 %v1464_v58, %v1462_v8  ;;  %1853 = vst [vmem:[%s3648_s13 + $0x98] sm:$0xff] %v1577_v19  ;;  %v1581_v11 = vadd.f32 %v1580_v51, %v3631_v61  ;;  %v1468_v41 = vadd.f32 %v1467_v50, %v3635_v45  ;;  %v3784_v8 = vrot.slane %v3627_v37, %v895_v34 }
 0x293   : > { %v1469_v42 = vpop.f32.mrf.mxu0  ;;  %v1582_v53 = vpop.f32.mrf.mxu1 }
 0x294   : > { %1827 = vst [vmem:[%s3655_s17 + $0x48] sm:$0xff] %v2308_v9  ;;  %1854 = vst [vmem:[%s3648_s13 + $0xa0] sm:$0xff] %v1581_v11  ;;  %v1470_v13 = vadd.f32 %v1469_v42, %v3639_v60  ;;  %v1583_v40 = vadd.f32 %v1582_v53, %v3642_v39 }
 0x295   : > { %v1471_v15 = vpop.f32.mrf.mxu0  ;;  %v1584_v57 = vpop.f32.mrf.mxu1 }
 0x296   : > { %v2309_v49 = vpack.c.bf16 %v1470_v13, %v1468_v41  ;;  %1855 = vst [vmem:[%s3648_s13 + $0xa8] sm:$0xff] %v1583_v40  ;;  %v1585_v56 = vadd.f32 %v1584_v57, %v3631_v61  ;;  %v1472_v47 = vadd.f32 %v1471_v15, %v3635_v45 }
 0x297   : > { %v1473_v5 = vpop.f32.mrf.mxu0  ;;  %v1586_v43 = vpop.f32.mrf.mxu1 }
 0x298   : > { %1828 = vst [vmem:[%s3655_s17 + $0x50] sm:$0xff] %v2309_v49  ;;  %1856 = vst [vmem:[%s3648_s13 + $0xb0] sm:$0xff] %v1585_v56  ;;  %v1474_v54 = vadd.f32 %v1473_v5, %v3639_v60  ;;  %v1587_v28 = vadd.f32 %v1586_v43, %v3642_v39 }
 0x299   : > { %v1477_v25 = vpop.f32.mrf.mxu0  ;;  %v1590_v29 = vpop.f32.mrf.mxu1 }
 0x29a   : > { %v2310_v26 = vpack.c.bf16 %v1474_v54, %v1472_v47  ;;  %1857 = vst [vmem:[%s3648_s13 + $0xb8] sm:$0xff] %v1587_v28  ;;  %v1591_v46 = vadd.f32 %v1590_v29, %v3631_v61  ;;  %v1478_v6 = vadd.f32 %v1477_v25, %v3635_v45 }
 0x29b   : > { %v1479_v62 = vpop.f32.mrf.mxu0  ;;  %v1592_v63 = vpop.f32.mrf.mxu1 }
 0x29c   : > { %1829 = vst [vmem:[%s3655_s17 + $0x58] sm:$0xff] %v2310_v26  ;;  %1858 = vst [vmem:[%s3648_s13 + $0xc0] sm:$0xff] %v1591_v46  ;;  %v1480_v14 = vadd.f32 %v1479_v62, %v3639_v60  ;;  %v1593_v23 = vadd.f32 %v1592_v63, %v3642_v39 }
 0x29d   : > { %v1481_v52 = vpop.f32.mrf.mxu0  ;;  %v1594_v17 = vpop.f32.mrf.mxu1 }
 0x29e   : > { %v2311_v1 = vpack.c.bf16 %v1480_v14, %v1478_v6  ;;  %1859 = vst [vmem:[%s3648_s13 + $0xc8] sm:$0xff] %v1593_v23  ;;  %v1595_v55 = vadd.f32 %v1594_v17, %v3631_v61  ;;  %v1482_v31 = vadd.f32 %v1481_v52, %v3635_v45 }
 0x29f   : > { %v1483_v3 = vpop.f32.mrf.mxu0  ;;  %v1596_v12 = vpop.f32.mrf.mxu1 }
 0x2a0   : > { %1830 = vst [vmem:[%s3655_s17 + $0x60] sm:$0xff] %v2311_v1  ;;  %1860 = vst [vmem:[%s3648_s13 + $0xd0] sm:$0xff] %v1595_v55  ;;  %v1484_v32 = vadd.f32 %v1483_v3, %v3639_v60  ;;  %v1597_v20 = vadd.f32 %v1596_v12, %v3642_v39 }
 0x2a1   : > { %v1487_v27 = vpop.f32.mrf.mxu0  ;;  %v1600_v4 = vpop.f32.mrf.mxu1 }
 0x2a2   : > { %v2312_v48 = vpack.c.bf16 %v1484_v32, %v1482_v31  ;;  %1861 = vst [vmem:[%s3648_s13 + $0xd8] sm:$0xff] %v1597_v20  ;;  %v1601_v10 = vadd.f32 %v1600_v4, %v3631_v61  ;;  %v1488_v18 = vadd.f32 %v1487_v27, %v3635_v45 }
 0x2a3   : > { %v1489_v24 = vpop.f32.mrf.mxu0  ;;  %v1602_v2 = vpop.f32.mrf.mxu1 }
 0x2a4   : > { %1831 = vst [vmem:[%s3655_s17 + $0x68] sm:$0xff] %v2312_v48  ;;  %1862 = vst [vmem:[%s3648_s13 + $0xe0] sm:$0xff] %v1601_v10  ;;  %v1490_v7 = vadd.f32 %v1489_v24, %v3639_v60  ;;  %v1603_v30 = vadd.f32 %v1602_v2, %v3642_v39 }
 0x2a5   : > { %v1491_v33 = vpop.f32.mrf.mxu0  ;;  %v1604_v35 = vpop.f32.mrf.mxu1 }
 0x2a6   : > { %v2313_v36 = vpack.c.bf16 %v1490_v7, %v1488_v18  ;;  %1863 = vst [vmem:[%s3648_s13 + $0xe8] sm:$0xff] %v1603_v30  ;;  %v1605_v38 = vadd.f32 %v1604_v35, %v3631_v61  ;;  %v1492_v44 = vadd.f32 %v1491_v33, %v3635_v45 }
 0x2a7   : > { %v1493_v16 = vpop.f32.mrf.mxu0  ;;  %v1606_v59 = vpop.f32.mrf.mxu1 }
 0x2a8   : > { %1832 = vst [vmem:[%s3655_s17 + $0x70] sm:$0xff] %v2313_v36  ;;  %1864 = vst [vmem:[%s3648_s13 + $0xf0] sm:$0xff] %v1605_v38  ;;  %v1494_v61 = vadd.f32 %v1493_v16, %v3639_v60  ;;  %v1607_v21 = vadd.f32 %v1606_v59, %v3642_v39 }
 0x2a9   : > { %v1643_v58 = vpop.f32.mrf.mxu0  ;;  %v1683_v19 = vpop.f32.mrf.mxu1 }
 0x2aa   : > { %v2314_v45 = vpack.c.bf16 %v1494_v61, %v1492_v44  ;;  %1865 = vst [vmem:[%s3648_s13 + $0xf8] sm:$0xff] %v1607_v21  ;;  %v1644_v60 = vadd.f32 %v1643_v58, %v3767_v22  ;;  %v1684_v50 = vadd.f32 %v1683_v19, %v3767_v22 }
 0x2ab   : > { %v1645_v39 = vpop.f32.mrf.mxu0  ;;  %v1685_v51 = vpop.f32.mrf.mxu1 }
 0x2ac   : > { %2772 = shalt.err (!%p2769_p9)
}
 0x2ad   : > { %s2773_s9 = scalar_lea.hbm %s3776_s5, 4096  ;;  %s2777_s19 = scalar_lea.hbm %s3983_s6, 16384 }
 0x2ae   : > { %p2774_p12 = scmp.ne.s32.totalorder %s3776_s5, %s2773_s9  ;;  %p2778_p1 = scmp.lt.s32.totalorder %s3776_s5, %s3983_s6 }
 0x2af   : > { %p2779_p2 = scmp.lt.s32.totalorder %s2777_s19, %s2773_s9 }
 0x2b0   : > { %p2775_p10 = pnand %p2774_p12, %p3096_p13 }
 0x2b1   : > { %p2780_p3 = por %p2779_p2, %p2778_p1 }
 0x2b2   : > { %p2776_p0 = pneg %p2775_p10 }
 0x2b4   : > { %p2781_p4 = pnand %p2780_p3, %p2776_p0 }
 0x2b6   : > { %2784 = shalt.err (!%p2781_p4)
}
 0x2b7   : > { %s2930_s23 = smov 256   ;;  %s2931_s15 = smov 16   ;;  %1833 = vst [vmem:[%s3655_s17 + $0x78] sm:$0xff] %v2314_v45  ;;  %v1646_v37 = vadd.f32 %v1645_v39, %v3784_v8  ;;  %v1686_v9 = vadd.f32 %v1685_v51, %v3784_v8  ;;  %v1647_v11 = vpop.f32.mrf.mxu0  ;;  %v1687_v42 = vpop.f32.mrf.mxu1 }
 0x2b8   : > { %2365 = dma.vmem_to_hbm [thread:$0]  (%p3096_p13), %s3762_s28, 4096, %s3776_s5, %s3798_s11, %s2930_s23, %s2930_s23, %s2931_s15  }
 0x2b9   : > { %s3826_s1 = scalar_lea.vmem [#allocation13], %s3136_s29  ;;  %s1899_s12 = scalar_lea.sflag [#allocation4], %s3133_s24 }
 0x2ba   : > { %1866 = vst [vmem:[%s3826_s1] sm:$0xff] %v1644_v60  ;;  %1882 = vst [vmem:[%s3826_s1 + $0x80] sm:$0xff] %v1684_v50  ;;  %s2785_s9 = scalar_lea.vmem %s3791_s10, 2048  ;;  %s2932_s17 = smov [#allocation10]  }
 0x2bb   : > { %p2786_p6 = scmp.ne.s32.totalorder %s3791_s10, %s2785_s9  ;;  %s2789_s29 = sshll.u32 %s2932_s17, 4  ;;  %s2790_s29 = int_to_ptr.vmem [resolvable:$false] %s2789_s29 }
 0x2bc   : > { %s2791_s28 = scalar_lea.vmem %s2790_s29, 4096  ;;  %p2792_p5 = scmp.lt.s32.totalorder %s3791_s10, %s2790_s29 }
 0x2bd   : > { %p2787_p8 = pnand %p2786_p6, %p3096_p13  ;;  %p2793_p7 = scmp.lt.s32.totalorder %s2791_s28, %s2785_s9 }
 0x2bf   : > { %p2788_p11 = pneg %p2787_p8  ;;  %p2794_p9 = por %p2793_p7, %p2792_p5 }
 0x2c1   : > { %p2795_p12 = pnand %p2794_p9, %p2788_p11 }
 0x2c3   : > { %2798 = shalt.err (!%p2795_p12)
}
 0x2c4   : > { %s2799_s5 = scalar_lea.hbm %s3789_s7, 2048  ;;  %s2803_s19 = scalar_lea.hbm %s4021_s3, 8192 }
 0x2c5   : > { %p2800_p10 = scmp.ne.s32.totalorder %s3789_s7, %s2799_s5  ;;  %p2804_p2 = scmp.lt.s32.totalorder %s3789_s7, %s4021_s3 }
 0x2c6   : > { %p2805_p3 = scmp.lt.s32.totalorder %s2803_s19, %s2799_s5 }
 0x2c7   : > { %p2801_p0 = pnand %p2800_p10, %p3096_p13 }
 0x2c8   : > { %p2806_p4 = por %p2805_p3, %p2804_p2 }
 0x2c9   : > { %p2802_p1 = pneg %p2801_p0 }
 0x2cb   : > { %p2807_p6 = pnand %p2806_p4, %p2802_p1 }
 0x2cd   : > { %2810 = shalt.err (!%p2807_p6)
}
 0x2ce   : > { %s2933_s9 = smov 128   ;;  %s2934_s17 = smov 8   ;;  %1867 = vst [vmem:[%s3826_s1 + $0x8] sm:$0xff] %v1646_v37  ;;  %1883 = vst [vmem:[%s3826_s1 + $0x88] sm:$0xff] %v1686_v9  ;;  %v1648_v53 = vadd.f32 %v1647_v11, %v3767_v22  ;;  %v1688_v41 = vadd.f32 %v1687_v42, %v3767_v22  ;;  %v1649_v13 = vpop.f32.mrf.mxu0  ;;  %v1689_v40 = vpop.f32.mrf.mxu1 }
 0x2cf   : > { %2364 = dma.vmem_to_hbm [thread:$0]  (%p3096_p13), %s3791_s10, 2048, %s3789_s7, %s1899_s12, %s2933_s9, %s2933_s9, %s2934_s17   ;;  %v1650_v15 = vadd.f32 %v1649_v13, %v3784_v8  ;;  %v1690_v57 = vadd.f32 %v1689_v40, %v3784_v8 }
 0x2d0   : > { %1868 = vst [vmem:[%s3826_s1 + $0x10] sm:$0xff] %v1648_v53  ;;  %1884 = vst [vmem:[%s3826_s1 + $0x90] sm:$0xff] %v1688_v41  ;;  %v1653_v49 = vpop.f32.mrf.mxu0  ;;  %v1693_v56 = vpop.f32.mrf.mxu1  ;;  %s1963_s24 = sshll.u32 %s3826_s1, 4  ;;  %s4022_s12 = sld [smem:[#allocation27_spill]]  ;;  %s3919_s24 = int_to_ptr.vmem [resolvable:$true] %s1963_s24 }
 0x2d1   : > { %1869 = vst [vmem:[%s3826_s1 + $0x18] sm:$0xff] %v1650_v15  ;;  %1885 = vst [vmem:[%s3826_s1 + $0x98] sm:$0xff] %v1690_v57  ;;  %v1654_v5 = vadd.f32 %v1653_v49, %v3767_v22  ;;  %v1694_v43 = vadd.f32 %v1693_v56, %v3767_v22  ;;  %s2811_s28 = scalar_lea.vmem %s3919_s24, 4096  ;;  %s2935_s5 = smov [#allocation13]  }
 0x2d2   : > { %v1655_v47 = vpop.f32.mrf.mxu0  ;;  %v1695_v54 = vpop.f32.mrf.mxu1  ;;  %p2812_p8 = scmp.ne.s32.totalorder %s3919_s24, %s2811_s28  ;;  %s2815_s13 = sshll.u32 %s2935_s5, 4  ;;  %s2816_s13 = int_to_ptr.vmem [resolvable:$false] %s2815_s13 }
 0x2d3   : > { %1870 = vst [vmem:[%s3826_s1 + $0x20] sm:$0xff] %v1654_v5  ;;  %1886 = vst [vmem:[%s3826_s1 + $0xa0] sm:$0xff] %v1694_v43  ;;  %v1656_v28 = vadd.f32 %v1655_v47, %v3784_v8  ;;  %v1696_v25 = vadd.f32 %v1695_v54, %v3784_v8  ;;  %s2817_s22 = scalar_lea.vmem %s2816_s13, 8192  ;;  %p2818_p7 = scmp.lt.s32.totalorder %s3919_s24, %s2816_s13 }
 0x2d4   : > { %v1657_v29 = vpop.f32.mrf.mxu0  ;;  %v1697_v26 = vpop.f32.mrf.mxu1  ;;  %p2813_p11 = pnand %p2812_p8, %p3096_p13  ;;  %p2819_p9 = scmp.lt.s32.totalorder %s2817_s22, %s2811_s28 }
 0x2d5   : > { %1871 = vst [vmem:[%s3826_s1 + $0x28] sm:$0xff] %v1656_v28  ;;  %1887 = vst [vmem:[%s3826_s1 + $0xa8] sm:$0xff] %v1696_v25  ;;  %v1658_v46 = vadd.f32 %v1657_v29, %v3767_v22  ;;  %v1698_v62 = vadd.f32 %v1697_v26, %v3767_v22 }
 0x2d6   : > { %v1659_v63 = vpop.f32.mrf.mxu0  ;;  %v1699_v6 = vpop.f32.mrf.mxu1  ;;  %s3917_s29 = scalar_lea.hbm %s4022_s12, %s2291_s2  ;;  %p2814_p5 = pneg %p2813_p11 }
 0x2d7   : > { %1872 = vst [vmem:[%s3826_s1 + $0x30] sm:$0xff] %v1658_v46  ;;  %1888 = vst [vmem:[%s3826_s1 + $0xb0] sm:$0xff] %v1698_v62  ;;  %v1660_v14 = vadd.f32 %v1659_v63, %v3784_v8  ;;  %v1700_v23 = vadd.f32 %v1699_v6, %v3784_v8  ;;  %p2820_p12 = por %p2819_p9, %p2818_p7 }
 0x2d8   : > { %v1663_v52 = vpop.f32.mrf.mxu0  ;;  %v1703_v17 = vpop.f32.mrf.mxu1 }
 0x2d9   : > { %1873 = vst [vmem:[%s3826_s1 + $0x38] sm:$0xff] %v1660_v14  ;;  %1889 = vst [vmem:[%s3826_s1 + $0xb8] sm:$0xff] %v1700_v23  ;;  %v1664_v1 = vadd.f32 %v1663_v52, %v3767_v22  ;;  %v1704_v55 = vadd.f32 %v1703_v17, %v3767_v22  ;;  %p2821_p10 = pnand %p2820_p12, %p2814_p5 }
 0x2da   : > { %v1665_v3 = vpop.f32.mrf.mxu0  ;;  %v1705_v12 = vpop.f32.mrf.mxu1 }
 0x2db   : > { %1874 = vst [vmem:[%s3826_s1 + $0x40] sm:$0xff] %v1664_v1  ;;  %1890 = vst [vmem:[%s3826_s1 + $0xc0] sm:$0xff] %v1704_v55  ;;  %v1666_v31 = vadd.f32 %v1665_v3, %v3784_v8  ;;  %v1706_v32 = vadd.f32 %v1705_v12, %v3784_v8 }
 0x2dc   : > { %v1667_v20 = vpop.f32.mrf.mxu0  ;;  %v1707_v27 = vpop.f32.mrf.mxu1 }
 0x2dd   : > { %1875 = vst [vmem:[%s3826_s1 + $0x48] sm:$0xff] %v1666_v31  ;;  %1891 = vst [vmem:[%s3826_s1 + $0xc8] sm:$0xff] %v1706_v32  ;;  %v1668_v4 = vadd.f32 %v1667_v20, %v3767_v22  ;;  %v1708_v48 = vadd.f32 %v1707_v27, %v3767_v22 }
 0x2de   : > { %v1669_v10 = vpop.f32.mrf.mxu0  ;;  %v1709_v0 = vpop.f32.mrf.mxu1 }
 0x2df   : > { %1876 = vst [vmem:[%s3826_s1 + $0x50] sm:$0xff] %v1668_v4  ;;  %1892 = vst [vmem:[%s3826_s1 + $0xd0] sm:$0xff] %v1708_v48  ;;  %v1670_v24 = vadd.f32 %v1669_v10, %v3784_v8  ;;  %v1710_v2 = vadd.f32 %v1709_v0, %v3784_v8 }
 0x2e0   : > { %v1673_v18 = vpop.f32.mrf.mxu0  ;;  %v1713_v7 = vpop.f32.mrf.mxu1 }
 0x2e1   : > { %1877 = vst [vmem:[%s3826_s1 + $0x58] sm:$0xff] %v1670_v24  ;;  %1893 = vst [vmem:[%s3826_s1 + $0xd8] sm:$0xff] %v1710_v2  ;;  %v1674_v30 = vadd.f32 %v1673_v18, %v3767_v22  ;;  %v1714_v34 = vadd.f32 %v1713_v7, %v3767_v22 }
 0x2e2   : > { %v1675_v33 = vpop.f32.mrf.mxu0  ;;  %v1715_v35 = vpop.f32.mrf.mxu1 }
 0x2e3   : > { %1878 = vst [vmem:[%s3826_s1 + $0x60] sm:$0xff] %v1674_v30  ;;  %1894 = vst [vmem:[%s3826_s1 + $0xe0] sm:$0xff] %v1714_v34  ;;  %v1676_v36 = vadd.f32 %v1675_v33, %v3784_v8  ;;  %v1716_v38 = vadd.f32 %v1715_v35, %v3784_v8 }
 0x2e4   : > { %v1677_v16 = vpop.f32.mrf.mxu0  ;;  %v1717_v59 = vpop.f32.mrf.mxu1 }
 0x2e5   : > { %1879 = vst [vmem:[%s3826_s1 + $0x68] sm:$0xff] %v1676_v36  ;;  %1895 = vst [vmem:[%s3826_s1 + $0xe8] sm:$0xff] %v1716_v38  ;;  %v1678_v44 = vadd.f32 %v1677_v16, %v3767_v22  ;;  %v1718_v61 = vadd.f32 %v1717_v59, %v3767_v22 }
 0x2e6   : > { %v1679_v21 = vpop.f32.mrf.mxu0  ;;  %v1719_v58 = vpop.f32.mrf.mxu1 }
 0x2e7   : > { %1880 = vst [vmem:[%s3826_s1 + $0x70] sm:$0xff] %v1678_v44  ;;  %1896 = vst [vmem:[%s3826_s1 + $0xf0] sm:$0xff] %v1718_v61  ;;  %v1680_v19 = vadd.f32 %v1679_v21, %v3784_v8  ;;  %v1720_v45 = vadd.f32 %v1719_v58, %v3784_v8 }
 0x2e9   : > { %1881 = vst [vmem:[%s3826_s1 + $0x78] sm:$0xff] %v1680_v19  ;;  %1897 = vst [vmem:[%s3826_s1 + $0xf8] sm:$0xff] %v1720_v45 }
 0x2ea   : > { %2824 = shalt.err (!%p2821_p10)
}
 0x2eb   : > { %s2825_s2 = scalar_lea.hbm %s3917_s29, 4096  ;;  %s2829_s19 = scalar_lea.hbm %s4022_s12, 16384 }
 0x2ec   : > { %p2826_p0 = scmp.ne.s32.totalorder %s3917_s29, %s2825_s2  ;;  %p2830_p3 = scmp.lt.s32.totalorder %s3917_s29, %s4022_s12 }
 0x2ed   : > { %p2831_p4 = scmp.lt.s32.totalorder %s2829_s19, %s2825_s2 }
 0x2ee   : > { %p2827_p1 = pnand %p2826_p0, %p3096_p13 }
 0x2ef   : > { %p2832_p6 = por %p2831_p4, %p2830_p3 }
 0x2f0   : > { %p2828_p2 = pneg %p2827_p1 }
 0x2f2   : > { %p2833_p8 = pnand %p2832_p6, %p2828_p2 }
 0x2f4   : > { %2836 = shalt.err (!%p2833_p8)
}
 0x2f5   : > { %2366 = dma.vmem_to_hbm [thread:$0]  (%p3096_p13), %s3919_s24, 4096, %s3917_s29, %s3798_s11, %s2930_s23, %s2930_s23, %s2931_s15  }
 0x2f6 PF: > { %s4023_s9 = sld [smem:[#allocation19_spill]]  ;;  %p2401_p11 = scmp.ge.s32.totalorder %s2919_s8, 2 }
 0x2f7   : > { %s4024_s17 = sld [smem:[#allocation21_spill]] }
 0x2fc   : > { %s1978_s10 = sand.u32 1, %s4023_s9  }
 0x2fd   : > { %p4025_p5 = scmp.ne.s32.totalorder %s4024_s17, 0  ;;  %s1979_s7 = scalar_lea.sflag [#allocation4], %s1978_s10 }
 0x2ff   : > { %p2385_p7 = pnand %p2401_p11, %p4025_p5 }
 0x301   : > { %p2386_p9 = pneg %p2385_p7 }
 0x303   : > { %2882 = dma.done.wait (%p2386_p9), %s1979_s7, 2048  }
 0x304   : > { %2884 = vsyncadd (%p2386_p9), %s1979_s7, 4294965248  ;;  %s4026_s18 = sadd.s32 4294967294, %s2919_s8  }
 0x305   : > { %s1987_s28 = sand.u32 1, %s4026_s18  }
 0x306   : > { %s1988_s5 = scalar_lea.sflag [#allocation12], %s1987_s28 }
 0x307   : > { %2886 = dma.done.wait (%p2386_p9), %s1988_s5, 8192  }
 0x308   : > { %2888 = vsyncadd (%p2386_p9), %s1988_s5, 4294959104  ;;  %s29_s8 = sadd.s32 1, %s2919_s8   ;;  %s4027_s27 = sld [smem:[#allocation20_spill]] }
 0x309   : > { %p26_p13 = scmp.ge.s32.totalorder %s29_s8, 6   ;;  %s4028_s29 = sld [smem:[#allocation22_spill]] }
 0x30a   : > { %s4029_s24 = smov %s2895_s25  ;;  %s4030_s25 = smov %s2899_s26 }
 0x30b   : > { %s4031_s26 = smov %s3113_s14  ;;  %s4032_s28 = smov %s2915_s30 }
 0x30c   : > { %s4033_s30 = smov %s4039_s16  ;;  %28 = sbr.rel (!%p26_p13) target bundleno = 17 (0x11), region = 129 }
 0x311   :  { %2002 = vsyncpa [#allocation3], 1 }
 0x312   :  { %2004 = vsyncpa [#allocation3 + $0x1], 1 }
 0x313   :  { %2005 = vsyncpa [#allocation6], 1 }
 0x314   :  { %2006 = vsyncpa [#allocation9], 1 }
 0x315   :  { %2007 = vsyncpa [#allocation4], 1 }
 0x316   :  { %2009 = vsyncpa [#allocation4 + $0x1], 1 }
 0x317   :  { %2010 = vsyncpa [#allocation12], 1 }
 0x318   :  { %2012 = vsyncpa [#allocation12 + $0x1], 1 }

</bundles_post_ra>
